<compile_context>
chip_gen: v6e
topology: v6e:2x2x1
jax: 0.10.0
libtpu: 0.0.40
codegen_flags: <defaults>
</compile_context>

<pallas_src>
import functools
import math

import jax
import jax.numpy as jnp
from jax.experimental import pallas as pl
from jax.experimental.pallas import tpu as pltpu


# ---------------------------------------------------------------------------
# Fused CTBlock kernel (one grid step = one batch sample)
# ---------------------------------------------------------------------------

def _ctblock_kernel(x_ref, wqkv_ref, bqkv_ref, s1_ref, t1_ref,
                    wcfe_ref, shcfe_ref, w3_ref, s2_ref, sh2_ref,
                    o_ref, attn_scr, *, H, T, d, scale):
    Td = T * d
    bf16, f32 = jnp.bfloat16, jnp.float32

    x = x_ref[0]                                               # (P, T*C) f32, lanes = (h, t, d)

    # --- QKV 1x1 conv as a block-diag-over-T dense matmul (bf16 MXU, f32 accum)
    qkv = jnp.dot(x.astype(bf16), wqkv_ref[...],
                  preferred_element_type=f32) + bqkv_ref[...]  # (P, 3*T*C)

    # --- multi-head attention: all heads of this sample inside one grid step
    #     (H is small -> static unroll; each head's q/k/v is a contiguous lane slice)
    for h in range(H):
        q = qkv[:, (0 * H + h) * Td:(0 * H + h + 1) * Td].astype(bf16)   # (P, d*T)
        k = qkv[:, (1 * H + h) * Td:(1 * H + h + 1) * Td].astype(bf16)
        v = qkv[:, (2 * H + h) * Td:(2 * H + h + 1) * Td].astype(bf16)
        dots = jax.lax.dot_general(q, k, (((1,), (1,)), ((), ())),
                                   preferred_element_type=f32) * scale   # (P, P)
        m = jnp.max(dots, axis=-1, keepdims=True)
        e = jnp.exp(dots - m)
        p = e * pl.reciprocal(jnp.sum(e, axis=-1, keepdims=True), approx=True)
        attn_scr[:, h * Td:(h + 1) * Td] = jnp.dot(
            p.astype(bf16), v, preferred_element_type=f32)
    o_attn = attn_scr[...]                                     # (P, T*C), lanes = (h, t, d)

    # --- residual + bn1 (folded per-lane affine)
    y1 = (o_attn + x) * s1_ref[...] + t1_ref[...]

    # --- CFE: conv(1,3)+conv(1,5)+concat+BN (scale folded into weight) in one matmul, then ELU
    a = jnp.dot(y1.astype(bf16), wcfe_ref[...],
                preferred_element_type=f32) + shcfe_ref[...]   # (P, T*E)
    a = jnp.where(a > 0, a, jnp.exp(jnp.minimum(a, 0.0)) - 1.0)          # ELU

    # --- conv3 (1x1, bn2 scale folded into weight) + bn2 residual & shift
    o_ref[0] = (jnp.dot(a.astype(bf16), w3_ref[...], preferred_element_type=f32)
                + y1 * s2_ref[...] + sh2_ref[...])


# ---------------------------------------------------------------------------
# One-time parameter preprocessing (pure layout / BN folding, done in XLA glue)
# ---------------------------------------------------------------------------

def _prepare_constants(params, C, H, T):
    f32, bf16 = jnp.float32, jnp.bfloat16
    d = C // H
    L = T * C
    E = params['w_c3'].shape[0]
    eyeT = jnp.eye(T, dtype=f32)

    def lane_vec(v):                     # per-channel (C,) -> per-lane (1, L), lanes = (h, t, d)
        return jnp.broadcast_to(v.reshape(H, 1, d), (H, T, d)).reshape(1, L).astype(f32)

    # QKV: rows = (h_in, t, d_in), cols = (comp, h_out, t, d_out) so that each head's
    # q/k/v is a contiguous lane slice already in the (t, d)-flattened attention layout.
    w5 = params['w_qkv'].reshape(H, d, 3, H, d)                       # (hi, di, comp, ho, do)
    wqkv = jnp.einsum('abqce,ts->atbqcse', w5, eyeT).reshape(L, 3 * L).astype(bf16)
    bqkv = jnp.broadcast_to(params['b_qkv'].reshape(3, H, 1, d),
                            (3, H, T, d)).reshape(1, 3 * L).astype(f32)

    # bn1 folded affine
    s1, t1 = params['bn1']
    s1_row, t1_row = lane_vec(s1), lane_vec(t1)

    # CFE conv1 (1,3) + conv2 (1,5) + concat + bn_cfe scale as one banded dense matmul.
    s_cfe, t_cfe = params['bn_cfe']

    def conv_band(w):                                                  # (K, C, E/2) -> (C, Tin, Tout, E/2)
        K = w.shape[0]
        pad = K // 2
        band = jnp.stack([jnp.eye(T, k=pad - k, dtype=f32) for k in range(K)])
        return jnp.einsum('kce,kio->cioe', w, band)

    dcat = jnp.concatenate([conv_band(params['w_c1']), conv_band(params['w_c2'])], axis=-1)
    dcat = dcat * s_cfe.reshape(1, 1, 1, E)                            # fold BN scale
    wcfe = dcat.reshape(H, d, T, T, E).transpose(0, 2, 1, 3, 4).reshape(L, T * E).astype(bf16)
    b_cat = jnp.concatenate([params['b_c1'], params['b_c2']])
    shcfe = jnp.broadcast_to((b_cat * s_cfe + t_cfe).reshape(1, E),
                             (T, E)).reshape(1, T * E).astype(f32)

    # conv3 (1x1, E->C) with bn2 scale folded; block-diagonal over T; cols = (h, t, d).
    s2, t2 = params['bn2']
    w3r = (params['w_c3'] * s2.reshape(1, C)).reshape(E, H, d)         # (e, ho, do)
    w3 = jnp.einsum('ehf,io->iehof', w3r, eyeT).reshape(T * E, L).astype(bf16)
    s2_row = lane_vec(s2)
    sh2_row = lane_vec(params['b_c3'] * s2 + t2)

    return wqkv, bqkv, s1_row, t1_row, wcfe, shcfe, w3, s2_row, sh2_row


# ---------------------------------------------------------------------------
# CTBlock forward
# ---------------------------------------------------------------------------

def ct_block_forward(x_nchw, params, num_heads):
    B, C, P, T = x_nchw.shape
    H = num_heads
    d = C // H
    L = T * C
    E = params['w_c3'].shape[0]
    scale = 1.0 / math.sqrt(d * 32)

    consts = _prepare_constants(params, C, H, T)

    # NCHW -> (B, P, T*C) with lane order (head, t, d); boundary layout plumbing in XLA.
    x_hs = x_nchw.reshape(B, H, d, P, T).transpose(0, 3, 1, 4, 2).reshape(B, P, L)

    def full(shape):
        return pl.BlockSpec(shape, lambda b, _nd=len(shape): (0,) * _nd)

    y2 = pl.pallas_call(
        functools.partial(_ctblock_kernel, H=H, T=T, d=d, scale=scale),
        out_shape=jax.ShapeDtypeStruct((B, P, L), jnp.float32),
        grid=(B,),
        in_specs=[
            pl.BlockSpec((1, P, L), lambda b: (b, 0, 0)),   # x (one sample per step)
            full((L, 3 * L)),                               # fused QKV weight (bf16, resident)
            full((1, 3 * L)),                               # QKV bias
            full((1, L)), full((1, L)),                     # bn1 scale / shift
            full((L, T * E)), full((1, T * E)),             # fused conv1+conv2 weight / shift
            full((T * E, L)),                               # conv3 weight (bn2 scale folded)
            full((1, L)), full((1, L)),                     # bn2 scale / shift
        ],
        out_specs=pl.BlockSpec((1, P, L), lambda b: (b, 0, 0)),
        scratch_shapes=[pltpu.VMEM((P, L), jnp.float32)],
        compiler_params=pltpu.CompilerParams(dimension_semantics=("parallel",)),
    )(x_hs, *consts)

    # back to NCHW
    return y2.reshape(B, P, H, T, d).transpose(0, 2, 4, 1, 3).reshape(B, C, P, T)


# ---------------------------------------------------------------------------
# Pure-JAX (XLA, f32) reference for validation
# ---------------------------------------------------------------------------

def ct_block_reference(x, params, num_heads):
    B, C, P, T = x.shape
    H, d = num_heads, C // num_heads
    scale = 1.0 / math.sqrt(d * 32)
    dn = ('NCHW', 'OIHW', 'NCHW')

    def bn(z, sc_sh):
        s, t = sc_sh
        return z * s.reshape(1, -1, 1, 1) + t.reshape(1, -1, 1, 1)

    w_qkv = params['w_qkv'].T.reshape(3 * C, C, 1, 1)
    qkv = jax.lax.conv_general_dilated(x, w_qkv, (1, 1), 'SAME', dimension_numbers=dn)
    qkv = qkv + params['b_qkv'].reshape(1, -1, 1, 1)
    qkv = qkv.reshape(B, 3, H, d, P, T)
    q2 = jnp.transpose(qkv[:, 0], (0, 1, 3, 2, 4)).reshape(B, H, P, d * T)
    k2 = jnp.transpose(qkv[:, 1], (0, 1, 3, 2, 4)).reshape(B, H, P, d * T)
    v2 = jnp.transpose(qkv[:, 2], (0, 1, 3, 2, 4)).reshape(B, H, P, d * T)
    dots = jnp.einsum('bhpe,bhqe->bhpq', q2, k2) * scale
    attn = jax.nn.softmax(dots, axis=-1)
    o = jnp.einsum('bhpq,bhqe->bhpe', attn, v2).reshape(B, H, P, d, T)
    o = jnp.transpose(o, (0, 1, 3, 2, 4)).reshape(B, C, P, T)

    x1 = bn(o + x, params['bn1'])

    def conv1k(z, w, b):
        K, Cin, Cout = w.shape
        wo = jnp.transpose(w, (2, 1, 0)).reshape(Cout, Cin, 1, K)
        return (jax.lax.conv_general_dilated(z, wo, (1, 1), 'SAME', dimension_numbers=dn)
                + b.reshape(1, -1, 1, 1))

    c1 = conv1k(x1, params['w_c1'], params['b_c1'])
    c2 = conv1k(x1, params['w_c2'], params['b_c2'])
    cc = jnp.concatenate([c1, c2], axis=1)
    a = bn(cc, params['bn_cfe'])
    a = jnp.where(a > 0, a, jnp.exp(a) - 1.0)
    w3 = params['w_c3'].T.reshape(C, -1, 1, 1)
    cfe = (jax.lax.conv_general_dilated(a, w3, (1, 1), 'SAME', dimension_numbers=dn)
           + params['b_c3'].reshape(1, -1, 1, 1))
    return bn(cfe + x1, params['bn2'])


# ---------------------------------------------------------------------------
# Deterministic parameter init
# ---------------------------------------------------------------------------

def init_params(key, C, E):
    ks = jax.random.split(key, 11)

    def n(k, shape, s=0.1):
        return jax.random.normal(k, shape, jnp.float32) * s

    def bn(k, c):
        k1, k2, k3, k4 = jax.random.split(k, 4)
        gamma = jax.random.uniform(k1, (c,), jnp.float32, 0.5, 1.5)
        beta = n(k2, (c,))
        mean = n(k3, (c,))
        var = jax.random.uniform(k4, (c,), jnp.float32, 0.5, 1.5)
        eps = 1e-5
        scale = gamma / jnp.sqrt(var + eps)
        shift = beta - mean * scale
        return scale, shift

    return dict(
        w_qkv=n(ks[0], (C, 3 * C)),        # conv_qkv 1x1: (Cin, 3C)
        b_qkv=n(ks[1], (3 * C,)),
        bn1=bn(ks[2], C),
        w_c1=n(ks[3], (3, C, E // 2)),     # CFE conv1 (1,3): (K, Cin, Cout)
        b_c1=n(ks[4], (E // 2,)),
        w_c2=n(ks[5], (5, C, E // 2)),     # CFE conv2 (1,5)
        b_c2=n(ks[6], (E // 2,)),
        bn_cfe=bn(ks[7], E),
        w_c3=n(ks[8], (E, C)),             # CFE conv3 1x1
        b_c3=n(ks[9], (C,)),
        bn2=bn(ks[10], C),
    )


if __name__ == "__main__":
    B, C, P, T = 2, 32, 8, 16
    num_heads, E = 8, 16

    key = jax.random.PRNGKey(0)
    kx, kp = jax.random.split(key)
    x = jax.random.normal(kx, (B, C, P, T), jnp.float32)
    params = init_params(kp, C, E)

    fwd = jax.jit(functools.partial(ct_block_forward, num_heads=num_heads))
    out = jax.block_until_ready(fwd(x, params))
    assert out.shape == (B, C, P, T)

    ref = ct_block_reference(x, params, num_heads)
    max_err = float(jnp.max(jnp.abs(out - ref)))
    # tolerance sized for bf16 MXU operands (f32 accumulation) vs the pure-f32 reference
    assert jnp.allclose(out, ref, atol=5e-2, rtol=5e-2), max_err

    print("KERNEL_OK")
</pallas_src>

<mosaic_0001>
module attributes {stable_mosaic.version = 11 : i64} {
  func.func @_ctblock_kernel(%arg0: i32, %arg1: memref<1x8x512xf32, #tpu.memory_space<vmem>>, %arg2: memref<512x1536xbf16, #tpu.memory_space<vmem>>, %arg3: memref<1x1536xf32, #tpu.memory_space<vmem>>, %arg4: memref<1x512xf32, #tpu.memory_space<vmem>>, %arg5: memref<1x512xf32, #tpu.memory_space<vmem>>, %arg6: memref<512x256xbf16, #tpu.memory_space<vmem>>, %arg7: memref<1x256xf32, #tpu.memory_space<vmem>>, %arg8: memref<256x512xbf16, #tpu.memory_space<vmem>>, %arg9: memref<1x512xf32, #tpu.memory_space<vmem>>, %arg10: memref<1x512xf32, #tpu.memory_space<vmem>>, %arg11: memref<1x8x512xf32, #tpu.memory_space<vmem>>, %arg12: memref<8x512xf32, #tpu.memory_space<vmem>>) attributes {dimension_semantics = [#tpu.dimension_semantics<parallel>], iteration_bounds = array<i64: 2>, scalar_prefetch = 0 : i64, scratch_operands = 1 : i64, tpu.core_type = #tpu.core_type<tc>, window_params = [{transform_indices = @transform_0, window_bounds = array<i64: 1, 8, 512>}, {pipeline_mode = #tpu.pipeline_mode<synchronous>, transform_indices = @transform_1, window_bounds = array<i64: 512, 1536>}, {pipeline_mode = #tpu.pipeline_mode<synchronous>, transform_indices = @transform_2, window_bounds = array<i64: 1, 1536>}, {pipeline_mode = #tpu.pipeline_mode<synchronous>, transform_indices = @transform_3, window_bounds = array<i64: 1, 512>}, {pipeline_mode = #tpu.pipeline_mode<synchronous>, transform_indices = @transform_4, window_bounds = array<i64: 1, 512>}, {pipeline_mode = #tpu.pipeline_mode<synchronous>, transform_indices = @transform_5, window_bounds = array<i64: 512, 256>}, {pipeline_mode = #tpu.pipeline_mode<synchronous>, transform_indices = @transform_6, window_bounds = array<i64: 1, 256>}, {pipeline_mode = #tpu.pipeline_mode<synchronous>, transform_indices = @transform_7, window_bounds = array<i64: 256, 512>}, {pipeline_mode = #tpu.pipeline_mode<synchronous>, transform_indices = @transform_8, window_bounds = array<i64: 1, 512>}, {pipeline_mode = #tpu.pipeline_mode<synchronous>, transform_indices = @transform_9, window_bounds = array<i64: 1, 512>}, {transform_indices = @transform_10, window_bounds = array<i64: 1, 8, 512>}]} {
    %c0 = arith.constant 0 : index
    %c0_0 = arith.constant 0 : index
    %c0_1 = arith.constant 0 : index
    %0 = vector.load %arg1[%c0, %c0_0, %c0_1] : memref<1x8x512xf32, #tpu.memory_space<vmem>>, vector<1x8x512xf32>
    %1 = vector.shape_cast %0 : vector<1x8x512xf32> to vector<8x512xf32>
    %2 = arith.truncf %1 : vector<8x512xf32> to vector<8x512xbf16>
    %c0_2 = arith.constant 0 : index
    %c0_3 = arith.constant 0 : index
    %3 = vector.load %arg2[%c0_2, %c0_3] : memref<512x1536xbf16, #tpu.memory_space<vmem>>, vector<512x1536xbf16>
    %cst = arith.constant dense<0.000000e+00> : vector<8x1536xf32>
    %4 = tpu.matmul %2, %3, %cst {dimension_numbers = #tpu.dot_dimension_numbers<[1], [0], [0], [1], [0, 0, 1, 1], [], []>} : vector<8x512xbf16>, vector<512x1536xbf16>, vector<8x1536xf32> -> vector<8x1536xf32>
    %c0_4 = arith.constant 0 : index
    %c0_5 = arith.constant 0 : index
    %5 = vector.load %arg3[%c0_4, %c0_5] : memref<1x1536xf32, #tpu.memory_space<vmem>>, vector<1x1536xf32>
    %6 = vector.broadcast %5 : vector<1x1536xf32> to vector<8x1536xf32>
    %7 = arith.addf %4, %6 : vector<8x1536xf32>
    %8 = vector.extract_strided_slice %7 {offsets = [0, 0], sizes = [8, 64], strides = [1, 1]} : vector<8x1536xf32> to vector<8x64xf32>
    %9 = arith.truncf %8 : vector<8x64xf32> to vector<8x64xbf16>
    %10 = vector.extract_strided_slice %7 {offsets = [0, 512], sizes = [8, 64], strides = [1, 1]} : vector<8x1536xf32> to vector<8x64xf32>
    %11 = arith.truncf %10 : vector<8x64xf32> to vector<8x64xbf16>
    %12 = vector.extract_strided_slice %7 {offsets = [0, 1024], sizes = [8, 64], strides = [1, 1]} : vector<8x1536xf32> to vector<8x64xf32>
    %13 = arith.truncf %12 : vector<8x64xf32> to vector<8x64xbf16>
    %cst_6 = arith.constant dense<0.000000e+00> : vector<8x8xf32>
    %14 = tpu.matmul %9, %11, %cst_6 {dimension_numbers = #tpu.dot_dimension_numbers<[1], [1], [0], [0], [0, 0, 1, 0], [], []>} : vector<8x64xbf16>, vector<8x64xbf16>, vector<8x8xf32> -> vector<8x8xf32>
    %cst_7 = arith.constant 0.0883883461 : f32
    %15 = vector.broadcast %cst_7 : f32 to vector<8x8xf32>
    %16 = arith.mulf %14, %15 : vector<8x8xf32>
    %cst_8 = arith.constant dense<0xFF800000> : vector<8xf32>
    %17 = vector.multi_reduction <maximumf>, %16, %cst_8 [1] : vector<8x8xf32> to vector<8xf32>
    %18 = vector.shape_cast %17 : vector<8xf32> to vector<8x1xf32>
    %19 = vector.broadcast %18 : vector<8x1xf32> to vector<8x8xf32>
    %20 = arith.subf %16, %19 : vector<8x8xf32>
    %21 = math.exp %20 : vector<8x8xf32>
    %cst_9 = arith.constant dense<0.000000e+00> : vector<8xf32>
    %22 = vector.multi_reduction <add>, %21, %cst_9 [1] : vector<8x8xf32> to vector<8xf32>
    %23 = vector.shape_cast %22 : vector<8xf32> to vector<8x1xf32>
    %24 = tpu.reciprocal %23 {approx = true} : vector<8x1xf32> -> vector<8x1xf32>
    %25 = vector.broadcast %24 : vector<8x1xf32> to vector<8x8xf32>
    %26 = arith.mulf %21, %25 : vector<8x8xf32>
    %27 = arith.truncf %26 : vector<8x8xf32> to vector<8x8xbf16>
    %cst_10 = arith.constant dense<0.000000e+00> : vector<8x64xf32>
    %28 = tpu.matmul %27, %13, %cst_10 {dimension_numbers = #tpu.dot_dimension_numbers<[1], [0], [0], [1], [0, 0, 1, 1], [], []>} : vector<8x8xbf16>, vector<8x64xbf16>, vector<8x64xf32> -> vector<8x64xf32>
    %c0_11 = arith.constant 0 : index
    %c0_12 = arith.constant 0 : index
    %29 = vector.load %arg12[%c0_11, %c0_12] : memref<8x512xf32, #tpu.memory_space<vmem>>, vector<8x64xf32>
    tpu.vector_store %arg12[%c0_11, %c0_12], %28 {strides = array<i32>} : memref<8x512xf32, #tpu.memory_space<vmem>>, vector<8x64xf32>,
    %30 = vector.extract_strided_slice %7 {offsets = [0, 64], sizes = [8, 64], strides = [1, 1]} : vector<8x1536xf32> to vector<8x64xf32>
    %31 = arith.truncf %30 : vector<8x64xf32> to vector<8x64xbf16>
    %32 = vector.extract_strided_slice %7 {offsets = [0, 576], sizes = [8, 64], strides = [1, 1]} : vector<8x1536xf32> to vector<8x64xf32>
    %33 = arith.truncf %32 : vector<8x64xf32> to vector<8x64xbf16>
    %34 = vector.extract_strided_slice %7 {offsets = [0, 1088], sizes = [8, 64], strides = [1, 1]} : vector<8x1536xf32> to vector<8x64xf32>
    %35 = arith.truncf %34 : vector<8x64xf32> to vector<8x64xbf16>
    %cst_13 = arith.constant dense<0.000000e+00> : vector<8x8xf32>
    %36 = tpu.matmul %31, %33, %cst_13 {dimension_numbers = #tpu.dot_dimension_numbers<[1], [1], [0], [0], [0, 0, 1, 0], [], []>} : vector<8x64xbf16>, vector<8x64xbf16>, vector<8x8xf32> -> vector<8x8xf32>
    %cst_14 = arith.constant 0.0883883461 : f32
    %37 = vector.broadcast %cst_14 : f32 to vector<8x8xf32>
    %38 = arith.mulf %36, %37 : vector<8x8xf32>
    %cst_15 = arith.constant dense<0xFF800000> : vector<8xf32>
    %39 = vector.multi_reduction <maximumf>, %38, %cst_15 [1] : vector<8x8xf32> to vector<8xf32>
    %40 = vector.shape_cast %39 : vector<8xf32> to vector<8x1xf32>
    %41 = vector.broadcast %40 : vector<8x1xf32> to vector<8x8xf32>
    %42 = arith.subf %38, %41 : vector<8x8xf32>
    %43 = math.exp %42 : vector<8x8xf32>
    %cst_16 = arith.constant dense<0.000000e+00> : vector<8xf32>
    %44 = vector.multi_reduction <add>, %43, %cst_16 [1] : vector<8x8xf32> to vector<8xf32>
    %45 = vector.shape_cast %44 : vector<8xf32> to vector<8x1xf32>
    %46 = tpu.reciprocal %45 {approx = true} : vector<8x1xf32> -> vector<8x1xf32>
    %47 = vector.broadcast %46 : vector<8x1xf32> to vector<8x8xf32>
    %48 = arith.mulf %43, %47 : vector<8x8xf32>
    %49 = arith.truncf %48 : vector<8x8xf32> to vector<8x8xbf16>
    %cst_17 = arith.constant dense<0.000000e+00> : vector<8x64xf32>
    %50 = tpu.matmul %49, %35, %cst_17 {dimension_numbers = #tpu.dot_dimension_numbers<[1], [0], [0], [1], [0, 0, 1, 1], [], []>} : vector<8x8xbf16>, vector<8x64xbf16>, vector<8x64xf32> -> vector<8x64xf32>
    %c0_18 = arith.constant 0 : index
    %c64 = arith.constant 64 : index
    %51 = vector.load %arg12[%c0_18, %c64] : memref<8x512xf32, #tpu.memory_space<vmem>>, vector<8x64xf32>
    tpu.vector_store %arg12[%c0_18, %c64], %50 {strides = array<i32>} : memref<8x512xf32, #tpu.memory_space<vmem>>, vector<8x64xf32>,
    %52 = vector.extract_strided_slice %7 {offsets = [0, 128], sizes = [8, 64], strides = [1, 1]} : vector<8x1536xf32> to vector<8x64xf32>
    %53 = arith.truncf %52 : vector<8x64xf32> to vector<8x64xbf16>
    %54 = vector.extract_strided_slice %7 {offsets = [0, 640], sizes = [8, 64], strides = [1, 1]} : vector<8x1536xf32> to vector<8x64xf32>
    %55 = arith.truncf %54 : vector<8x64xf32> to vector<8x64xbf16>
    %56 = vector.extract_strided_slice %7 {offsets = [0, 1152], sizes = [8, 64], strides = [1, 1]} : vector<8x1536xf32> to vector<8x64xf32>
    %57 = arith.truncf %56 : vector<8x64xf32> to vector<8x64xbf16>
    %cst_19 = arith.constant dense<0.000000e+00> : vector<8x8xf32>
    %58 = tpu.matmul %53, %55, %cst_19 {dimension_numbers = #tpu.dot_dimension_numbers<[1], [1], [0], [0], [0, 0, 1, 0], [], []>} : vector<8x64xbf16>, vector<8x64xbf16>, vector<8x8xf32> -> vector<8x8xf32>
    %cst_20 = arith.constant 0.0883883461 : f32
    %59 = vector.broadcast %cst_20 : f32 to vector<8x8xf32>
    %60 = arith.mulf %58, %59 : vector<8x8xf32>
    %cst_21 = arith.constant dense<0xFF800000> : vector<8xf32>
    %61 = vector.multi_reduction <maximumf>, %60, %cst_21 [1] : vector<8x8xf32> to vector<8xf32>
    %62 = vector.shape_cast %61 : vector<8xf32> to vector<8x1xf32>
    %63 = vector.broadcast %62 : vector<8x1xf32> to vector<8x8xf32>
    %64 = arith.subf %60, %63 : vector<8x8xf32>
    %65 = math.exp %64 : vector<8x8xf32>
    %cst_22 = arith.constant dense<0.000000e+00> : vector<8xf32>
    %66 = vector.multi_reduction <add>, %65, %cst_22 [1] : vector<8x8xf32> to vector<8xf32>
    %67 = vector.shape_cast %66 : vector<8xf32> to vector<8x1xf32>
    %68 = tpu.reciprocal %67 {approx = true} : vector<8x1xf32> -> vector<8x1xf32>
    %69 = vector.broadcast %68 : vector<8x1xf32> to vector<8x8xf32>
    %70 = arith.mulf %65, %69 : vector<8x8xf32>
    %71 = arith.truncf %70 : vector<8x8xf32> to vector<8x8xbf16>
    %cst_23 = arith.constant dense<0.000000e+00> : vector<8x64xf32>
    %72 = tpu.matmul %71, %57, %cst_23 {dimension_numbers = #tpu.dot_dimension_numbers<[1], [0], [0], [1], [0, 0, 1, 1], [], []>} : vector<8x8xbf16>, vector<8x64xbf16>, vector<8x64xf32> -> vector<8x64xf32>
    %c0_24 = arith.constant 0 : index
    %c128 = arith.constant 128 : index
    %73 = vector.load %arg12[%c0_24, %c128] : memref<8x512xf32, #tpu.memory_space<vmem>>, vector<8x64xf32>
    tpu.vector_store %arg12[%c0_24, %c128], %72 {strides = array<i32>} : memref<8x512xf32, #tpu.memory_space<vmem>>, vector<8x64xf32>,
    %74 = vector.extract_strided_slice %7 {offsets = [0, 192], sizes = [8, 64], strides = [1, 1]} : vector<8x1536xf32> to vector<8x64xf32>
    %75 = arith.truncf %74 : vector<8x64xf32> to vector<8x64xbf16>
    %76 = vector.extract_strided_slice %7 {offsets = [0, 704], sizes = [8, 64], strides = [1, 1]} : vector<8x1536xf32> to vector<8x64xf32>
    %77 = arith.truncf %76 : vector<8x64xf32> to vector<8x64xbf16>
    %78 = vector.extract_strided_slice %7 {offsets = [0, 1216], sizes = [8, 64], strides = [1, 1]} : vector<8x1536xf32> to vector<8x64xf32>
    %79 = arith.truncf %78 : vector<8x64xf32> to vector<8x64xbf16>
    %cst_25 = arith.constant dense<0.000000e+00> : vector<8x8xf32>
    %80 = tpu.matmul %75, %77, %cst_25 {dimension_numbers = #tpu.dot_dimension_numbers<[1], [1], [0], [0], [0, 0, 1, 0], [], []>} : vector<8x64xbf16>, vector<8x64xbf16>, vector<8x8xf32> -> vector<8x8xf32>
    %cst_26 = arith.constant 0.0883883461 : f32
    %81 = vector.broadcast %cst_26 : f32 to vector<8x8xf32>
    %82 = arith.mulf %80, %81 : vector<8x8xf32>
    %cst_27 = arith.constant dense<0xFF800000> : vector<8xf32>
    %83 = vector.multi_reduction <maximumf>, %82, %cst_27 [1] : vector<8x8xf32> to vector<8xf32>
    %84 = vector.shape_cast %83 : vector<8xf32> to vector<8x1xf32>
    %85 = vector.broadcast %84 : vector<8x1xf32> to vector<8x8xf32>
    %86 = arith.subf %82, %85 : vector<8x8xf32>
    %87 = math.exp %86 : vector<8x8xf32>
    %cst_28 = arith.constant dense<0.000000e+00> : vector<8xf32>
    %88 = vector.multi_reduction <add>, %87, %cst_28 [1] : vector<8x8xf32> to vector<8xf32>
    %89 = vector.shape_cast %88 : vector<8xf32> to vector<8x1xf32>
    %90 = tpu.reciprocal %89 {approx = true} : vector<8x1xf32> -> vector<8x1xf32>
    %91 = vector.broadcast %90 : vector<8x1xf32> to vector<8x8xf32>
    %92 = arith.mulf %87, %91 : vector<8x8xf32>
    %93 = arith.truncf %92 : vector<8x8xf32> to vector<8x8xbf16>
    %cst_29 = arith.constant dense<0.000000e+00> : vector<8x64xf32>
    %94 = tpu.matmul %93, %79, %cst_29 {dimension_numbers = #tpu.dot_dimension_numbers<[1], [0], [0], [1], [0, 0, 1, 1], [], []>} : vector<8x8xbf16>, vector<8x64xbf16>, vector<8x64xf32> -> vector<8x64xf32>
    %c0_30 = arith.constant 0 : index
    %c192 = arith.constant 192 : index
    %95 = vector.load %arg12[%c0_30, %c192] : memref<8x512xf32, #tpu.memory_space<vmem>>, vector<8x64xf32>
    tpu.vector_store %arg12[%c0_30, %c192], %94 {strides = array<i32>} : memref<8x512xf32, #tpu.memory_space<vmem>>, vector<8x64xf32>,
    %96 = vector.extract_strided_slice %7 {offsets = [0, 256], sizes = [8, 64], strides = [1, 1]} : vector<8x1536xf32> to vector<8x64xf32>
    %97 = arith.truncf %96 : vector<8x64xf32> to vector<8x64xbf16>
    %98 = vector.extract_strided_slice %7 {offsets = [0, 768], sizes = [8, 64], strides = [1, 1]} : vector<8x1536xf32> to vector<8x64xf32>
    %99 = arith.truncf %98 : vector<8x64xf32> to vector<8x64xbf16>
    %100 = vector.extract_strided_slice %7 {offsets = [0, 1280], sizes = [8, 64], strides = [1, 1]} : vector<8x1536xf32> to vector<8x64xf32>
    %101 = arith.truncf %100 : vector<8x64xf32> to vector<8x64xbf16>
    %cst_31 = arith.constant dense<0.000000e+00> : vector<8x8xf32>
    %102 = tpu.matmul %97, %99, %cst_31 {dimension_numbers = #tpu.dot_dimension_numbers<[1], [1], [0], [0], [0, 0, 1, 0], [], []>} : vector<8x64xbf16>, vector<8x64xbf16>, vector<8x8xf32> -> vector<8x8xf32>
    %cst_32 = arith.constant 0.0883883461 : f32
    %103 = vector.broadcast %cst_32 : f32 to vector<8x8xf32>
    %104 = arith.mulf %102, %103 : vector<8x8xf32>
    %cst_33 = arith.constant dense<0xFF800000> : vector<8xf32>
    %105 = vector.multi_reduction <maximumf>, %104, %cst_33 [1] : vector<8x8xf32> to vector<8xf32>
    %106 = vector.shape_cast %105 : vector<8xf32> to vector<8x1xf32>
    %107 = vector.broadcast %106 : vector<8x1xf32> to vector<8x8xf32>
    %108 = arith.subf %104, %107 : vector<8x8xf32>
    %109 = math.exp %108 : vector<8x8xf32>
    %cst_34 = arith.constant dense<0.000000e+00> : vector<8xf32>
    %110 = vector.multi_reduction <add>, %109, %cst_34 [1] : vector<8x8xf32> to vector<8xf32>
    %111 = vector.shape_cast %110 : vector<8xf32> to vector<8x1xf32>
    %112 = tpu.reciprocal %111 {approx = true} : vector<8x1xf32> -> vector<8x1xf32>
    %113 = vector.broadcast %112 : vector<8x1xf32> to vector<8x8xf32>
    %114 = arith.mulf %109, %113 : vector<8x8xf32>
    %115 = arith.truncf %114 : vector<8x8xf32> to vector<8x8xbf16>
    %cst_35 = arith.constant dense<0.000000e+00> : vector<8x64xf32>
    %116 = tpu.matmul %115, %101, %cst_35 {dimension_numbers = #tpu.dot_dimension_numbers<[1], [0], [0], [1], [0, 0, 1, 1], [], []>} : vector<8x8xbf16>, vector<8x64xbf16>, vector<8x64xf32> -> vector<8x64xf32>
    %c0_36 = arith.constant 0 : index
    %c256 = arith.constant 256 : index
    %117 = vector.load %arg12[%c0_36, %c256] : memref<8x512xf32, #tpu.memory_space<vmem>>, vector<8x64xf32>
    tpu.vector_store %arg12[%c0_36, %c256], %116 {strides = array<i32>} : memref<8x512xf32, #tpu.memory_space<vmem>>, vector<8x64xf32>,
    %118 = vector.extract_strided_slice %7 {offsets = [0, 320], sizes = [8, 64], strides = [1, 1]} : vector<8x1536xf32> to vector<8x64xf32>
    %119 = arith.truncf %118 : vector<8x64xf32> to vector<8x64xbf16>
    %120 = vector.extract_strided_slice %7 {offsets = [0, 832], sizes = [8, 64], strides = [1, 1]} : vector<8x1536xf32> to vector<8x64xf32>
    %121 = arith.truncf %120 : vector<8x64xf32> to vector<8x64xbf16>
    %122 = vector.extract_strided_slice %7 {offsets = [0, 1344], sizes = [8, 64], strides = [1, 1]} : vector<8x1536xf32> to vector<8x64xf32>
    %123 = arith.truncf %122 : vector<8x64xf32> to vector<8x64xbf16>
    %cst_37 = arith.constant dense<0.000000e+00> : vector<8x8xf32>
    %124 = tpu.matmul %119, %121, %cst_37 {dimension_numbers = #tpu.dot_dimension_numbers<[1], [1], [0], [0], [0, 0, 1, 0], [], []>} : vector<8x64xbf16>, vector<8x64xbf16>, vector<8x8xf32> -> vector<8x8xf32>
    %cst_38 = arith.constant 0.0883883461 : f32
    %125 = vector.broadcast %cst_38 : f32 to vector<8x8xf32>
    %126 = arith.mulf %124, %125 : vector<8x8xf32>
    %cst_39 = arith.constant dense<0xFF800000> : vector<8xf32>
    %127 = vector.multi_reduction <maximumf>, %126, %cst_39 [1] : vector<8x8xf32> to vector<8xf32>
    %128 = vector.shape_cast %127 : vector<8xf32> to vector<8x1xf32>
    %129 = vector.broadcast %128 : vector<8x1xf32> to vector<8x8xf32>
    %130 = arith.subf %126, %129 : vector<8x8xf32>
    %131 = math.exp %130 : vector<8x8xf32>
    %cst_40 = arith.constant dense<0.000000e+00> : vector<8xf32>
    %132 = vector.multi_reduction <add>, %131, %cst_40 [1] : vector<8x8xf32> to vector<8xf32>
    %133 = vector.shape_cast %132 : vector<8xf32> to vector<8x1xf32>
    %134 = tpu.reciprocal %133 {approx = true} : vector<8x1xf32> -> vector<8x1xf32>
    %135 = vector.broadcast %134 : vector<8x1xf32> to vector<8x8xf32>
    %136 = arith.mulf %131, %135 : vector<8x8xf32>
    %137 = arith.truncf %136 : vector<8x8xf32> to vector<8x8xbf16>
    %cst_41 = arith.constant dense<0.000000e+00> : vector<8x64xf32>
    %138 = tpu.matmul %137, %123, %cst_41 {dimension_numbers = #tpu.dot_dimension_numbers<[1], [0], [0], [1], [0, 0, 1, 1], [], []>} : vector<8x8xbf16>, vector<8x64xbf16>, vector<8x64xf32> -> vector<8x64xf32>
    %c0_42 = arith.constant 0 : index
    %c320 = arith.constant 320 : index
    %139 = vector.load %arg12[%c0_42, %c320] : memref<8x512xf32, #tpu.memory_space<vmem>>, vector<8x64xf32>
    tpu.vector_store %arg12[%c0_42, %c320], %138 {strides = array<i32>} : memref<8x512xf32, #tpu.memory_space<vmem>>, vector<8x64xf32>,
    %140 = vector.extract_strided_slice %7 {offsets = [0, 384], sizes = [8, 64], strides = [1, 1]} : vector<8x1536xf32> to vector<8x64xf32>
    %141 = arith.truncf %140 : vector<8x64xf32> to vector<8x64xbf16>
    %142 = vector.extract_strided_slice %7 {offsets = [0, 896], sizes = [8, 64], strides = [1, 1]} : vector<8x1536xf32> to vector<8x64xf32>
    %143 = arith.truncf %142 : vector<8x64xf32> to vector<8x64xbf16>
    %144 = vector.extract_strided_slice %7 {offsets = [0, 1408], sizes = [8, 64], strides = [1, 1]} : vector<8x1536xf32> to vector<8x64xf32>
    %145 = arith.truncf %144 : vector<8x64xf32> to vector<8x64xbf16>
    %cst_43 = arith.constant dense<0.000000e+00> : vector<8x8xf32>
    %146 = tpu.matmul %141, %143, %cst_43 {dimension_numbers = #tpu.dot_dimension_numbers<[1], [1], [0], [0], [0, 0, 1, 0], [], []>} : vector<8x64xbf16>, vector<8x64xbf16>, vector<8x8xf32> -> vector<8x8xf32>
    %cst_44 = arith.constant 0.0883883461 : f32
    %147 = vector.broadcast %cst_44 : f32 to vector<8x8xf32>
    %148 = arith.mulf %146, %147 : vector<8x8xf32>
    %cst_45 = arith.constant dense<0xFF800000> : vector<8xf32>
    %149 = vector.multi_reduction <maximumf>, %148, %cst_45 [1] : vector<8x8xf32> to vector<8xf32>
    %150 = vector.shape_cast %149 : vector<8xf32> to vector<8x1xf32>
    %151 = vector.broadcast %150 : vector<8x1xf32> to vector<8x8xf32>
    %152 = arith.subf %148, %151 : vector<8x8xf32>
    %153 = math.exp %152 : vector<8x8xf32>
    %cst_46 = arith.constant dense<0.000000e+00> : vector<8xf32>
    %154 = vector.multi_reduction <add>, %153, %cst_46 [1] : vector<8x8xf32> to vector<8xf32>
    %155 = vector.shape_cast %154 : vector<8xf32> to vector<8x1xf32>
    %156 = tpu.reciprocal %155 {approx = true} : vector<8x1xf32> -> vector<8x1xf32>
    %157 = vector.broadcast %156 : vector<8x1xf32> to vector<8x8xf32>
    %158 = arith.mulf %153, %157 : vector<8x8xf32>
    %159 = arith.truncf %158 : vector<8x8xf32> to vector<8x8xbf16>
    %cst_47 = arith.constant dense<0.000000e+00> : vector<8x64xf32>
    %160 = tpu.matmul %159, %145, %cst_47 {dimension_numbers = #tpu.dot_dimension_numbers<[1], [0], [0], [1], [0, 0, 1, 1], [], []>} : vector<8x8xbf16>, vector<8x64xbf16>, vector<8x64xf32> -> vector<8x64xf32>
    %c0_48 = arith.constant 0 : index
    %c384 = arith.constant 384 : index
    %161 = vector.load %arg12[%c0_48, %c384] : memref<8x512xf32, #tpu.memory_space<vmem>>, vector<8x64xf32>
    tpu.vector_store %arg12[%c0_48, %c384], %160 {strides = array<i32>} : memref<8x512xf32, #tpu.memory_space<vmem>>, vector<8x64xf32>,
    %162 = vector.extract_strided_slice %7 {offsets = [0, 448], sizes = [8, 64], strides = [1, 1]} : vector<8x1536xf32> to vector<8x64xf32>
    %163 = arith.truncf %162 : vector<8x64xf32> to vector<8x64xbf16>
    %164 = vector.extract_strided_slice %7 {offsets = [0, 960], sizes = [8, 64], strides = [1, 1]} : vector<8x1536xf32> to vector<8x64xf32>
    %165 = arith.truncf %164 : vector<8x64xf32> to vector<8x64xbf16>
    %166 = vector.extract_strided_slice %7 {offsets = [0, 1472], sizes = [8, 64], strides = [1, 1]} : vector<8x1536xf32> to vector<8x64xf32>
    %167 = arith.truncf %166 : vector<8x64xf32> to vector<8x64xbf16>
    %cst_49 = arith.constant dense<0.000000e+00> : vector<8x8xf32>
    %168 = tpu.matmul %163, %165, %cst_49 {dimension_numbers = #tpu.dot_dimension_numbers<[1], [1], [0], [0], [0, 0, 1, 0], [], []>} : vector<8x64xbf16>, vector<8x64xbf16>, vector<8x8xf32> -> vector<8x8xf32>
    %cst_50 = arith.constant 0.0883883461 : f32
    %169 = vector.broadcast %cst_50 : f32 to vector<8x8xf32>
    %170 = arith.mulf %168, %169 : vector<8x8xf32>
    %cst_51 = arith.constant dense<0xFF800000> : vector<8xf32>
    %171 = vector.multi_reduction <maximumf>, %170, %cst_51 [1] : vector<8x8xf32> to vector<8xf32>
    %172 = vector.shape_cast %171 : vector<8xf32> to vector<8x1xf32>
    %173 = vector.broadcast %172 : vector<8x1xf32> to vector<8x8xf32>
    %174 = arith.subf %170, %173 : vector<8x8xf32>
    %175 = math.exp %174 : vector<8x8xf32>
    %cst_52 = arith.constant dense<0.000000e+00> : vector<8xf32>
    %176 = vector.multi_reduction <add>, %175, %cst_52 [1] : vector<8x8xf32> to vector<8xf32>
    %177 = vector.shape_cast %176 : vector<8xf32> to vector<8x1xf32>
    %178 = tpu.reciprocal %177 {approx = true} : vector<8x1xf32> -> vector<8x1xf32>
    %179 = vector.broadcast %178 : vector<8x1xf32> to vector<8x8xf32>
    %180 = arith.mulf %175, %179 : vector<8x8xf32>
    %181 = arith.truncf %180 : vector<8x8xf32> to vector<8x8xbf16>
    %cst_53 = arith.constant dense<0.000000e+00> : vector<8x64xf32>
    %182 = tpu.matmul %181, %167, %cst_53 {dimension_numbers = #tpu.dot_dimension_numbers<[1], [0], [0], [1], [0, 0, 1, 1], [], []>} : vector<8x8xbf16>, vector<8x64xbf16>, vector<8x64xf32> -> vector<8x64xf32>
    %c0_54 = arith.constant 0 : index
    %c448 = arith.constant 448 : index
    %183 = vector.load %arg12[%c0_54, %c448] : memref<8x512xf32, #tpu.memory_space<vmem>>, vector<8x64xf32>
    tpu.vector_store %arg12[%c0_54, %c448], %182 {strides = array<i32>} : memref<8x512xf32, #tpu.memory_space<vmem>>, vector<8x64xf32>,
    %c0_55 = arith.constant 0 : index
    %c0_56 = arith.constant 0 : index
    %184 = vector.load %arg12[%c0_55, %c0_56] : memref<8x512xf32, #tpu.memory_space<vmem>>, vector<8x512xf32>
    %185 = arith.addf %184, %1 : vector<8x512xf32>
    %c0_57 = arith.constant 0 : index
    %c0_58 = arith.constant 0 : index
    %186 = vector.load %arg4[%c0_57, %c0_58] : memref<1x512xf32, #tpu.memory_space<vmem>>, vector<1x512xf32>
    %187 = vector.broadcast %186 : vector<1x512xf32> to vector<8x512xf32>
    %188 = arith.mulf %185, %187 : vector<8x512xf32>
    %c0_59 = arith.constant 0 : index
    %c0_60 = arith.constant 0 : index
    %189 = vector.load %arg5[%c0_59, %c0_60] : memref<1x512xf32, #tpu.memory_space<vmem>>, vector<1x512xf32>
    %190 = vector.broadcast %189 : vector<1x512xf32> to vector<8x512xf32>
    %191 = arith.addf %188, %190 : vector<8x512xf32>
    %192 = arith.truncf %191 : vector<8x512xf32> to vector<8x512xbf16>
    %c0_61 = arith.constant 0 : index
    %c0_62 = arith.constant 0 : index
    %193 = vector.load %arg6[%c0_61, %c0_62] : memref<512x256xbf16, #tpu.memory_space<vmem>>, vector<512x256xbf16>
    %cst_63 = arith.constant dense<0.000000e+00> : vector<8x256xf32>
    %194 = tpu.matmul %192, %193, %cst_63 {dimension_numbers = #tpu.dot_dimension_numbers<[1], [0], [0], [1], [0, 0, 1, 1], [], []>} : vector<8x512xbf16>, vector<512x256xbf16>, vector<8x256xf32> -> vector<8x256xf32>
    %c0_64 = arith.constant 0 : index
    %c0_65 = arith.constant 0 : index
    %195 = vector.load %arg7[%c0_64, %c0_65] : memref<1x256xf32, #tpu.memory_space<vmem>>, vector<1x256xf32>
    %196 = vector.broadcast %195 : vector<1x256xf32> to vector<8x256xf32>
    %197 = arith.addf %194, %196 : vector<8x256xf32>
    %cst_66 = arith.constant 0.000000e+00 : f32
    %198 = vector.broadcast %cst_66 : f32 to vector<8x256xf32>
    %199 = arith.cmpf ogt, %197, %198 : vector<8x256xf32>
    %cst_67 = arith.constant 0.000000e+00 : f32
    %200 = vector.broadcast %cst_67 : f32 to vector<8x256xf32>
    %201 = arith.minimumf %197, %200 : vector<8x256xf32>
    %202 = math.exp %201 : vector<8x256xf32>
    %cst_68 = arith.constant 1.000000e+00 : f32
    %203 = vector.broadcast %cst_68 : f32 to vector<8x256xf32>
    %204 = arith.subf %202, %203 : vector<8x256xf32>
    %205 = arith.select %199, %197, %204 : vector<8x256xi1>, vector<8x256xf32>
    %206 = arith.truncf %205 : vector<8x256xf32> to vector<8x256xbf16>
    %c0_69 = arith.constant 0 : index
    %c0_70 = arith.constant 0 : index
    %207 = vector.load %arg8[%c0_69, %c0_70] : memref<256x512xbf16, #tpu.memory_space<vmem>>, vector<256x512xbf16>
    %cst_71 = arith.constant dense<0.000000e+00> : vector<8x512xf32>
    %208 = tpu.matmul %206, %207, %cst_71 {dimension_numbers = #tpu.dot_dimension_numbers<[1], [0], [0], [1], [0, 0, 1, 1], [], []>} : vector<8x256xbf16>, vector<256x512xbf16>, vector<8x512xf32> -> vector<8x512xf32>
    %c0_72 = arith.constant 0 : index
    %c0_73 = arith.constant 0 : index
    %209 = vector.load %arg9[%c0_72, %c0_73] : memref<1x512xf32, #tpu.memory_space<vmem>>, vector<1x512xf32>
    %210 = vector.broadcast %209 : vector<1x512xf32> to vector<8x512xf32>
    %211 = arith.mulf %191, %210 : vector<8x512xf32>
    %212 = arith.addf %208, %211 : vector<8x512xf32>
    %c0_74 = arith.constant 0 : index
    %c0_75 = arith.constant 0 : index
    %213 = vector.load %arg10[%c0_74, %c0_75] : memref<1x512xf32, #tpu.memory_space<vmem>>, vector<1x512xf32>
    %214 = vector.broadcast %213 : vector<1x512xf32> to vector<8x512xf32>
    %215 = arith.addf %212, %214 : vector<8x512xf32>
    %c0_76 = arith.constant 0 : index
    %c0_77 = arith.constant 0 : index
    %c0_78 = arith.constant 0 : index
    %216 = vector.load %arg11[%c0_76, %c0_77, %c0_78] : memref<1x8x512xf32, #tpu.memory_space<vmem>>, vector<1x8x512xf32>
    %217 = vector.shape_cast %216 : vector<1x8x512xf32> to vector<8x512xf32>
    %218 = vector.shape_cast %215 : vector<8x512xf32> to vector<1x8x512xf32>
    tpu.vector_store %arg11[%c0_76, %c0_77, %c0_78], %218 {strides = array<i32>} : memref<1x8x512xf32, #tpu.memory_space<vmem>>, vector<1x8x512xf32>,
    return
  }
  func.func @transform_0(%arg0: i32) -> (i32, i32, i32) {
    %c0_i32 = arith.constant 0 : i32
    %c0_i32_0 = arith.constant 0 : i32
    %c0_i32_1 = arith.constant 0 : i32
    return %arg0, %c0_i32, %c0_i32_0 : i32, i32, i32
  }
  func.func @transform_1(%arg0: i32) -> (i32, i32) {
    %c0_i32 = arith.constant 0 : i32
    %c0_i32_0 = arith.constant 0 : i32
    %c0_i32_1 = arith.constant 0 : i32
    return %c0_i32, %c0_i32_0 : i32, i32
  }
  func.func @transform_2(%arg0: i32) -> (i32, i32) {
    %c0_i32 = arith.constant 0 : i32
    %c0_i32_0 = arith.constant 0 : i32
    %c0_i32_1 = arith.constant 0 : i32
    return %c0_i32, %c0_i32_0 : i32, i32
  }
  func.func @transform_3(%arg0: i32) -> (i32, i32) {
    %c0_i32 = arith.constant 0 : i32
    %c0_i32_0 = arith.constant 0 : i32
    %c0_i32_1 = arith.constant 0 : i32
    return %c0_i32, %c0_i32_0 : i32, i32
  }
  func.func @transform_4(%arg0: i32) -> (i32, i32) {
    %c0_i32 = arith.constant 0 : i32
    %c0_i32_0 = arith.constant 0 : i32
    %c0_i32_1 = arith.constant 0 : i32
    return %c0_i32, %c0_i32_0 : i32, i32
  }
  func.func @transform_5(%arg0: i32) -> (i32, i32) {
    %c0_i32 = arith.constant 0 : i32
    %c0_i32_0 = arith.constant 0 : i32
    %c0_i32_1 = arith.constant 0 : i32
    return %c0_i32, %c0_i32_0 : i32, i32
  }
  func.func @transform_6(%arg0: i32) -> (i32, i32) {
    %c0_i32 = arith.constant 0 : i32
    %c0_i32_0 = arith.constant 0 : i32
    %c0_i32_1 = arith.constant 0 : i32
    return %c0_i32, %c0_i32_0 : i32, i32
  }
  func.func @transform_7(%arg0: i32) -> (i32, i32) {
    %c0_i32 = arith.constant 0 : i32
    %c0_i32_0 = arith.constant 0 : i32
    %c0_i32_1 = arith.constant 0 : i32
    return %c0_i32, %c0_i32_0 : i32, i32
  }
  func.func @transform_8(%arg0: i32) -> (i32, i32) {
    %c0_i32 = arith.constant 0 : i32
    %c0_i32_0 = arith.constant 0 : i32
    %c0_i32_1 = arith.constant 0 : i32
    return %c0_i32, %c0_i32_0 : i32, i32
  }
  func.func @transform_9(%arg0: i32) -> (i32, i32) {
    %c0_i32 = arith.constant 0 : i32
    %c0_i32_0 = arith.constant 0 : i32
    %c0_i32_1 = arith.constant 0 : i32
    return %c0_i32, %c0_i32_0 : i32, i32
  }
  func.func @transform_10(%arg0: i32) -> (i32, i32, i32) {
    %c0_i32 = arith.constant 0 : i32
    %c0_i32_0 = arith.constant 0 : i32
    %c0_i32_1 = arith.constant 0 : i32
    return %arg0, %c0_i32, %c0_i32_0 : i32, i32, i32
  }
}

</mosaic_0001>

<bundles_post_ra>
// kernel: ct_block_forward.1
= control target key start
LH: loop header
LB: loop body
LE: loop exit
PB: predicated region body
PF: predicated region fallthrough
CT: control target
= control target key end

     0   :  { %s6834_s13 = smov 0   ;;  %s8723_s0 = inlined_call_operand.vmem [shape: f32[2,8,512], index: 0, kind: input, shape index: {}]   ;;  %s8724_s1 = inlined_call_operand.vmem [shape: bf16[512,1536], index: 1, kind: input, shape index: {}]   ;;  %s8725_s2 = inlined_call_operand.vmem [shape: f32[1,1536], index: 2, kind: input, shape index: {}]   ;;  %s8726_s3 = inlined_call_operand.vmem [shape: f32[1,512], index: 3, kind: input, shape index: {}]   ;;  %s8727_s4 = inlined_call_operand.vmem [shape: f32[1,512], index: 4, kind: input, shape index: {}]   ;;  %s8728_s5 = inlined_call_operand.vmem [shape: bf16[512,256], index: 5, kind: input, shape index: {}]   ;;  %s8729_s6 = inlined_call_operand.vmem [shape: f32[1,256], index: 6, kind: input, shape index: {}]   ;;  %s8730_s7 = inlined_call_operand.vmem [shape: bf16[256,512], index: 7, kind: input, shape index: {}]   ;;  %s8731_s8 = inlined_call_operand.vmem [shape: f32[1,512], index: 8, kind: input, shape index: {}]   ;;  %s8732_s9 = inlined_call_operand.vmem [shape: f32[1,512], index: 9, kind: input, shape index: {}]   ;;  %s8733_s10 = inlined_call_operand.vmem [shape: f32[2,8,512], index: 10, kind: output, shape index: {}]  }
   0x1 LB: > { %s5278_s14 = sadd.s32 4294967295, %s6774_s13   ;;  %p5282_p0 = scmp.ge.s32.totalorder %s6774_s13, 1  ;;  %s6774_s13 = sphi %s6834_s13, %s20_s13  }
   0x2   : > { %p312_p1 = scmp.lt.s32.totalorder %s6774_s13, 3 }
   0x4   : > { %p313_p2 = pnand %p5282_p0, %p312_p1 }
   0x5   : > { %p350_p3 = scmp.lt.s32.totalorder (!%p313_p2), %s5278_s14, 1  ;;  %s6778_s28 = smov (!%p313_p2), 64  }
   0x6   : > { %316 = sbr.rel (%p313_p2) target bundleno = 1869 (0x74d), region = 60 }
   0xb   : > { %v5960_v0 = vld [vmem:[%s8724_s1 + $0x2a4] ss:$48 sps:$4 sm:$0xff]   ;;  %v5964_v2 = vld [vmem:[%s8724_s1 + $0x2a0] ss:$48 sps:$4 sm:$0xff]   ;;  %s8735_s14 = smov (!%p350_p3, %s5278_s14), 1  ;;  %vm6777_vm0 = vmmov 0  }
   0xc   : > { %v5962_v1 = vld [vmem:[%s8724_s1 + $0x8a4] ss:$48 sps:$4 sm:$0xff]   ;;  %2737 = vmatprep.subr.bf16.mxu0 %v5960_v0  ;;  %v5965_v3 = vld [vmem:[%s8724_s1 + $0x8a0] ss:$48 sps:$4 sm:$0xff]   ;;  %s5819_s25 = sshll.u32 %s8735_s14, 5  ;;  %vm3232_vm1 = vcmask 523264  }
   0xd   : > { %2778 = vmatprep.subr.bf16.mxu1 %v5962_v1  ;;  %v5966_v4 = vld [vmem:[%s8724_s1 + $0x244] ss:$48 sps:$4 sm:$0xff]   ;;  %2738 = vmatpush1.bf16.msra.mxu0 %v5964_v2  ;;  %v5970_v6 = vld [vmem:[%s8724_s1 + $0x240] ss:$48 sps:$4 sm:$0xff]   ;;  %s6986_s16 = scalar_lea.vmem %s8723_s0, %s5819_s25  ;;  %vm3296_vm2 = vcmask 1043456   ;;  %vm3280_vm3 = vcmask 64512   ;;  %s359_s26 = scalar_lea.vmem %s8733_s10, %s5819_s25 }
   0xe   : > { %2779 = vmatpush1.bf16.msra.mxu1 %v5965_v3  ;;  %v5968_v5 = vld [vmem:[%s8724_s1 + $0x844] ss:$48 sps:$4 sm:$0xff]   ;;  %2739 = vmatprep.subr.bf16.mxu0 %v5966_v4  ;;  %v5971_v7 = vld [vmem:[%s8724_s1 + $0x840] ss:$48 sps:$4 sm:$0xff]   ;;  %v362_v46 = vld [vmem:[%s6986_s16 + $0x8] sm:$0xff]  ;;  %vm3459_vm4 = vcmask 1048064  }
   0xf   : > { %2780 = vmatprep.subr.bf16.mxu1 %v5968_v5  ;;  %v5972_v8 = vld [vmem:[%s8724_s1 + $0x1e4] ss:$48 sps:$4 sm:$0xff]   ;;  %v5976_v10 = vld [vmem:[%s8724_s1 + $0x1e0] ss:$48 sps:$4 sm:$0xff]   ;;  %v7001_v49 = vpack.c.bf16 %v362_v46, %v362_v46  ;;  %v364_v50 = vld [vmem:[%s6986_s16 + $0x18] sm:$0xff] }
  0x10   : > { %v5974_v9 = vld [vmem:[%s8724_s1 + $0x7e4] ss:$48 sps:$4 sm:$0xff]   ;;  %v5977_v11 = vld [vmem:[%s8724_s1 + $0x7e0] ss:$48 sps:$4 sm:$0xff]   ;;  %v7007_v52 = vpack.c.bf16 %v364_v50, %v364_v50  ;;  %v6110_v46 = vld [vmem:[%s8724_s1 + $0x548] ss:$48 sps:$4 sm:$0xff]  }
  0x11   : > { %2740 = vmatpush1.bf16.msra.mxu0 %v5970_v6  ;;  %v5978_v12 = vld [vmem:[%s8724_s1 + $0x184] ss:$48 sps:$4 sm:$0xff]   ;;  %v5982_v14 = vld [vmem:[%s8724_s1 + $0x180] ss:$48 sps:$4 sm:$0xff]   ;;  %2769 = vmatprep.mubr.bf16.mxu0 %v7001_v49  ;;  %v6058_v6 = vld [vmem:[%s8724_s1 + $0x2ac] ss:$48 sps:$4 sm:$0xff]  }
  0x12   : > { %2781 = vmatpush1.bf16.msra.mxu1 %v5971_v7  ;;  %2741 = vmatprep.subr.bf16.mxu0 %v5972_v8  ;;  %v5980_v13 = vld [vmem:[%s8724_s1 + $0x784] ss:$48 sps:$4 sm:$0xff]   ;;  %v5983_v15 = vld [vmem:[%s8724_s1 + $0x780] ss:$48 sps:$4 sm:$0xff]   ;;  %v6061_v7 = vld [vmem:[%s8724_s1 + $0x8ac] ss:$48 sps:$4 sm:$0xff]  }
  0x13   : > { %2782 = vmatprep.subr.bf16.mxu1 %v5974_v9  ;;  %v5984_v16 = vld [vmem:[%s8724_s1 + $0x124] ss:$48 sps:$4 sm:$0xff]   ;;  %v5988_v18 = vld [vmem:[%s8724_s1 + $0x120] ss:$48 sps:$4 sm:$0xff]   ;;  %2810 = vmatprep.mubr.bf16.mxu1 %v7007_v52  ;;  %v6121_v50 = vld [vmem:[%s8724_s1 + $0xaec] ss:$48 sps:$4 sm:$0xff]  }
  0x14   : > { %v5986_v17 = vld [vmem:[%s8724_s1 + $0x724] ss:$48 sps:$4 sm:$0xff]   ;;  %v5989_v19 = vld [vmem:[%s8724_s1 + $0x720] ss:$48 sps:$4 sm:$0xff]  }
  0x15   : > { %2742 = vmatpush1.bf16.msra.mxu0 %v5976_v10  ;;  %v5990_v20 = vld [vmem:[%s8724_s1 + $0xc4] ss:$48 sps:$4 sm:$0xff]   ;;  %v5994_v22 = vld [vmem:[%s8724_s1 + $0xc0] ss:$48 sps:$4 sm:$0xff]   ;;  %v6056_v10 = vld [vmem:[%s8724_s1 + $0x2a8] ss:$48 sps:$4 sm:$0xff]  }
  0x16   : > { %2783 = vmatpush1.bf16.msra.mxu1 %v5977_v11  ;;  %2743 = vmatprep.subr.bf16.mxu0 %v5978_v12  ;;  %v5992_v21 = vld [vmem:[%s8724_s1 + $0x6c4] ss:$48 sps:$4 sm:$0xff]   ;;  %v5995_v23 = vld [vmem:[%s8724_s1 + $0x6c0] ss:$48 sps:$4 sm:$0xff]   ;;  %v6059_v11 = vld [vmem:[%s8724_s1 + $0x8a8] ss:$48 sps:$4 sm:$0xff]  }
  0x17   : > { %2784 = vmatprep.subr.bf16.mxu1 %v5980_v13  ;;  %v5996_v24 = vld [vmem:[%s8724_s1 + $0x64] ss:$48 sps:$4 sm:$0xff]   ;;  %v6000_v26 = vld [vmem:[%s8724_s1 + $0x60] ss:$48 sps:$4 sm:$0xff]   ;;  %v6064_v12 = vld [vmem:[%s8724_s1 + $0x24c] ss:$48 sps:$4 sm:$0xff]  }
  0x18   : > { %v5998_v25 = vld [vmem:[%s8724_s1 + $0x664] ss:$48 sps:$4 sm:$0xff]   ;;  %v6001_v27 = vld [vmem:[%s8724_s1 + $0x660] ss:$48 sps:$4 sm:$0xff]   ;;  %v6067_v13 = vld [vmem:[%s8724_s1 + $0x84c] ss:$48 sps:$4 sm:$0xff]  }
  0x19   : > { %2744 = vmatpush1.bf16.msra.mxu0 %v5982_v14  ;;  %v6002_v28 = vld [vmem:[%s8724_s1 + $0x4] ss:$48 sps:$4 sm:$0xff]   ;;  %v6006_v30 = vld [vmem:[%s8724_s1] ss:$48 sps:$4 sm:$0xff]   ;;  %v6062_v14 = vld [vmem:[%s8724_s1 + $0x248] ss:$48 sps:$4 sm:$0xff]  }
  0x1a   : > { %2785 = vmatpush1.bf16.msra.mxu1 %v5983_v15  ;;  %2745 = vmatprep.subr.bf16.mxu0 %v5984_v16  ;;  %v6004_v29 = vld [vmem:[%s8724_s1 + $0x604] ss:$48 sps:$4 sm:$0xff]   ;;  %v6007_v31 = vld [vmem:[%s8724_s1 + $0x600] ss:$48 sps:$4 sm:$0xff]   ;;  %v6065_v15 = vld [vmem:[%s8724_s1 + $0x848] ss:$48 sps:$4 sm:$0xff]  }
  0x1b   : > { %2786 = vmatprep.subr.bf16.mxu1 %v5986_v17  ;;  %v6008_v32 = vld [vmem:[%s8724_s1 + $0x5a4] ss:$48 sps:$4 sm:$0xff]   ;;  %v6012_v34 = vld [vmem:[%s8724_s1 + $0x5a0] ss:$48 sps:$4 sm:$0xff]   ;;  %v6070_v16 = vld [vmem:[%s8724_s1 + $0x1ec] ss:$48 sps:$4 sm:$0xff]  }
  0x1c   : > { %v6010_v33 = vld [vmem:[%s8724_s1 + $0xba4] ss:$48 sps:$4 sm:$0xff]   ;;  %v6013_v35 = vld [vmem:[%s8724_s1 + $0xba0] ss:$48 sps:$4 sm:$0xff]   ;;  %v6073_v17 = vld [vmem:[%s8724_s1 + $0x7ec] ss:$48 sps:$4 sm:$0xff]  }
  0x1d   : > { %2746 = vmatpush1.bf16.msra.mxu0 %v5988_v18  ;;  %v6014_v36 = vld [vmem:[%s8724_s1 + $0x544] ss:$48 sps:$4 sm:$0xff]   ;;  %v6018_v38 = vld [vmem:[%s8724_s1 + $0x540] ss:$48 sps:$4 sm:$0xff]   ;;  %v6068_v18 = vld [vmem:[%s8724_s1 + $0x1e8] ss:$48 sps:$4 sm:$0xff]  }
  0x1e   : > { %2787 = vmatpush1.bf16.msra.mxu1 %v5989_v19  ;;  %2747 = vmatprep.subr.bf16.mxu0 %v5990_v20  ;;  %v6016_v37 = vld [vmem:[%s8724_s1 + $0xb44] ss:$48 sps:$4 sm:$0xff]   ;;  %v6019_v39 = vld [vmem:[%s8724_s1 + $0xb40] ss:$48 sps:$4 sm:$0xff]   ;;  %v6071_v19 = vld [vmem:[%s8724_s1 + $0x7e8] ss:$48 sps:$4 sm:$0xff]  }
  0x1f   : > { %2788 = vmatprep.subr.bf16.mxu1 %v5992_v21  ;;  %v6020_v40 = vld [vmem:[%s8724_s1 + $0x4e4] ss:$48 sps:$4 sm:$0xff]   ;;  %v6024_v42 = vld [vmem:[%s8724_s1 + $0x4e0] ss:$48 sps:$4 sm:$0xff]   ;;  %v6076_v20 = vld [vmem:[%s8724_s1 + $0x18c] ss:$48 sps:$4 sm:$0xff]  }
  0x20   : > { %v6022_v41 = vld [vmem:[%s8724_s1 + $0xae4] ss:$48 sps:$4 sm:$0xff]   ;;  %v6025_v43 = vld [vmem:[%s8724_s1 + $0xae0] ss:$48 sps:$4 sm:$0xff]   ;;  %v6079_v21 = vld [vmem:[%s8724_s1 + $0x78c] ss:$48 sps:$4 sm:$0xff]  }
  0x21   : > { %2748 = vmatpush1.bf16.msra.mxu0 %v5994_v22  ;;  %v6026_v44 = vld [vmem:[%s8724_s1 + $0x484] ss:$48 sps:$4 sm:$0xff]   ;;  %v6030_v47 = vld [vmem:[%s8724_s1 + $0x480] ss:$48 sps:$4 sm:$0xff]   ;;  %v6074_v22 = vld [vmem:[%s8724_s1 + $0x188] ss:$48 sps:$4 sm:$0xff]  }
  0x22   : > { %2789 = vmatpush1.bf16.msra.mxu1 %v5995_v23  ;;  %2749 = vmatprep.subr.bf16.mxu0 %v5996_v24  ;;  %v6028_v45 = vld [vmem:[%s8724_s1 + $0xa84] ss:$48 sps:$4 sm:$0xff]   ;;  %v6031_v48 = vld [vmem:[%s8724_s1 + $0xa80] ss:$48 sps:$4 sm:$0xff]   ;;  %v6077_v23 = vld [vmem:[%s8724_s1 + $0x788] ss:$48 sps:$4 sm:$0xff]  }
  0x23   : > { %2790 = vmatprep.subr.bf16.mxu1 %v5998_v25  ;;  %v6032_v51 = vld [vmem:[%s8724_s1 + $0x424] ss:$48 sps:$4 sm:$0xff]   ;;  %v6036_v54 = vld [vmem:[%s8724_s1 + $0x420] ss:$48 sps:$4 sm:$0xff]   ;;  %v6082_v24 = vld [vmem:[%s8724_s1 + $0x12c] ss:$48 sps:$4 sm:$0xff]  }
  0x24   : > { %v6034_v53 = vld [vmem:[%s8724_s1 + $0xa24] ss:$48 sps:$4 sm:$0xff]   ;;  %v6037_v55 = vld [vmem:[%s8724_s1 + $0xa20] ss:$48 sps:$4 sm:$0xff]   ;;  %v6085_v25 = vld [vmem:[%s8724_s1 + $0x72c] ss:$48 sps:$4 sm:$0xff]  }
  0x25   : > { %2750 = vmatpush1.bf16.msra.mxu0 %v6000_v26  ;;  %v6038_v56 = vld [vmem:[%s8724_s1 + $0x3c4] ss:$48 sps:$4 sm:$0xff]   ;;  %v6042_v58 = vld [vmem:[%s8724_s1 + $0x3c0] ss:$48 sps:$4 sm:$0xff]   ;;  %v6080_v26 = vld [vmem:[%s8724_s1 + $0x128] ss:$48 sps:$4 sm:$0xff]  }
  0x26   : > { %2791 = vmatpush1.bf16.msra.mxu1 %v6001_v27  ;;  %2751 = vmatprep.subr.bf16.mxu0 %v6002_v28  ;;  %v6040_v57 = vld [vmem:[%s8724_s1 + $0x9c4] ss:$48 sps:$4 sm:$0xff]   ;;  %v6043_v59 = vld [vmem:[%s8724_s1 + $0x9c0] ss:$48 sps:$4 sm:$0xff]   ;;  %v6083_v27 = vld [vmem:[%s8724_s1 + $0x728] ss:$48 sps:$4 sm:$0xff]  }
  0x27   : > { %2792 = vmatprep.subr.bf16.mxu1 %v6004_v29  ;;  %v6044_v60 = vld [vmem:[%s8724_s1 + $0x364] ss:$48 sps:$4 sm:$0xff]   ;;  %v6048_v62 = vld [vmem:[%s8724_s1 + $0x360] ss:$48 sps:$4 sm:$0xff]   ;;  %v6088_v28 = vld [vmem:[%s8724_s1 + $0xcc] ss:$48 sps:$4 sm:$0xff]  }
  0x28   : > { %v6046_v61 = vld [vmem:[%s8724_s1 + $0x964] ss:$48 sps:$4 sm:$0xff]   ;;  %v6049_v63 = vld [vmem:[%s8724_s1 + $0x960] ss:$48 sps:$4 sm:$0xff]   ;;  %v6091_v29 = vld [vmem:[%s8724_s1 + $0x6cc] ss:$48 sps:$4 sm:$0xff]  }
  0x29   : > { %2752 = vmatpush1.bf16.msra.mxu0 %v6006_v30  ;;  %v6050_v0 = vld [vmem:[%s8724_s1 + $0x304] ss:$48 sps:$4 sm:$0xff]   ;;  %v6054_v2 = vld [vmem:[%s8724_s1 + $0x300] ss:$48 sps:$4 sm:$0xff]   ;;  %v6086_v30 = vld [vmem:[%s8724_s1 + $0xc8] ss:$48 sps:$4 sm:$0xff]  }
  0x2a   : > { %2793 = vmatpush1.bf16.msra.mxu1 %v6007_v31  ;;  %2753 = vmatprep.subr.bf16.mxu0 %v6008_v32  ;;  %v6052_v1 = vld [vmem:[%s8724_s1 + $0x904] ss:$48 sps:$4 sm:$0xff]   ;;  %v6055_v3 = vld [vmem:[%s8724_s1 + $0x900] ss:$48 sps:$4 sm:$0xff]   ;;  %v6089_v31 = vld [vmem:[%s8724_s1 + $0x6c8] ss:$48 sps:$4 sm:$0xff]  }
  0x2b   : > { %2794 = vmatprep.subr.bf16.mxu1 %v6010_v33  ;;  %v361_v4 = vld [vmem:[%s6986_s16] sm:$0xff]  ;;  %v363_v5 = vld [vmem:[%s6986_s16 + $0x10] sm:$0xff]  ;;  %v6094_v32 = vld [vmem:[%s8724_s1 + $0x6c] ss:$48 sps:$4 sm:$0xff]  }
  0x2c   : > { %v7064_v8 = vpack.c.bf16 %v361_v4, %v361_v4  ;;  %v7066_v9 = vpack.c.bf16 %v363_v5, %v363_v5  ;;  %v6097_v33 = vld [vmem:[%s8724_s1 + $0x66c] ss:$48 sps:$4 sm:$0xff]   ;;  %v6140_v4 = vld [vmem:[%s8724_s1 + $0x368] ss:$48 sps:$4 sm:$0xff]  }
  0x2d   : > { %2754 = vmatpush2.bf16.msra.mxu0 %v6012_v34  ;;  %v6092_v34 = vld [vmem:[%s8724_s1 + $0x68] ss:$48 sps:$4 sm:$0xff]  }
  0x2e   : > { %2795 = vmatpush2.bf16.msra.mxu1 %v6013_v35  ;;  %2755 = vmatprep.subr.bf16.mxu0 %v6014_v36  ;;  %v6095_v35 = vld [vmem:[%s8724_s1 + $0x668] ss:$48 sps:$4 sm:$0xff]   ;;  %v6100_v36 = vld [vmem:[%s8724_s1 + $0xc] ss:$48 sps:$4 sm:$0xff]  }
  0x2f   : > { %2796 = vmatprep.subr.bf16.mxu1 %v6016_v37  ;;  %v6103_v37 = vld [vmem:[%s8724_s1 + $0x60c] ss:$48 sps:$4 sm:$0xff]   ;;  %v6143_v5 = vld [vmem:[%s8724_s1 + $0x968] ss:$48 sps:$4 sm:$0xff]  }
  0x31   : > { %2756 = vmatpush2.bf16.msra.mxu0 %v6018_v38  ;;  %v6098_v38 = vld [vmem:[%s8724_s1 + $0x8] ss:$48 sps:$4 sm:$0xff]  }
  0x32   : > { %2797 = vmatpush2.bf16.msra.mxu1 %v6019_v39  ;;  %2757 = vmatprep.subr.bf16.mxu0 %v6020_v40  ;;  %v6101_v39 = vld [vmem:[%s8724_s1 + $0x608] ss:$48 sps:$4 sm:$0xff]   ;;  %v6106_v40 = vld [vmem:[%s8724_s1 + $0x5ac] ss:$48 sps:$4 sm:$0xff]  }
  0x33   : > { %2798 = vmatprep.subr.bf16.mxu1 %v6022_v41  ;;  %v6109_v41 = vld [vmem:[%s8724_s1 + $0xbac] ss:$48 sps:$4 sm:$0xff]  }
  0x35   : > { %2758 = vmatpush2.bf16.msra.mxu0 %v6024_v42  ;;  %v6104_v42 = vld [vmem:[%s8724_s1 + $0x5a8] ss:$48 sps:$4 sm:$0xff]  }
  0x36   : > { %2799 = vmatpush2.bf16.msra.mxu1 %v6025_v43  ;;  %2759 = vmatprep.subr.bf16.mxu0 %v6026_v44  ;;  %v6107_v43 = vld [vmem:[%s8724_s1 + $0xba8] ss:$48 sps:$4 sm:$0xff]   ;;  %v6112_v44 = vld [vmem:[%s8724_s1 + $0x54c] ss:$48 sps:$4 sm:$0xff]  }
  0x37   : > { %2800 = vmatprep.subr.bf16.mxu1 %v6028_v45  ;;  %v6115_v45 = vld [vmem:[%s8724_s1 + $0xb4c] ss:$48 sps:$4 sm:$0xff]  }
  0x39   : > { %2760 = vmatpush2.bf16.msra.mxu0 %v6030_v47  ;;  %v6113_v47 = vld [vmem:[%s8724_s1 + $0xb48] ss:$48 sps:$4 sm:$0xff]  }
  0x3a   : > { %2801 = vmatpush2.bf16.msra.mxu1 %v6031_v48  ;;  %2761 = vmatprep.subr.bf16.mxu0 %v6032_v51  ;;  %v6118_v48 = vld [vmem:[%s8724_s1 + $0x4ec] ss:$48 sps:$4 sm:$0xff]   ;;  %v6116_v51 = vld [vmem:[%s8724_s1 + $0x4e8] ss:$48 sps:$4 sm:$0xff]  }
  0x3b   : > { %2802 = vmatprep.subr.bf16.mxu1 %v6034_v53  ;;  %v6119_v53 = vld [vmem:[%s8724_s1 + $0xae8] ss:$48 sps:$4 sm:$0xff]  }
  0x3d   : > { %2762 = vmatpush2.bf16.msra.mxu0 %v6036_v54  ;;  %v6124_v54 = vld [vmem:[%s8724_s1 + $0x48c] ss:$48 sps:$4 sm:$0xff]  }
  0x3e   : > { %2803 = vmatpush2.bf16.msra.mxu1 %v6037_v55  ;;  %2763 = vmatprep.subr.bf16.mxu0 %v6038_v56  ;;  %v6127_v55 = vld [vmem:[%s8724_s1 + $0xa8c] ss:$48 sps:$4 sm:$0xff]   ;;  %v6122_v56 = vld [vmem:[%s8724_s1 + $0x488] ss:$48 sps:$4 sm:$0xff]  }
  0x3f   : > { %2804 = vmatprep.subr.bf16.mxu1 %v6040_v57  ;;  %v6125_v57 = vld [vmem:[%s8724_s1 + $0xa88] ss:$48 sps:$4 sm:$0xff]  }
  0x41   : > { %2764 = vmatpush2.bf16.msra.mxu0 %v6042_v58  ;;  %v6130_v58 = vld [vmem:[%s8724_s1 + $0x42c] ss:$48 sps:$4 sm:$0xff]  }
  0x42   : > { %2805 = vmatpush2.bf16.msra.mxu1 %v6043_v59  ;;  %2765 = vmatprep.subr.bf16.mxu0 %v6044_v60  ;;  %v6133_v59 = vld [vmem:[%s8724_s1 + $0xa2c] ss:$48 sps:$4 sm:$0xff]   ;;  %v6128_v60 = vld [vmem:[%s8724_s1 + $0x428] ss:$48 sps:$4 sm:$0xff]  }
  0x43   : > { %2806 = vmatprep.subr.bf16.mxu1 %v6046_v61  ;;  %v6131_v61 = vld [vmem:[%s8724_s1 + $0xa28] ss:$48 sps:$4 sm:$0xff]  }
  0x45   : > { %2766 = vmatpush2.bf16.msra.mxu0 %v6048_v62  ;;  %v6136_v62 = vld [vmem:[%s8724_s1 + $0x3cc] ss:$48 sps:$4 sm:$0xff]  }
  0x46   : > { %2807 = vmatpush2.bf16.msra.mxu1 %v6049_v63  ;;  %2767 = vmatprep.subr.bf16.mxu0 %v6050_v0  ;;  %v6139_v63 = vld [vmem:[%s8724_s1 + $0x9cc] ss:$48 sps:$4 sm:$0xff]   ;;  %v6134_v0 = vld [vmem:[%s8724_s1 + $0x3c8] ss:$48 sps:$4 sm:$0xff]  }
  0x47   : > { %2808 = vmatprep.subr.bf16.mxu1 %v6052_v1  ;;  %v6137_v1 = vld [vmem:[%s8724_s1 + $0x9c8] ss:$48 sps:$4 sm:$0xff]  }
  0x49   : > { %2768 = vmatpush2.bf16.msra.mxu0 %v6054_v2  ;;  %v6142_v2 = vld [vmem:[%s8724_s1 + $0x36c] ss:$48 sps:$4 sm:$0xff]  }
  0x4a   : > { %2809 = vmatpush2.bf16.msra.mxu1 %v6055_v3  ;;  %2819 = vmatprep.subr.bf16.mxu0 %v6058_v6  ;;  %v6145_v3 = vld [vmem:[%s8724_s1 + $0x96c] ss:$48 sps:$4 sm:$0xff]  }
  0x4b   : > { %2860 = vmatprep.subr.bf16.mxu1 %v6061_v7  ;;  %v6148_v6 = vld [vmem:[%s8724_s1 + $0x30c] ss:$48 sps:$4 sm:$0xff]  }
  0x4c   : > { %2770 = vmatmul.mubr.bf16.vlgmr.msra.gmra.mxu0 %v7064_v8  ;;  %v6151_v7 = vld [vmem:[%s8724_s1 + $0x90c] ss:$48 sps:$4 sm:$0xff]  }
  0x4d   : > { %2811 = vmatmul.mubr.bf16.vlgmr.msra.gmra.mxu1 %v7066_v9  ;;  %2820 = vmatpush1.bf16.msra.mxu0 %v6056_v10  ;;  %v6146_v10 = vld [vmem:[%s8724_s1 + $0x308] ss:$48 sps:$4 sm:$0xff]  }
  0x4e   : > { %2861 = vmatpush1.bf16.msra.mxu1 %v6059_v11  ;;  %2821 = vmatprep.subr.bf16.mxu0 %v6064_v12  ;;  %v6149_v11 = vld [vmem:[%s8724_s1 + $0x908] ss:$48 sps:$4 sm:$0xff]   ;;  %v6154_v12 = vld [vmem:[%s8724_s1 + $0x2b4] ss:$48 sps:$4 sm:$0xff]  }
  0x4f   : > { %2862 = vmatprep.subr.bf16.mxu1 %v6067_v13  ;;  %2851 = vmatprep.mubr.bf16.mxu0 %v7001_v49  ;;  %v6157_v13 = vld [vmem:[%s8724_s1 + $0x8b4] ss:$48 sps:$4 sm:$0xff]  }
  0x50   : > { %2892 = vmatprep.mubr.bf16.mxu1 %v7007_v52 }
  0x51   : > { %2822 = vmatpush1.bf16.msra.mxu0 %v6062_v14  ;;  %v6152_v14 = vld [vmem:[%s8724_s1 + $0x2b0] ss:$48 sps:$4 sm:$0xff]  }
  0x52   : > { %2863 = vmatpush1.bf16.msra.mxu1 %v6065_v15  ;;  %2823 = vmatprep.subr.bf16.mxu0 %v6070_v16  ;;  %v6155_v15 = vld [vmem:[%s8724_s1 + $0x8b0] ss:$48 sps:$4 sm:$0xff]   ;;  %v6160_v16 = vld [vmem:[%s8724_s1 + $0x254] ss:$48 sps:$4 sm:$0xff]  }
  0x53   : > { %2864 = vmatprep.subr.bf16.mxu1 %v6073_v17  ;;  %v6163_v17 = vld [vmem:[%s8724_s1 + $0x854] ss:$48 sps:$4 sm:$0xff]  }
  0x55   : > { %2824 = vmatpush1.bf16.msra.mxu0 %v6068_v18  ;;  %v6158_v18 = vld [vmem:[%s8724_s1 + $0x250] ss:$48 sps:$4 sm:$0xff]  }
  0x56   : > { %2865 = vmatpush1.bf16.msra.mxu1 %v6071_v19  ;;  %2825 = vmatprep.subr.bf16.mxu0 %v6076_v20  ;;  %v6161_v19 = vld [vmem:[%s8724_s1 + $0x850] ss:$48 sps:$4 sm:$0xff]   ;;  %v6166_v20 = vld [vmem:[%s8724_s1 + $0x1f4] ss:$48 sps:$4 sm:$0xff]  }
  0x57   : > { %2866 = vmatprep.subr.bf16.mxu1 %v6079_v21  ;;  %v6169_v21 = vld [vmem:[%s8724_s1 + $0x7f4] ss:$48 sps:$4 sm:$0xff]  }
  0x59   : > { %2826 = vmatpush1.bf16.msra.mxu0 %v6074_v22  ;;  %v6164_v22 = vld [vmem:[%s8724_s1 + $0x1f0] ss:$48 sps:$4 sm:$0xff]  }
  0x5a   : > { %2867 = vmatpush1.bf16.msra.mxu1 %v6077_v23  ;;  %2827 = vmatprep.subr.bf16.mxu0 %v6082_v24  ;;  %v6167_v23 = vld [vmem:[%s8724_s1 + $0x7f0] ss:$48 sps:$4 sm:$0xff]   ;;  %v6172_v24 = vld [vmem:[%s8724_s1 + $0x194] ss:$48 sps:$4 sm:$0xff]  }
  0x5b   : > { %2868 = vmatprep.subr.bf16.mxu1 %v6085_v25  ;;  %v6175_v25 = vld [vmem:[%s8724_s1 + $0x794] ss:$48 sps:$4 sm:$0xff]  }
  0x5d   : > { %2828 = vmatpush1.bf16.msra.mxu0 %v6080_v26  ;;  %v6170_v26 = vld [vmem:[%s8724_s1 + $0x190] ss:$48 sps:$4 sm:$0xff]  }
  0x5e   : > { %2869 = vmatpush1.bf16.msra.mxu1 %v6083_v27  ;;  %2829 = vmatprep.subr.bf16.mxu0 %v6088_v28  ;;  %v6173_v27 = vld [vmem:[%s8724_s1 + $0x790] ss:$48 sps:$4 sm:$0xff]   ;;  %v6178_v28 = vld [vmem:[%s8724_s1 + $0x134] ss:$48 sps:$4 sm:$0xff]  }
  0x5f   : > { %2870 = vmatprep.subr.bf16.mxu1 %v6091_v29  ;;  %v6181_v29 = vld [vmem:[%s8724_s1 + $0x734] ss:$48 sps:$4 sm:$0xff]  }
  0x61   : > { %2830 = vmatpush1.bf16.msra.mxu0 %v6086_v30  ;;  %v6176_v30 = vld [vmem:[%s8724_s1 + $0x130] ss:$48 sps:$4 sm:$0xff]  }
  0x62   : > { %2871 = vmatpush1.bf16.msra.mxu1 %v6089_v31  ;;  %2831 = vmatprep.subr.bf16.mxu0 %v6094_v32  ;;  %v6179_v31 = vld [vmem:[%s8724_s1 + $0x730] ss:$48 sps:$4 sm:$0xff]   ;;  %v6184_v32 = vld [vmem:[%s8724_s1 + $0xd4] ss:$48 sps:$4 sm:$0xff]  }
  0x63   : > { %2872 = vmatprep.subr.bf16.mxu1 %v6097_v33  ;;  %v6187_v33 = vld [vmem:[%s8724_s1 + $0x6d4] ss:$48 sps:$4 sm:$0xff]  }
  0x65   : > { %2832 = vmatpush1.bf16.msra.mxu0 %v6092_v34  ;;  %v6182_v34 = vld [vmem:[%s8724_s1 + $0xd0] ss:$48 sps:$4 sm:$0xff]  }
  0x66   : > { %2873 = vmatpush1.bf16.msra.mxu1 %v6095_v35  ;;  %2833 = vmatprep.subr.bf16.mxu0 %v6100_v36  ;;  %v6185_v35 = vld [vmem:[%s8724_s1 + $0x6d0] ss:$48 sps:$4 sm:$0xff]   ;;  %v6190_v36 = vld [vmem:[%s8724_s1 + $0x74] ss:$48 sps:$4 sm:$0xff]  }
  0x67   : > { %2874 = vmatprep.subr.bf16.mxu1 %v6103_v37  ;;  %v6193_v37 = vld [vmem:[%s8724_s1 + $0x674] ss:$48 sps:$4 sm:$0xff]  }
  0x69   : > { %2834 = vmatpush1.bf16.msra.mxu0 %v6098_v38  ;;  %v6188_v38 = vld [vmem:[%s8724_s1 + $0x70] ss:$48 sps:$4 sm:$0xff]  }
  0x6a   : > { %2875 = vmatpush1.bf16.msra.mxu1 %v6101_v39  ;;  %2835 = vmatprep.subr.bf16.mxu0 %v6106_v40  ;;  %v6191_v39 = vld [vmem:[%s8724_s1 + $0x670] ss:$48 sps:$4 sm:$0xff]   ;;  %v6196_v40 = vld [vmem:[%s8724_s1 + $0x14] ss:$48 sps:$4 sm:$0xff]  }
  0x6b   : > { %2876 = vmatprep.subr.bf16.mxu1 %v6109_v41  ;;  %v6199_v41 = vld [vmem:[%s8724_s1 + $0x614] ss:$48 sps:$4 sm:$0xff]  }
  0x6d   : > { %2836 = vmatpush2.bf16.msra.mxu0 %v6104_v42  ;;  %v6194_v42 = vld [vmem:[%s8724_s1 + $0x10] ss:$48 sps:$4 sm:$0xff]  }
  0x6e   : > { %2877 = vmatpush2.bf16.msra.mxu1 %v6107_v43  ;;  %2837 = vmatprep.subr.bf16.mxu0 %v6112_v44  ;;  %v6197_v43 = vld [vmem:[%s8724_s1 + $0x610] ss:$48 sps:$4 sm:$0xff]   ;;  %v6202_v44 = vld [vmem:[%s8724_s1 + $0x5b4] ss:$48 sps:$4 sm:$0xff]  }
  0x6f   : > { %2878 = vmatprep.subr.bf16.mxu1 %v6115_v45  ;;  %v6205_v45 = vld [vmem:[%s8724_s1 + $0xbb4] ss:$48 sps:$4 sm:$0xff]  }
  0x71   : > { %2838 = vmatpush2.bf16.msra.mxu0 %v6110_v46  ;;  %v6200_v46 = vld [vmem:[%s8724_s1 + $0x5b0] ss:$48 sps:$4 sm:$0xff]  }
  0x72   : > { %2879 = vmatpush2.bf16.msra.mxu1 %v6113_v47  ;;  %2839 = vmatprep.subr.bf16.mxu0 %v6118_v48  ;;  %v6203_v47 = vld [vmem:[%s8724_s1 + $0xbb0] ss:$48 sps:$4 sm:$0xff]   ;;  %v6208_v48 = vld [vmem:[%s8724_s1 + $0x554] ss:$48 sps:$4 sm:$0xff]  }
  0x73   : > { %2880 = vmatprep.subr.bf16.mxu1 %v6121_v50  ;;  %v6211_v50 = vld [vmem:[%s8724_s1 + $0xb54] ss:$48 sps:$4 sm:$0xff]  }
  0x75   : > { %2840 = vmatpush2.bf16.msra.mxu0 %v6116_v51  ;;  %v6206_v51 = vld [vmem:[%s8724_s1 + $0x550] ss:$48 sps:$4 sm:$0xff]  }
  0x76   : > { %2881 = vmatpush2.bf16.msra.mxu1 %v6119_v53  ;;  %2841 = vmatprep.subr.bf16.mxu0 %v6124_v54  ;;  %v6209_v53 = vld [vmem:[%s8724_s1 + $0xb50] ss:$48 sps:$4 sm:$0xff]   ;;  %v6214_v54 = vld [vmem:[%s8724_s1 + $0x4f4] ss:$48 sps:$4 sm:$0xff]  }
  0x77   : > { %2882 = vmatprep.subr.bf16.mxu1 %v6127_v55  ;;  %v6217_v55 = vld [vmem:[%s8724_s1 + $0xaf4] ss:$48 sps:$4 sm:$0xff]  }
  0x79   : > { %2842 = vmatpush2.bf16.msra.mxu0 %v6122_v56  ;;  %v6212_v56 = vld [vmem:[%s8724_s1 + $0x4f0] ss:$48 sps:$4 sm:$0xff]  }
  0x7a   : > { %2883 = vmatpush2.bf16.msra.mxu1 %v6125_v57  ;;  %2843 = vmatprep.subr.bf16.mxu0 %v6130_v58  ;;  %v6215_v57 = vld [vmem:[%s8724_s1 + $0xaf0] ss:$48 sps:$4 sm:$0xff]   ;;  %v6220_v58 = vld [vmem:[%s8724_s1 + $0x494] ss:$48 sps:$4 sm:$0xff]  }
  0x7b   : > { %2884 = vmatprep.subr.bf16.mxu1 %v6133_v59  ;;  %v6223_v59 = vld [vmem:[%s8724_s1 + $0xa94] ss:$48 sps:$4 sm:$0xff]  }
  0x7d   : > { %2844 = vmatpush2.bf16.msra.mxu0 %v6128_v60  ;;  %v6218_v60 = vld [vmem:[%s8724_s1 + $0x490] ss:$48 sps:$4 sm:$0xff]  }
  0x7e   : > { %2885 = vmatpush2.bf16.msra.mxu1 %v6131_v61  ;;  %2845 = vmatprep.subr.bf16.mxu0 %v6136_v62  ;;  %v6221_v61 = vld [vmem:[%s8724_s1 + $0xa90] ss:$48 sps:$4 sm:$0xff]   ;;  %v6226_v62 = vld [vmem:[%s8724_s1 + $0x434] ss:$48 sps:$4 sm:$0xff]  }
  0x7f   : > { %2886 = vmatprep.subr.bf16.mxu1 %v6139_v63  ;;  %v6229_v63 = vld [vmem:[%s8724_s1 + $0xa34] ss:$48 sps:$4 sm:$0xff]  }
  0x81   : > { %2846 = vmatpush2.bf16.msra.mxu0 %v6134_v0  ;;  %v6224_v0 = vld [vmem:[%s8724_s1 + $0x430] ss:$48 sps:$4 sm:$0xff]  }
  0x82   : > { %2887 = vmatpush2.bf16.msra.mxu1 %v6137_v1  ;;  %2847 = vmatprep.subr.bf16.mxu0 %v6142_v2  ;;  %v6227_v1 = vld [vmem:[%s8724_s1 + $0xa30] ss:$48 sps:$4 sm:$0xff]   ;;  %v6232_v2 = vld [vmem:[%s8724_s1 + $0x3d4] ss:$48 sps:$4 sm:$0xff]  }
  0x83   : > { %2888 = vmatprep.subr.bf16.mxu1 %v6145_v3  ;;  %v6235_v3 = vld [vmem:[%s8724_s1 + $0x9d4] ss:$48 sps:$4 sm:$0xff]  }
  0x85   : > { %2848 = vmatpush2.bf16.msra.mxu0 %v6140_v4  ;;  %v6230_v4 = vld [vmem:[%s8724_s1 + $0x3d0] ss:$48 sps:$4 sm:$0xff]  }
  0x86   : > { %2889 = vmatpush2.bf16.msra.mxu1 %v6143_v5  ;;  %2849 = vmatprep.subr.bf16.mxu0 %v6148_v6  ;;  %v6233_v5 = vld [vmem:[%s8724_s1 + $0x9d0] ss:$48 sps:$4 sm:$0xff]   ;;  %v6238_v6 = vld [vmem:[%s8724_s1 + $0x374] ss:$48 sps:$4 sm:$0xff]  }
  0x87   : > { %2890 = vmatprep.subr.bf16.mxu1 %v6151_v7  ;;  %v6241_v7 = vld [vmem:[%s8724_s1 + $0x974] ss:$48 sps:$4 sm:$0xff]  }
  0x89   : > { %2850 = vmatpush2.bf16.msra.mxu0 %v6146_v10  ;;  %v6236_v10 = vld [vmem:[%s8724_s1 + $0x370] ss:$48 sps:$4 sm:$0xff]  }
  0x8a   : > { %2891 = vmatpush2.bf16.msra.mxu1 %v6149_v11  ;;  %2901 = vmatprep.subr.bf16.mxu0 %v6154_v12  ;;  %v6239_v11 = vld [vmem:[%s8724_s1 + $0x970] ss:$48 sps:$4 sm:$0xff]   ;;  %v6244_v12 = vld [vmem:[%s8724_s1 + $0x314] ss:$48 sps:$4 sm:$0xff]  }
  0x8b   : > { %2942 = vmatprep.subr.bf16.mxu1 %v6157_v13  ;;  %v6247_v13 = vld [vmem:[%s8724_s1 + $0x914] ss:$48 sps:$4 sm:$0xff]  }
  0x8c   : > { %2852 = vmatmul.mubr.bf16.vlgmr.msra.gmra.mxu0 %v7064_v8 }
  0x8d   : > { %2893 = vmatmul.mubr.bf16.vlgmr.msra.gmra.mxu1 %v7066_v9  ;;  %2902 = vmatpush1.bf16.msra.mxu0 %v6152_v14  ;;  %v6242_v14 = vld [vmem:[%s8724_s1 + $0x310] ss:$48 sps:$4 sm:$0xff]  }
  0x8e   : > { %2943 = vmatpush1.bf16.msra.mxu1 %v6155_v15  ;;  %2903 = vmatprep.subr.bf16.mxu0 %v6160_v16  ;;  %v6245_v15 = vld [vmem:[%s8724_s1 + $0x910] ss:$48 sps:$4 sm:$0xff]   ;;  %v6250_v16 = vld [vmem:[%s8724_s1 + $0x2bc] ss:$48 sps:$4 sm:$0xff]  }
  0x8f   : > { %2944 = vmatprep.subr.bf16.mxu1 %v6163_v17  ;;  %2933 = vmatprep.mubr.bf16.mxu0 %v7001_v49  ;;  %v6253_v17 = vld [vmem:[%s8724_s1 + $0x8bc] ss:$48 sps:$4 sm:$0xff]  }
  0x90   : > { %2974 = vmatprep.mubr.bf16.mxu1 %v7007_v52 }
  0x91   : > { %2904 = vmatpush1.bf16.msra.mxu0 %v6158_v18  ;;  %v6248_v18 = vld [vmem:[%s8724_s1 + $0x2b8] ss:$48 sps:$4 sm:$0xff]  }
  0x92   : > { %2945 = vmatpush1.bf16.msra.mxu1 %v6161_v19  ;;  %2905 = vmatprep.subr.bf16.mxu0 %v6166_v20  ;;  %v6251_v19 = vld [vmem:[%s8724_s1 + $0x8b8] ss:$48 sps:$4 sm:$0xff]   ;;  %v6256_v20 = vld [vmem:[%s8724_s1 + $0x25c] ss:$48 sps:$4 sm:$0xff]  }
  0x93   : > { %2946 = vmatprep.subr.bf16.mxu1 %v6169_v21  ;;  %v6259_v21 = vld [vmem:[%s8724_s1 + $0x85c] ss:$48 sps:$4 sm:$0xff]  }
  0x95   : > { %2906 = vmatpush1.bf16.msra.mxu0 %v6164_v22  ;;  %v6254_v22 = vld [vmem:[%s8724_s1 + $0x258] ss:$48 sps:$4 sm:$0xff]  }
  0x96   : > { %2947 = vmatpush1.bf16.msra.mxu1 %v6167_v23  ;;  %2907 = vmatprep.subr.bf16.mxu0 %v6172_v24  ;;  %v6257_v23 = vld [vmem:[%s8724_s1 + $0x858] ss:$48 sps:$4 sm:$0xff]   ;;  %v6262_v24 = vld [vmem:[%s8724_s1 + $0x1fc] ss:$48 sps:$4 sm:$0xff]  }
  0x97   : > { %2948 = vmatprep.subr.bf16.mxu1 %v6175_v25  ;;  %v6265_v25 = vld [vmem:[%s8724_s1 + $0x7fc] ss:$48 sps:$4 sm:$0xff]  }
  0x99   : > { %2908 = vmatpush1.bf16.msra.mxu0 %v6170_v26  ;;  %v6260_v26 = vld [vmem:[%s8724_s1 + $0x1f8] ss:$48 sps:$4 sm:$0xff]  }
  0x9a   : > { %2949 = vmatpush1.bf16.msra.mxu1 %v6173_v27  ;;  %2909 = vmatprep.subr.bf16.mxu0 %v6178_v28  ;;  %v6263_v27 = vld [vmem:[%s8724_s1 + $0x7f8] ss:$48 sps:$4 sm:$0xff]   ;;  %v6268_v28 = vld [vmem:[%s8724_s1 + $0x19c] ss:$48 sps:$4 sm:$0xff]  }
  0x9b   : > { %2950 = vmatprep.subr.bf16.mxu1 %v6181_v29  ;;  %v6271_v29 = vld [vmem:[%s8724_s1 + $0x79c] ss:$48 sps:$4 sm:$0xff]  }
  0x9d   : > { %2910 = vmatpush1.bf16.msra.mxu0 %v6176_v30  ;;  %v6266_v30 = vld [vmem:[%s8724_s1 + $0x198] ss:$48 sps:$4 sm:$0xff]  }
  0x9e   : > { %2951 = vmatpush1.bf16.msra.mxu1 %v6179_v31  ;;  %2911 = vmatprep.subr.bf16.mxu0 %v6184_v32  ;;  %v6269_v31 = vld [vmem:[%s8724_s1 + $0x798] ss:$48 sps:$4 sm:$0xff]   ;;  %v6274_v32 = vld [vmem:[%s8724_s1 + $0x13c] ss:$48 sps:$4 sm:$0xff]  }
  0x9f   : > { %2952 = vmatprep.subr.bf16.mxu1 %v6187_v33  ;;  %v6277_v33 = vld [vmem:[%s8724_s1 + $0x73c] ss:$48 sps:$4 sm:$0xff]  }
  0xa1   : > { %2912 = vmatpush1.bf16.msra.mxu0 %v6182_v34  ;;  %v6272_v34 = vld [vmem:[%s8724_s1 + $0x138] ss:$48 sps:$4 sm:$0xff]  }
  0xa2   : > { %2953 = vmatpush1.bf16.msra.mxu1 %v6185_v35  ;;  %2913 = vmatprep.subr.bf16.mxu0 %v6190_v36  ;;  %v6275_v35 = vld [vmem:[%s8724_s1 + $0x738] ss:$48 sps:$4 sm:$0xff]   ;;  %v6280_v36 = vld [vmem:[%s8724_s1 + $0xdc] ss:$48 sps:$4 sm:$0xff]  }
  0xa3   : > { %2954 = vmatprep.subr.bf16.mxu1 %v6193_v37  ;;  %v6283_v37 = vld [vmem:[%s8724_s1 + $0x6dc] ss:$48 sps:$4 sm:$0xff]  }
  0xa5   : > { %2914 = vmatpush1.bf16.msra.mxu0 %v6188_v38  ;;  %v6278_v38 = vld [vmem:[%s8724_s1 + $0xd8] ss:$48 sps:$4 sm:$0xff]  }
  0xa6   : > { %2955 = vmatpush1.bf16.msra.mxu1 %v6191_v39  ;;  %2915 = vmatprep.subr.bf16.mxu0 %v6196_v40  ;;  %v6281_v39 = vld [vmem:[%s8724_s1 + $0x6d8] ss:$48 sps:$4 sm:$0xff]   ;;  %v6286_v40 = vld [vmem:[%s8724_s1 + $0x7c] ss:$48 sps:$4 sm:$0xff]  }
  0xa7   : > { %2956 = vmatprep.subr.bf16.mxu1 %v6199_v41  ;;  %v6289_v41 = vld [vmem:[%s8724_s1 + $0x67c] ss:$48 sps:$4 sm:$0xff]  }
  0xa9   : > { %2916 = vmatpush1.bf16.msra.mxu0 %v6194_v42  ;;  %v6284_v42 = vld [vmem:[%s8724_s1 + $0x78] ss:$48 sps:$4 sm:$0xff]  }
  0xaa   : > { %2957 = vmatpush1.bf16.msra.mxu1 %v6197_v43  ;;  %2917 = vmatprep.subr.bf16.mxu0 %v6202_v44  ;;  %v6287_v43 = vld [vmem:[%s8724_s1 + $0x678] ss:$48 sps:$4 sm:$0xff]   ;;  %v6292_v44 = vld [vmem:[%s8724_s1 + $0x1c] ss:$48 sps:$4 sm:$0xff]  }
  0xab   : > { %2958 = vmatprep.subr.bf16.mxu1 %v6205_v45  ;;  %v6295_v45 = vld [vmem:[%s8724_s1 + $0x61c] ss:$48 sps:$4 sm:$0xff]  }
  0xad   : > { %2918 = vmatpush2.bf16.msra.mxu0 %v6200_v46  ;;  %v6290_v46 = vld [vmem:[%s8724_s1 + $0x18] ss:$48 sps:$4 sm:$0xff]  }
  0xae   : > { %2959 = vmatpush2.bf16.msra.mxu1 %v6203_v47  ;;  %2919 = vmatprep.subr.bf16.mxu0 %v6208_v48  ;;  %v6293_v47 = vld [vmem:[%s8724_s1 + $0x618] ss:$48 sps:$4 sm:$0xff]   ;;  %v6298_v48 = vld [vmem:[%s8724_s1 + $0x5bc] ss:$48 sps:$4 sm:$0xff]  }
  0xaf   : > { %2960 = vmatprep.subr.bf16.mxu1 %v6211_v50  ;;  %v6301_v50 = vld [vmem:[%s8724_s1 + $0xbbc] ss:$48 sps:$4 sm:$0xff]  }
  0xb1   : > { %2920 = vmatpush2.bf16.msra.mxu0 %v6206_v51  ;;  %v6296_v51 = vld [vmem:[%s8724_s1 + $0x5b8] ss:$48 sps:$4 sm:$0xff]  }
  0xb2   : > { %2961 = vmatpush2.bf16.msra.mxu1 %v6209_v53  ;;  %2921 = vmatprep.subr.bf16.mxu0 %v6214_v54  ;;  %v6299_v53 = vld [vmem:[%s8724_s1 + $0xbb8] ss:$48 sps:$4 sm:$0xff]   ;;  %v6304_v54 = vld [vmem:[%s8724_s1 + $0x55c] ss:$48 sps:$4 sm:$0xff]  }
  0xb3   : > { %2962 = vmatprep.subr.bf16.mxu1 %v6217_v55  ;;  %v6307_v55 = vld [vmem:[%s8724_s1 + $0xb5c] ss:$48 sps:$4 sm:$0xff]  }
  0xb5   : > { %2922 = vmatpush2.bf16.msra.mxu0 %v6212_v56  ;;  %v6302_v56 = vld [vmem:[%s8724_s1 + $0x558] ss:$48 sps:$4 sm:$0xff]  }
  0xb6   : > { %2963 = vmatpush2.bf16.msra.mxu1 %v6215_v57  ;;  %2923 = vmatprep.subr.bf16.mxu0 %v6220_v58  ;;  %v6305_v57 = vld [vmem:[%s8724_s1 + $0xb58] ss:$48 sps:$4 sm:$0xff]   ;;  %v6310_v58 = vld [vmem:[%s8724_s1 + $0x4fc] ss:$48 sps:$4 sm:$0xff]  }
  0xb7   : > { %2964 = vmatprep.subr.bf16.mxu1 %v6223_v59  ;;  %v6313_v59 = vld [vmem:[%s8724_s1 + $0xafc] ss:$48 sps:$4 sm:$0xff]  }
  0xb9   : > { %2924 = vmatpush2.bf16.msra.mxu0 %v6218_v60  ;;  %v6308_v60 = vld [vmem:[%s8724_s1 + $0x4f8] ss:$48 sps:$4 sm:$0xff]  }
  0xba   : > { %2965 = vmatpush2.bf16.msra.mxu1 %v6221_v61  ;;  %2925 = vmatprep.subr.bf16.mxu0 %v6226_v62  ;;  %v6311_v61 = vld [vmem:[%s8724_s1 + $0xaf8] ss:$48 sps:$4 sm:$0xff]   ;;  %v6316_v62 = vld [vmem:[%s8724_s1 + $0x49c] ss:$48 sps:$4 sm:$0xff]  }
  0xbb   : > { %2966 = vmatprep.subr.bf16.mxu1 %v6229_v63  ;;  %v6319_v63 = vld [vmem:[%s8724_s1 + $0xa9c] ss:$48 sps:$4 sm:$0xff]  }
  0xbd   : > { %2926 = vmatpush2.bf16.msra.mxu0 %v6224_v0  ;;  %v6314_v0 = vld [vmem:[%s8724_s1 + $0x498] ss:$48 sps:$4 sm:$0xff]  }
  0xbe   : > { %2967 = vmatpush2.bf16.msra.mxu1 %v6227_v1  ;;  %2927 = vmatprep.subr.bf16.mxu0 %v6232_v2  ;;  %v6317_v1 = vld [vmem:[%s8724_s1 + $0xa98] ss:$48 sps:$4 sm:$0xff]   ;;  %v6322_v2 = vld [vmem:[%s8724_s1 + $0x43c] ss:$48 sps:$4 sm:$0xff]  }
  0xbf   : > { %2968 = vmatprep.subr.bf16.mxu1 %v6235_v3  ;;  %v6325_v3 = vld [vmem:[%s8724_s1 + $0xa3c] ss:$48 sps:$4 sm:$0xff]  }
  0xc1   : > { %2928 = vmatpush2.bf16.msra.mxu0 %v6230_v4  ;;  %v6320_v4 = vld [vmem:[%s8724_s1 + $0x438] ss:$48 sps:$4 sm:$0xff]  }
  0xc2   : > { %2969 = vmatpush2.bf16.msra.mxu1 %v6233_v5  ;;  %2929 = vmatprep.subr.bf16.mxu0 %v6238_v6  ;;  %v6323_v5 = vld [vmem:[%s8724_s1 + $0xa38] ss:$48 sps:$4 sm:$0xff]   ;;  %v6328_v6 = vld [vmem:[%s8724_s1 + $0x3dc] ss:$48 sps:$4 sm:$0xff]  }
  0xc3   : > { %2970 = vmatprep.subr.bf16.mxu1 %v6241_v7  ;;  %v6331_v7 = vld [vmem:[%s8724_s1 + $0x9dc] ss:$48 sps:$4 sm:$0xff]  }
  0xc5   : > { %2930 = vmatpush2.bf16.msra.mxu0 %v6236_v10  ;;  %v757_v10 = vlaneseq }
  0xc6   : > { %2971 = vmatpush2.bf16.msra.mxu1 %v6239_v11  ;;  %2931 = vmatprep.subr.bf16.mxu0 %v6244_v12  ;;  %v6326_v11 = vld [vmem:[%s8724_s1 + $0x3d8] ss:$48 sps:$4 sm:$0xff]  }
  0xc7   : > { %2972 = vmatprep.subr.bf16.mxu1 %v6247_v13  ;;  %v6329_v12 = vld [vmem:[%s8724_s1 + $0x9d8] ss:$48 sps:$4 sm:$0xff]   ;;  %v6334_v13 = vld [vmem:[%s8724_s1 + $0x37c] ss:$48 sps:$4 sm:$0xff]  }
  0xc9   : > { %2932 = vmatpush2.bf16.msra.mxu0 %v6242_v14  ;;  %v6337_v14 = vld [vmem:[%s8724_s1 + $0x97c] ss:$48 sps:$4 sm:$0xff]  }
  0xca   : > { %2973 = vmatpush2.bf16.msra.mxu1 %v6245_v15  ;;  %2983 = vmatprep.subr.bf16.mxu0 %v6250_v16  ;;  %v7632_v15 = vshrl.u32 %v757_v10, 7  ;;  %v6332_v16 = vld [vmem:[%s8724_s1 + $0x378] ss:$48 sps:$4 sm:$0xff]   ;;  %v6370_v10 = vld [vmem:[%s8724_s1 + $0x5c4] ss:$48 sps:$4 sm:$0xff]  }
  0xcb   : > { %3024 = vmatprep.subr.bf16.mxu1 %v6253_v17  ;;  %v6335_v17 = vld [vmem:[%s8724_s1 + $0x978] ss:$48 sps:$4 sm:$0xff]  }
  0xcc   : > { %2934 = vmatmul.mubr.bf16.vlgmr.msra.gmra.mxu0 %v7064_v8 }
  0xcd   : > { %2975 = vmatmul.mubr.bf16.vlgmr.msra.gmra.mxu1 %v7066_v9  ;;  %2984 = vmatpush1.bf16.msra.mxu0 %v6248_v18  ;;  %v6340_v18 = vld [vmem:[%s8724_s1 + $0x31c] ss:$48 sps:$4 sm:$0xff]  }
  0xce   : > { %3025 = vmatpush1.bf16.msra.mxu1 %v6251_v19  ;;  %2985 = vmatprep.subr.bf16.mxu0 %v6256_v20  ;;  %v6343_v19 = vld [vmem:[%s8724_s1 + $0x91c] ss:$48 sps:$4 sm:$0xff]   ;;  %v6338_v20 = vld [vmem:[%s8724_s1 + $0x318] ss:$48 sps:$4 sm:$0xff]  }
  0xcf   : > { %3026 = vmatprep.subr.bf16.mxu1 %v6259_v21  ;;  %3015 = vmatprep.mubr.bf16.mxu0 %v7001_v49  ;;  %v6341_v21 = vld [vmem:[%s8724_s1 + $0x918] ss:$48 sps:$4 sm:$0xff]  }
  0xd0   : > { %3056 = vmatprep.mubr.bf16.mxu1 %v7007_v52 }
  0xd1   : > { %2986 = vmatpush1.bf16.msra.mxu0 %v6254_v22  ;;  %v7655_v22 = vld [vmem:[%s8725_s2] sm:$0xff] }
  0xd2   : > { %3027 = vmatpush1.bf16.msra.mxu1 %v6257_v23  ;;  %2987 = vmatprep.subr.bf16.mxu0 %v6262_v24  ;;  %v6346_v23 = vld [vmem:[%s8724_s1 + $0x2c4] ss:$48 sps:$4 sm:$0xff]  }
  0xd3   : > { %3028 = vmatprep.subr.bf16.mxu1 %v6265_v25  ;;  %v6427_v24 = vld [vmem:[%s8724_s1 + $0x8c4] ss:$48 sps:$4 sm:$0xff]   ;;  %v7664_v25 = vsub.s32 0, %v7632_v15 }
  0xd5   : > { %2988 = vmatpush1.bf16.msra.mxu0 %v6260_v26  ;;  %v7667_v26 = vsub.s32 1, %v7632_v15 }
  0xd6   : > { %3029 = vmatpush1.bf16.msra.mxu1 %v6263_v27  ;;  %2989 = vmatprep.subr.bf16.mxu0 %v6268_v28  ;;  %v6344_v27 = vld [vmem:[%s8724_s1 + $0x2c0] ss:$48 sps:$4 sm:$0xff]   ;;  %v6349_v28 = vld [vmem:[%s8724_s1 + $0x264] ss:$48 sps:$4 sm:$0xff]  }
  0xd7   : > { %3030 = vmatprep.subr.bf16.mxu1 %v6271_v29  ;;  %v6425_v29 = vld [vmem:[%s8724_s1 + $0x8c0] ss:$48 sps:$4 sm:$0xff]  }
  0xd9   : > { %2990 = vmatpush1.bf16.msra.mxu0 %v6266_v30  ;;  %v760_v30 = vrot.slane %v7655_v22, %v7664_v25 }
  0xda   : > { %3031 = vmatpush1.bf16.msra.mxu1 %v6269_v31  ;;  %2991 = vmatprep.subr.bf16.mxu0 %v6274_v32  ;;  %v6433_v31 = vld [vmem:[%s8724_s1 + $0x864] ss:$48 sps:$4 sm:$0xff]   ;;  %v764_v32 = vrot.slane %v7655_v22, %v7667_v26 }
  0xdb   : > { %3032 = vmatprep.subr.bf16.mxu1 %v6277_v33 }
  0xdd   : > { %2992 = vmatpush1.bf16.msra.mxu0 %v6272_v34 }
  0xde   : > { %3033 = vmatpush1.bf16.msra.mxu1 %v6275_v35  ;;  %2993 = vmatprep.subr.bf16.mxu0 %v6280_v36  ;;  %v6347_v35 = vld [vmem:[%s8724_s1 + $0x260] ss:$48 sps:$4 sm:$0xff]  }
  0xdf   : > { %3034 = vmatprep.subr.bf16.mxu1 %v6283_v37  ;;  %v6352_v37 = vld [vmem:[%s8724_s1 + $0x204] ss:$48 sps:$4 sm:$0xff]  }
  0xe1   : > { %2994 = vmatpush1.bf16.msra.mxu0 %v6278_v38  ;;  %v6431_v38 = vld [vmem:[%s8724_s1 + $0x860] ss:$48 sps:$4 sm:$0xff]  }
  0xe2   : > { %3035 = vmatpush1.bf16.msra.mxu1 %v6281_v39  ;;  %2995 = vmatprep.subr.bf16.mxu0 %v6286_v40 }
  0xe3   : > { %3036 = vmatprep.subr.bf16.mxu1 %v6289_v41  ;;  %v6439_v41 = vld [vmem:[%s8724_s1 + $0x804] ss:$48 sps:$4 sm:$0xff]  }
  0xe5   : > { %2996 = vmatpush1.bf16.msra.mxu0 %v6284_v42 }
  0xe6   : > { %3037 = vmatpush1.bf16.msra.mxu1 %v6287_v43  ;;  %2997 = vmatprep.subr.bf16.mxu0 %v6292_v44  ;;  %v6350_v44 = vld [vmem:[%s8724_s1 + $0x200] ss:$48 sps:$4 sm:$0xff]  }
  0xe7   : > { %3038 = vmatprep.subr.bf16.mxu1 %v6295_v45 }
  0xe9   : > { %2998 = vmatpush1.bf16.msra.mxu0 %v6290_v46 }
  0xea   : > { %3039 = vmatpush1.bf16.msra.mxu1 %v6293_v47  ;;  %2999 = vmatprep.subr.bf16.mxu0 %v6298_v48  ;;  %v6355_v47 = vld [vmem:[%s8724_s1 + $0x1a4] ss:$48 sps:$4 sm:$0xff]   ;;  %v6437_v48 = vld [vmem:[%s8724_s1 + $0x800] ss:$48 sps:$4 sm:$0xff]  }
  0xeb   : > { %3040 = vmatprep.subr.bf16.mxu1 %v6301_v50 }
  0xed   : > { %3000 = vmatpush2.bf16.msra.mxu0 %v6296_v51  ;;  %v6445_v51 = vld [vmem:[%s8724_s1 + $0x7a4] ss:$48 sps:$4 sm:$0xff]  }
  0xee   : > { %3041 = vmatpush2.bf16.msra.mxu1 %v6299_v53  ;;  %3001 = vmatprep.subr.bf16.mxu0 %v6304_v54 }
  0xef   : > { %3042 = vmatprep.subr.bf16.mxu1 %v6307_v55  ;;  %v6353_v55 = vld [vmem:[%s8724_s1 + $0x1a0] ss:$48 sps:$4 sm:$0xff]  }
  0xf1   : > { %3002 = vmatpush2.bf16.msra.mxu0 %v6302_v56  ;;  %v6358_v56 = vld [vmem:[%s8724_s1 + $0x144] ss:$48 sps:$4 sm:$0xff]  }
  0xf2   : > { %3043 = vmatpush2.bf16.msra.mxu1 %v6305_v57  ;;  %3003 = vmatprep.subr.bf16.mxu0 %v6310_v58  ;;  %v6443_v57 = vld [vmem:[%s8724_s1 + $0x7a0] ss:$48 sps:$4 sm:$0xff]   ;;  %v6451_v58 = vld [vmem:[%s8724_s1 + $0x744] ss:$48 sps:$4 sm:$0xff]  }
  0xf3   : > { %3044 = vmatprep.subr.bf16.mxu1 %v6313_v59  ;;  %v6356_v59 = vld [vmem:[%s8724_s1 + $0x140] ss:$48 sps:$4 sm:$0xff]  }
  0xf5   : > { %3004 = vmatpush2.bf16.msra.mxu0 %v6308_v60  ;;  %v6361_v60 = vld [vmem:[%s8724_s1 + $0xe4] ss:$48 sps:$4 sm:$0xff]  }
  0xf6   : > { %3045 = vmatpush2.bf16.msra.mxu1 %v6311_v61  ;;  %3005 = vmatprep.subr.bf16.mxu0 %v6316_v62  ;;  %v6449_v61 = vld [vmem:[%s8724_s1 + $0x740] ss:$48 sps:$4 sm:$0xff]   ;;  %v6457_v62 = vld [vmem:[%s8724_s1 + $0x6e4] ss:$48 sps:$4 sm:$0xff]  }
  0xf7   : > { %3046 = vmatprep.subr.bf16.mxu1 %v6319_v63  ;;  %v6359_v63 = vld [vmem:[%s8724_s1 + $0xe0] ss:$48 sps:$4 sm:$0xff]  }
  0xf9   : > { %3006 = vmatpush2.bf16.msra.mxu0 %v6314_v0  ;;  %v6364_v0 = vld [vmem:[%s8724_s1 + $0x84] ss:$48 sps:$4 sm:$0xff]  }
  0xfa   : > { %3047 = vmatpush2.bf16.msra.mxu1 %v6317_v1  ;;  %3007 = vmatprep.subr.bf16.mxu0 %v6322_v2  ;;  %v6455_v1 = vld [vmem:[%s8724_s1 + $0x6e0] ss:$48 sps:$4 sm:$0xff]   ;;  %v6460_v2 = vld [vmem:[%s8724_s1 + $0x684] ss:$48 sps:$4 sm:$0xff]  }
  0xfb   : > { %3048 = vmatprep.subr.bf16.mxu1 %v6325_v3  ;;  %v6362_v3 = vld [vmem:[%s8724_s1 + $0x80] ss:$48 sps:$4 sm:$0xff]  }
  0xfd   : > { %3008 = vmatpush2.bf16.msra.mxu0 %v6320_v4  ;;  %v6367_v4 = vld [vmem:[%s8724_s1 + $0x24] ss:$48 sps:$4 sm:$0xff]  }
  0xfe   : > { %3049 = vmatpush2.bf16.msra.mxu1 %v6323_v5  ;;  %3009 = vmatprep.subr.bf16.mxu0 %v6328_v6  ;;  %v6458_v5 = vld [vmem:[%s8724_s1 + $0x680] ss:$48 sps:$4 sm:$0xff]   ;;  %v6463_v6 = vld [vmem:[%s8724_s1 + $0x624] ss:$48 sps:$4 sm:$0xff]  }
  0xff   : > { %3050 = vmatprep.subr.bf16.mxu1 %v6331_v7  ;;  %v6365_v7 = vld [vmem:[%s8724_s1 + $0x20] ss:$48 sps:$4 sm:$0xff]  }
 0x101   : > { %3010 = vmatpush2.bf16.msra.mxu0 %v6326_v11  ;;  %v6461_v11 = vld [vmem:[%s8724_s1 + $0x620] ss:$48 sps:$4 sm:$0xff]  }
 0x102   : > { %3051 = vmatpush2.bf16.msra.mxu1 %v6329_v12  ;;  %3011 = vmatprep.subr.bf16.mxu0 %v6334_v13  ;;  %v6368_v12 = vld [vmem:[%s8724_s1 + $0x5c0] ss:$48 sps:$4 sm:$0xff]   ;;  %v6466_v13 = vld [vmem:[%s8724_s1 + $0xbc4] ss:$48 sps:$4 sm:$0xff]  }
 0x103   : > { %3052 = vmatprep.subr.bf16.mxu1 %v6337_v14  ;;  %v6373_v14 = vld [vmem:[%s8724_s1 + $0x564] ss:$48 sps:$4 sm:$0xff]  }
 0x105   : > { %3012 = vmatpush2.bf16.msra.mxu0 %v6332_v16  ;;  %v6464_v16 = vld [vmem:[%s8724_s1 + $0xbc0] ss:$48 sps:$4 sm:$0xff]  }
 0x106   : > { %3053 = vmatpush2.bf16.msra.mxu1 %v6335_v17  ;;  %3013 = vmatprep.subr.bf16.mxu0 %v6340_v18  ;;  %v6469_v17 = vld [vmem:[%s8724_s1 + $0xb64] ss:$48 sps:$4 sm:$0xff]   ;;  %v6371_v18 = vld [vmem:[%s8724_s1 + $0x560] ss:$48 sps:$4 sm:$0xff]  }
 0x107   : > { %3054 = vmatprep.subr.bf16.mxu1 %v6343_v19  ;;  %v6376_v19 = vld [vmem:[%s8724_s1 + $0x504] ss:$48 sps:$4 sm:$0xff]  }
 0x109   : > { %3014 = vmatpush2.bf16.msra.mxu0 %v6338_v20  ;;  %v6467_v20 = vld [vmem:[%s8724_s1 + $0xb60] ss:$48 sps:$4 sm:$0xff]  }
 0x10a   : > { %3055 = vmatpush2.bf16.msra.mxu1 %v6341_v21  ;;  %3065 = vmatprep.subr.bf16.mxu0 %v6346_v23  ;;  %v6472_v21 = vld [vmem:[%s8724_s1 + $0xb04] ss:$48 sps:$4 sm:$0xff]   ;;  %v6374_v23 = vld [vmem:[%s8724_s1 + $0x500] ss:$48 sps:$4 sm:$0xff]  }
 0x10b   : > { %3106 = vmatprep.subr.bf16.mxu1 %v6427_v24  ;;  %v6379_v24 = vld [vmem:[%s8724_s1 + $0x4a4] ss:$48 sps:$4 sm:$0xff]  }
 0x10c   : > { %v2771_v33 = vpop.f32.mrf.mxu0  ;;  %3016 = vmatmul.mubr.bf16.vlgmr.msra.gmra.mxu0 %v7064_v8 }
 0x10d   : > { %v2812_v34 = vpop.f32.mrf.mxu1  ;;  %3057 = vmatmul.mubr.bf16.vlgmr.msra.gmra.mxu1 %v7066_v9  ;;  %v2772_v36 = vadd.f32 %v2771_v33, %v760_v30  ;;  %3066 = vmatpush1.bf16.msra.mxu0 %v6344_v27  ;;  %v6470_v27 = vld [vmem:[%s8724_s1 + $0xb00] ss:$48 sps:$4 sm:$0xff]   ;;  %v6382_v30 = vld [vmem:[%s8724_s1 + $0x444] ss:$48 sps:$4 sm:$0xff]  }
 0x10e   : > { %3097 = vmatprep.mubr.bf16.mxu0 %v7001_v49  ;;  %v2773_v39 = vpop.f32.mrf.mxu0  ;;  %3067 = vmatprep.subr.bf16.mxu0 %v6349_v28  ;;  %v6475_v28 = vld [vmem:[%s8724_s1 + $0xaa4] ss:$48 sps:$4 sm:$0xff]   ;;  %v6380_v33 = vld [vmem:[%s8724_s1 + $0x440] ss:$48 sps:$4 sm:$0xff]  }
 0x10f   : > { %v2814_v40 = vpop.f32.mrf.mxu1  ;;  %3107 = vmatpush1.bf16.msra.mxu1 %v6425_v29  ;;  %v7700_v42 = vadd.f32 %v2812_v34, %v2772_v36  ;;  %v2774_v43 = vadd.f32 %v2773_v39, %v764_v32  ;;  %3138 = vmatprep.mubr.bf16.mxu1 %v7007_v52  ;;  %v6377_v29 = vld [vmem:[%s8724_s1 + $0x4a0] ss:$48 sps:$4 sm:$0xff]   ;;  %v6478_v32 = vld [vmem:[%s8724_s1 + $0xa44] ss:$48 sps:$4 sm:$0xff]  }
 0x110   : > { %3108 = vmatprep.subr.bf16.mxu1 %v6433_v31  ;;  %v2775_v45 = vpop.f32.mrf.mxu0  ;;  %v6473_v31 = vld [vmem:[%s8724_s1 + $0xaa0] ss:$48 sps:$4 sm:$0xff]   ;;  %v6385_v34 = vld [vmem:[%s8724_s1 + $0x3e4] ss:$48 sps:$4 sm:$0xff]  }
 0x111   : > { %v2816_v46 = vpop.f32.mrf.mxu1  ;;  %v7712_v50 = vadd.f32 %v2814_v40, %v2774_v43  ;;  %3068 = vmatpush1.bf16.msra.mxu0 %v6347_v35  ;;  %v6476_v35 = vld [vmem:[%s8724_s1 + $0xa40] ss:$48 sps:$4 sm:$0xff]   ;;  %v6481_v36 = vld [vmem:[%s8724_s1 + $0x9e4] ss:$48 sps:$4 sm:$0xff]  }
 0x112   : > { %v2776_v53 = vpop.f32.mrf.mxu0  ;;  %3069 = vmatprep.subr.bf16.mxu0 %v6352_v37  ;;  %v6383_v37 = vld [vmem:[%s8724_s1 + $0x3e0] ss:$48 sps:$4 sm:$0xff]   ;;  %v6484_v40 = vld [vmem:[%s8724_s1 + $0x984] ss:$48 sps:$4 sm:$0xff]   ;;  %v7862_v46 = vsub.s32 2, %v7632_v15 }
 0x113   : > { %v2817_v54 = vpop.f32.mrf.mxu1  ;;  %3109 = vmatpush1.bf16.msra.mxu1 %v6431_v38  ;;  %v6388_v38 = vld [vmem:[%s8724_s1 + $0x384] ss:$48 sps:$4 sm:$0xff]   ;;  %v6479_v39 = vld [vmem:[%s8724_s1 + $0x9e0] ss:$48 sps:$4 sm:$0xff]   ;;  %v7874_v53 = vsub.s32 3, %v7632_v15 }
 0x114   : > { %3110 = vmatprep.subr.bf16.mxu1 %v6439_v41  ;;  %v6386_v41 = vld [vmem:[%s8724_s1 + $0x380] ss:$48 sps:$4 sm:$0xff]   ;;  %v6391_v43 = vld [vmem:[%s8724_s1 + $0x324] ss:$48 sps:$4 sm:$0xff]   ;;  %v6490_v54 = vld [vmem:[%s8724_s1 + $0x8cc] ss:$48 sps:$4 sm:$0xff]  }
 0x115   : > { %3070 = vmatpush1.bf16.msra.mxu0 %v6350_v44  ;;  %v6482_v44 = vld [vmem:[%s8724_s1 + $0x980] ss:$48 sps:$4 sm:$0xff]   ;;  %v6487_v45 = vld [vmem:[%s8724_s1 + $0x924] ss:$48 sps:$4 sm:$0xff]  }
 0x116   : > { %3071 = vmatprep.subr.bf16.mxu0 %v6355_v47  ;;  %v6389_v47 = vld [vmem:[%s8724_s1 + $0x320] ss:$48 sps:$4 sm:$0xff]  }
 0x117   : > { %3111 = vmatpush1.bf16.msra.mxu1 %v6437_v48  ;;  %v6394_v48 = vld [vmem:[%s8724_s1 + $0x2cc] ss:$48 sps:$4 sm:$0xff]  }
 0x118   : > { %3112 = vmatprep.subr.bf16.mxu1 %v6445_v51  ;;  %v6485_v51 = vld [vmem:[%s8724_s1 + $0x920] ss:$48 sps:$4 sm:$0xff]  }
 0x119   : > { %3072 = vmatpush1.bf16.msra.mxu0 %v6353_v55  ;;  %v768_v55 = vrot.slane %v7655_v22, %v7862_v46 }
 0x11a   : > { %3073 = vmatprep.subr.bf16.mxu0 %v6358_v56  ;;  %v6392_v56 = vld [vmem:[%s8724_s1 + $0x2c8] ss:$48 sps:$4 sm:$0xff]  }
 0x11b   : > { %3113 = vmatpush1.bf16.msra.mxu1 %v6443_v57  ;;  %v6397_v57 = vld [vmem:[%s8724_s1 + $0x26c] ss:$48 sps:$4 sm:$0xff]  }
 0x11c   : > { %3114 = vmatprep.subr.bf16.mxu1 %v6451_v58  ;;  %v772_v58 = vrot.slane %v7655_v22, %v7874_v53 }
 0x11d   : > { %3074 = vmatpush1.bf16.msra.mxu0 %v6356_v59  ;;  %v6488_v59 = vld [vmem:[%s8724_s1 + $0x8c8] ss:$48 sps:$4 sm:$0xff]  }
 0x11e   : > { %3075 = vmatprep.subr.bf16.mxu0 %v6361_v60 }
 0x11f   : > { %3115 = vmatpush1.bf16.msra.mxu1 %v6449_v61 }
 0x120   : > { %3116 = vmatprep.subr.bf16.mxu1 %v6457_v62  ;;  %v6493_v62 = vld [vmem:[%s8724_s1 + $0x86c] ss:$48 sps:$4 sm:$0xff]  }
 0x121   : > { %3076 = vmatpush1.bf16.msra.mxu0 %v6359_v63 }
 0x122   : > { %3077 = vmatprep.subr.bf16.mxu0 %v6364_v0  ;;  %v6395_v0 = vld [vmem:[%s8724_s1 + $0x268] ss:$48 sps:$4 sm:$0xff]  }
 0x123   : > { %3117 = vmatpush1.bf16.msra.mxu1 %v6455_v1 }
 0x124   : > { %3118 = vmatprep.subr.bf16.mxu1 %v6460_v2 }
 0x125   : > { %3078 = vmatpush1.bf16.msra.mxu0 %v6362_v3  ;;  %v6400_v3 = vld [vmem:[%s8724_s1 + $0x20c] ss:$48 sps:$4 sm:$0xff]  }
 0x126   : > { %3079 = vmatprep.subr.bf16.mxu0 %v6367_v4 }
 0x127   : > { %3119 = vmatpush1.bf16.msra.mxu1 %v6458_v5 }
 0x128   : > { %3120 = vmatprep.subr.bf16.mxu1 %v6463_v6  ;;  %v6491_v6 = vld [vmem:[%s8724_s1 + $0x868] ss:$48 sps:$4 sm:$0xff]  }
 0x129   : > { %3080 = vmatpush1.bf16.msra.mxu0 %v6365_v7 }
 0x12a   : > { %3081 = vmatprep.subr.bf16.mxu0 %v6370_v10  ;;  %v6496_v10 = vld [vmem:[%s8724_s1 + $0x80c] ss:$48 sps:$4 sm:$0xff]  }
 0x12b   : > { %3121 = vmatpush1.bf16.msra.mxu1 %v6461_v11 }
 0x12c   : > { %3122 = vmatprep.subr.bf16.mxu1 %v6466_v13 }
 0x12d   : > { %3082 = vmatpush2.bf16.msra.mxu0 %v6368_v12  ;;  %v6398_v12 = vld [vmem:[%s8724_s1 + $0x208] ss:$48 sps:$4 sm:$0xff]  }
 0x12e   : > { %3083 = vmatprep.subr.bf16.mxu0 %v6373_v14 }
 0x12f   : > { %3123 = vmatpush2.bf16.msra.mxu1 %v6464_v16  ;;  %v6494_v16 = vld [vmem:[%s8724_s1 + $0x808] ss:$48 sps:$4 sm:$0xff]  }
 0x130   : > { %3124 = vmatprep.subr.bf16.mxu1 %v6469_v17  ;;  %v6499_v17 = vld [vmem:[%s8724_s1 + $0x7ac] ss:$48 sps:$4 sm:$0xff]  }
 0x131   : > { %3084 = vmatpush2.bf16.msra.mxu0 %v6371_v18  ;;  %v6401_v18 = vld [vmem:[%s8724_s1 + $0x1a8] ss:$48 sps:$4 sm:$0xff]  }
 0x132   : > { %3085 = vmatprep.subr.bf16.mxu0 %v6376_v19  ;;  %v6406_v19 = vld [vmem:[%s8724_s1 + $0x14c] ss:$48 sps:$4 sm:$0xff]  }
 0x133   : > { %3125 = vmatpush2.bf16.msra.mxu1 %v6467_v20  ;;  %v6497_v20 = vld [vmem:[%s8724_s1 + $0x7a8] ss:$48 sps:$4 sm:$0xff]  }
 0x134   : > { %3126 = vmatprep.subr.bf16.mxu1 %v6472_v21  ;;  %v6502_v21 = vld [vmem:[%s8724_s1 + $0x74c] ss:$48 sps:$4 sm:$0xff]  }
 0x135   : > { %3086 = vmatpush2.bf16.msra.mxu0 %v6374_v23  ;;  %v6404_v23 = vld [vmem:[%s8724_s1 + $0x148] ss:$48 sps:$4 sm:$0xff]  }
 0x136   : > { %3087 = vmatprep.subr.bf16.mxu0 %v6379_v24  ;;  %v6409_v24 = vld [vmem:[%s8724_s1 + $0xec] ss:$48 sps:$4 sm:$0xff]  }
 0x137   : > { %3127 = vmatpush2.bf16.msra.mxu1 %v6470_v27  ;;  %v6500_v27 = vld [vmem:[%s8724_s1 + $0x748] ss:$48 sps:$4 sm:$0xff]  }
 0x138   : > { %3128 = vmatprep.subr.bf16.mxu1 %v6475_v28  ;;  %v6505_v28 = vld [vmem:[%s8724_s1 + $0x6ec] ss:$48 sps:$4 sm:$0xff]  }
 0x139   : > { %3088 = vmatpush2.bf16.msra.mxu0 %v6377_v29  ;;  %v6407_v29 = vld [vmem:[%s8724_s1 + $0xe8] ss:$48 sps:$4 sm:$0xff]  }
 0x13a   : > { %3089 = vmatprep.subr.bf16.mxu0 %v6382_v30  ;;  %v6412_v30 = vld [vmem:[%s8724_s1 + $0x8c] ss:$48 sps:$4 sm:$0xff]  }
 0x13b   : > { %3129 = vmatpush2.bf16.msra.mxu1 %v6473_v31  ;;  %v6503_v31 = vld [vmem:[%s8724_s1 + $0x6e8] ss:$48 sps:$4 sm:$0xff]  }
 0x13c   : > { %3130 = vmatprep.subr.bf16.mxu1 %v6478_v32  ;;  %v6508_v32 = vld [vmem:[%s8724_s1 + $0x68c] ss:$48 sps:$4 sm:$0xff]  }
 0x13d   : > { %3090 = vmatpush2.bf16.msra.mxu0 %v6380_v33  ;;  %v6410_v33 = vld [vmem:[%s8724_s1 + $0x88] ss:$48 sps:$4 sm:$0xff]  }
 0x13e   : > { %3091 = vmatprep.subr.bf16.mxu0 %v6385_v34  ;;  %v6415_v34 = vld [vmem:[%s8724_s1 + $0x2c] ss:$48 sps:$4 sm:$0xff]  }
 0x13f   : > { %3131 = vmatpush2.bf16.msra.mxu1 %v6476_v35  ;;  %v6506_v35 = vld [vmem:[%s8724_s1 + $0x688] ss:$48 sps:$4 sm:$0xff]  }
 0x140   : > { %3132 = vmatprep.subr.bf16.mxu1 %v6481_v36  ;;  %v6511_v36 = vld [vmem:[%s8724_s1 + $0x62c] ss:$48 sps:$4 sm:$0xff]  }
 0x141   : > { %3092 = vmatpush2.bf16.msra.mxu0 %v6383_v37  ;;  %v6413_v37 = vld [vmem:[%s8724_s1 + $0x28] ss:$48 sps:$4 sm:$0xff]  }
 0x142   : > { %3093 = vmatprep.subr.bf16.mxu0 %v6388_v38  ;;  %v6418_v38 = vld [vmem:[%s8724_s1 + $0x5cc] ss:$48 sps:$4 sm:$0xff]  }
 0x143   : > { %3133 = vmatpush2.bf16.msra.mxu1 %v6479_v39  ;;  %v6509_v39 = vld [vmem:[%s8724_s1 + $0x628] ss:$48 sps:$4 sm:$0xff]  }
 0x144   : > { %3134 = vmatprep.subr.bf16.mxu1 %v6484_v40  ;;  %v6514_v40 = vld [vmem:[%s8724_s1 + $0xbcc] ss:$48 sps:$4 sm:$0xff]  }
 0x145   : > { %3094 = vmatpush2.bf16.msra.mxu0 %v6386_v41  ;;  %v6416_v41 = vld [vmem:[%s8724_s1 + $0x5c8] ss:$48 sps:$4 sm:$0xff]  }
 0x146   : > { %3095 = vmatprep.subr.bf16.mxu0 %v6391_v43  ;;  %v6421_v43 = vld [vmem:[%s8724_s1 + $0x56c] ss:$48 sps:$4 sm:$0xff]  }
 0x147   : > { %3135 = vmatpush2.bf16.msra.mxu1 %v6482_v44  ;;  %v6512_v44 = vld [vmem:[%s8724_s1 + $0xbc8] ss:$48 sps:$4 sm:$0xff]  }
 0x148   : > { %3136 = vmatprep.subr.bf16.mxu1 %v6487_v45  ;;  %v6517_v45 = vld [vmem:[%s8724_s1 + $0xb6c] ss:$48 sps:$4 sm:$0xff]  }
 0x149   : > { %3096 = vmatpush2.bf16.msra.mxu0 %v6389_v47  ;;  %v6419_v47 = vld [vmem:[%s8724_s1 + $0x568] ss:$48 sps:$4 sm:$0xff]  }
 0x14a   : > { %3147 = vmatprep.subr.bf16.mxu0 %v6394_v48  ;;  %v6424_v48 = vld [vmem:[%s8724_s1 + $0x50c] ss:$48 sps:$4 sm:$0xff]  }
 0x14b   : > { %3137 = vmatpush2.bf16.msra.mxu1 %v6485_v51  ;;  %v6515_v51 = vld [vmem:[%s8724_s1 + $0xb68] ss:$48 sps:$4 sm:$0xff]  }
 0x14c   : > { %3188 = vmatprep.subr.bf16.mxu1 %v6490_v54  ;;  %v2853_v60 = vpop.f32.mrf.mxu0  ;;  %3098 = vmatmul.mubr.bf16.vlgmr.msra.gmra.mxu0 %v7064_v8  ;;  %v6520_v54 = vld [vmem:[%s8724_s1 + $0xb0c] ss:$48 sps:$4 sm:$0xff]  }
 0x14d   : > { %v2894_v61 = vpop.f32.mrf.mxu1  ;;  %v2854_v63 = vadd.f32 %v2853_v60, %v768_v55  ;;  %3148 = vmatpush1.bf16.msra.mxu0 %v6392_v56  ;;  %3179 = vmatprep.mubr.bf16.mxu0 %v7001_v49  ;;  %v6422_v55 = vld [vmem:[%s8724_s1 + $0x508] ss:$48 sps:$4 sm:$0xff]   ;;  %v6430_v56 = vld [vmem:[%s8724_s1 + $0x4ac] ss:$48 sps:$4 sm:$0xff]  }
 0x14e   : > { %v2855_v1 = vpop.f32.mrf.mxu0  ;;  %3149 = vmatprep.subr.bf16.mxu0 %v6397_v57  ;;  %3139 = vmatmul.mubr.bf16.vlgmr.msra.gmra.mxu1 %v7066_v9  ;;  %v6518_v57 = vld [vmem:[%s8724_s1 + $0xb08] ss:$48 sps:$4 sm:$0xff]   ;;  %v6436_v60 = vld [vmem:[%s8724_s1 + $0x44c] ss:$48 sps:$4 sm:$0xff]  }
 0x14f   : > { %v2896_v2 = vpop.f32.mrf.mxu1  ;;  %v7904_v4 = vadd.f32 %v2894_v61, %v2854_v63  ;;  %v2856_v5 = vadd.f32 %v2855_v1, %v772_v58  ;;  %3189 = vmatpush1.bf16.msra.mxu1 %v6488_v59  ;;  %3220 = vmatprep.mubr.bf16.mxu1 %v7007_v52  ;;  %v6403_v52 = vld [vmem:[%s8724_s1 + $0x1ac] ss:$48 sps:$4 sm:$0xff]   ;;  %v6428_v59 = vld [vmem:[%s8724_s1 + $0x4a8] ss:$48 sps:$4 sm:$0xff]  }
 0x150   : > { %v2857_v49 = vpop.f32.mrf.mxu0  ;;  %3190 = vmatprep.subr.bf16.mxu1 %v6493_v62  ;;  %v6523_v58 = vld [vmem:[%s8724_s1 + $0xaac] ss:$48 sps:$4 sm:$0xff]   ;;  %v6521_v61 = vld [vmem:[%s8724_s1 + $0xaa8] ss:$48 sps:$4 sm:$0xff]  }
 0x151   : > { %v2898_v7 = vpop.f32.mrf.mxu1  ;;  %v7913_v11 = vadd.f32 %v2896_v2, %v2856_v5  ;;  %3150 = vmatpush1.bf16.msra.mxu0 %v6395_v0  ;;  %v6526_v62 = vld [vmem:[%s8724_s1 + $0xa4c] ss:$48 sps:$4 sm:$0xff]   ;;  %v6434_v63 = vld [vmem:[%s8724_s1 + $0x448] ss:$48 sps:$4 sm:$0xff]  }
 0x152   : > { %v2858_v13 = vpop.f32.mrf.mxu0  ;;  %3151 = vmatprep.subr.bf16.mxu0 %v6400_v3  ;;  %v6442_v0 = vld [vmem:[%s8724_s1 + $0x3ec] ss:$48 sps:$4 sm:$0xff]   ;;  %v6524_v1 = vld [vmem:[%s8724_s1 + $0xa48] ss:$48 sps:$4 sm:$0xff]  }
 0x153   : > { %v2899_v14 = vpop.f32.mrf.mxu1  ;;  %3191 = vmatpush1.bf16.msra.mxu1 %v6491_v6  ;;  %v6529_v2 = vld [vmem:[%s8724_s1 + $0x9ec] ss:$48 sps:$4 sm:$0xff]   ;;  %v6440_v3 = vld [vmem:[%s8724_s1 + $0x3e8] ss:$48 sps:$4 sm:$0xff]  }
 0x154   : > { %3192 = vmatprep.subr.bf16.mxu1 %v6496_v10  ;;  %v6448_v5 = vld [vmem:[%s8724_s1 + $0x38c] ss:$48 sps:$4 sm:$0xff]   ;;  %v6527_v6 = vld [vmem:[%s8724_s1 + $0x9e8] ss:$48 sps:$4 sm:$0xff]   ;;  %v775_v14 = vsub.s32 4, %v7632_v15 }
 0x155   : > { %3152 = vmatpush1.bf16.msra.mxu0 %v6398_v12  ;;  %v6532_v49 = vld [vmem:[%s8724_s1 + $0x98c] ss:$48 sps:$4 sm:$0xff]   ;;  %v6446_v7 = vld [vmem:[%s8724_s1 + $0x388] ss:$48 sps:$4 sm:$0xff]  }
 0x156   : > { %3153 = vmatprep.subr.bf16.mxu0 %v6403_v52  ;;  %v6454_v10 = vld [vmem:[%s8724_s1 + $0x32c] ss:$48 sps:$4 sm:$0xff]   ;;  %v6530_v12 = vld [vmem:[%s8724_s1 + $0x988] ss:$48 sps:$4 sm:$0xff]  }
 0x157   : > { %3193 = vmatpush1.bf16.msra.mxu1 %v6494_v16  ;;  %v6535_v13 = vld [vmem:[%s8724_s1 + $0x92c] ss:$48 sps:$4 sm:$0xff]   ;;  %v6452_v52 = vld [vmem:[%s8724_s1 + $0x328] ss:$48 sps:$4 sm:$0xff]   ;;  %v779_v16 = vsub.s32 5, %v7632_v15 }
 0x158   : > { %3194 = vmatprep.subr.bf16.mxu1 %v6499_v17  ;;  %v6533_v17 = vld [vmem:[%s8724_s1 + $0x928] ss:$48 sps:$4 sm:$0xff]  }
 0x159   : > { %3154 = vmatpush1.bf16.msra.mxu0 %v6401_v18  ;;  %v776_v18 = vrot.slane %v7655_v22, %v775_v14 }
 0x15a   : > { %3155 = vmatprep.subr.bf16.mxu0 %v6406_v19  ;;  %v6776_v19 = vmov 0.0  }
 0x15b   : > { %3195 = vmatpush1.bf16.msra.mxu1 %v6497_v20  ;;  %v780_v20 = vrot.slane %v7655_v22, %v779_v16 }
 0x15c   : > { %3196 = vmatprep.subr.bf16.mxu1 %v6502_v21 }
 0x15d   : > { %3156 = vmatpush1.bf16.msra.mxu0 %v6404_v23 }
 0x15e   : > { %3157 = vmatprep.subr.bf16.mxu0 %v6409_v24 }
 0x15f   : > { %3197 = vmatpush1.bf16.msra.mxu1 %v6500_v27 }
 0x160   : > { %3198 = vmatprep.subr.bf16.mxu1 %v6505_v28 }
 0x161   : > { %3158 = vmatpush1.bf16.msra.mxu0 %v6407_v29 }
 0x162   : > { %3159 = vmatprep.subr.bf16.mxu0 %v6412_v30 }
 0x163   : > { %3199 = vmatpush1.bf16.msra.mxu1 %v6503_v31 }
 0x164   : > { %3200 = vmatprep.subr.bf16.mxu1 %v6508_v32 }
 0x165   : > { %3160 = vmatpush1.bf16.msra.mxu0 %v6410_v33 }
 0x166   : > { %3161 = vmatprep.subr.bf16.mxu0 %v6415_v34 }
 0x167   : > { %3201 = vmatpush1.bf16.msra.mxu1 %v6506_v35 }
 0x168   : > { %3202 = vmatprep.subr.bf16.mxu1 %v6511_v36 }
 0x169   : > { %3162 = vmatpush1.bf16.msra.mxu0 %v6413_v37 }
 0x16a   : > { %3163 = vmatprep.subr.bf16.mxu0 %v6418_v38  ;;  %v3461_v38 = vpack.c.bf16 %v7712_v50, %v7712_v50  ;;  %v783_v50 = vsub.s32 6, %v7632_v15 }
 0x16b   : > { %3203 = vmatpush1.bf16.msra.mxu1 %v6509_v39  ;;  %v8101_v39 = vpack.c.bf16 %v7904_v4, %v7904_v4  ;;  %v787_v4 = vsub.s32 7, %v7632_v15 }
 0x16c   : > { %3204 = vmatprep.subr.bf16.mxu1 %v6514_v40  ;;  %v784_v40 = vrot.slane %v7655_v22, %v783_v50 }
 0x16d   : > { %3164 = vmatpush2.bf16.msra.mxu0 %v6416_v41  ;;  %v788_v41 = vrot.slane %v7655_v22, %v787_v4 }
 0x16e   : > { %3165 = vmatprep.subr.bf16.mxu0 %v6421_v43 }
 0x16f   : > { %3205 = vmatpush2.bf16.msra.mxu1 %v6512_v44 }
 0x170   : > { %3206 = vmatprep.subr.bf16.mxu1 %v6517_v45 }
 0x171   : > { %3166 = vmatpush2.bf16.msra.mxu0 %v6419_v47 }
 0x172   : > { %3167 = vmatprep.subr.bf16.mxu0 %v6424_v48 }
 0x173   : > { %3207 = vmatpush2.bf16.msra.mxu1 %v6515_v51 }
 0x174   : > { %3208 = vmatprep.subr.bf16.mxu1 %v6520_v54 }
 0x175   : > { %3168 = vmatpush2.bf16.msra.mxu0 %v6422_v55 }
 0x176   : > { %3169 = vmatprep.subr.bf16.mxu0 %v6430_v56 }
 0x177   : > { %3209 = vmatpush2.bf16.msra.mxu1 %v6518_v57 }
 0x178   : > { %3210 = vmatprep.subr.bf16.mxu1 %v6523_v58 }
 0x179   : > { %3170 = vmatpush2.bf16.msra.mxu0 %v6428_v59 }
 0x17a   : > { %3171 = vmatprep.subr.bf16.mxu0 %v6436_v60 }
 0x17b   : > { %3211 = vmatpush2.bf16.msra.mxu1 %v6521_v61  ;;  %v754_v61 = vld [vmem:[%s8725_s2 + $0x8] sm:$0xf] }
 0x17c   : > { %3212 = vmatprep.subr.bf16.mxu1 %v6526_v62  ;;  %v792_v62 = vrot.slane %v754_v61, %v7664_v25 }
 0x17d   : > { %3172 = vmatpush2.bf16.msra.mxu0 %v6434_v63  ;;  %v796_v63 = vrot.slane %v754_v61, %v7667_v26 }
 0x17e   : > { %3173 = vmatprep.subr.bf16.mxu0 %v6442_v0 }
 0x17f   : > { %3213 = vmatpush2.bf16.msra.mxu1 %v6524_v1 }
 0x180   : > { %3214 = vmatprep.subr.bf16.mxu1 %v6529_v2 }
 0x181   : > { %3174 = vmatpush2.bf16.msra.mxu0 %v6440_v3 }
 0x182   : > { %3175 = vmatprep.subr.bf16.mxu0 %v6448_v5 }
 0x183   : > { %3215 = vmatpush2.bf16.msra.mxu1 %v6527_v6 }
 0x184   : > { %3216 = vmatprep.subr.bf16.mxu1 %v6532_v49 }
 0x185   : > { %3176 = vmatpush2.bf16.msra.mxu0 %v6446_v7 }
 0x186   : > { %3177 = vmatprep.subr.bf16.mxu0 %v6454_v10 }
 0x187   : > { %3217 = vmatpush2.bf16.msra.mxu1 %v6530_v12 }
 0x188   : > { %3218 = vmatprep.subr.bf16.mxu1 %v6535_v13 }
 0x189   : > { %3178 = vmatpush2.bf16.msra.mxu0 %v6452_v52 }
 0x18a   : > { %5853 = vmatprep.subr.bf16.mxu0 %v6776_v19 }
 0x18b   : > { %3219 = vmatpush2.bf16.msra.mxu1 %v6533_v17 }
 0x18c   : > { %v2935_v21 = vpop.f32.mrf.mxu0  ;;  %3180 = vmatmul.mubr.bf16.vlgmr.msra.gmra.mxu0 %v7064_v8  ;;  %5859 = vmatprep.subr.bf16.mxu1 %v6776_v19 }
 0x18d   : > { %v2976_v23 = vpop.f32.mrf.mxu1  ;;  %v2936_v24 = vadd.f32 %v2935_v21, %v776_v18  ;;  %5855 = vmatprep.mubr.msk.bf16.mxu0 %vm6777_vm0, %v6776_v19 }
 0x18e   : > { %v2937_v27 = vpop.f32.mrf.mxu0  ;;  %3221 = vmatmul.mubr.bf16.vlgmr.msra.gmra.mxu1 %v7066_v9  ;;  %v3229_v9 = vpack.c.bf16 %v7700_v42, %v7700_v42  ;;  %v8110_v42 = vpack.c.bf16 %v7913_v11, %v7913_v11 }
 0x18f   : > { %v2978_v28 = vpop.f32.mrf.mxu1  ;;  %v2977_v29 = vadd.f32 %v2976_v23, %v2936_v24  ;;  %v2938_v30 = vadd.f32 %v2937_v27, %v780_v20  ;;  %5861 = vmatprep.mubr.msk.bf16.mxu1 %vm6777_vm0, %v6776_v19 }
 0x190   : > { %v2939_v31 = vpop.f32.mrf.mxu0 }
 0x191   : > { %v2980_v32 = vpop.f32.mrf.mxu1  ;;  %v3230_v8 = vpack.c.bf16 %v2977_v29, %v2977_v29  ;;  %v2979_v33 = vadd.f32 %v2978_v28, %v2938_v30  ;;  %v800_v29 = vrot.slane %v754_v61, %v7862_v46  ;;  %v804_v30 = vrot.slane %v754_v61, %v7874_v53 }
 0x192   : > { %v2940_v34 = vpop.f32.mrf.mxu0 }
 0x193   : > { %v2981_v35 = vpop.f32.mrf.mxu1  ;;  %v3237_v36 = vsel %vm3232_vm1, %v3230_v8, 0  ;;  %v3462_v37 = vpack.c.bf16 %v2979_v33, %v2979_v33  ;;  %3345 = vrot.lane.b32.xlu0 %v3230_v8, %s6778_s28 }
 0x194   : > { %5854 = vmatpush3.bf16.xpose.msra.mxu0 %v3237_v36 }
 0x195   : > { %3574 = vrot.lane.b32.xlu1 %v3462_v37, %s6778_s28  ;;  %5865 = vmatprep.subr.bf16.mxu0 %v6776_v19  ;;  %v3468_v3 = vsel %vm3232_vm1, %v3462_v37, 0 }
 0x197   : > { %3342 = vrot.lane.b32.xlu0 %v3229_v9, %s6778_s28 }
 0x199   : > { %3571 = vrot.lane.b32.xlu1 %v3461_v38, %s6778_s28 }
 0x19b   : > { %5856 = vmatmul.mubr.msk.bf16.vlgmr.msra.gmra.mxu0 %vm3232_vm1, %v3229_v9 }
 0x19c   : > { %5867 = vmatprep.mubr.msk.bf16.mxu0 %vm6777_vm0, %v6776_v19 }
 0x19d   : > { %3799 = vrot.lane.b32.xlu1 %v8101_v39, %s6778_s28 }
 0x1a1   : > { %4027 = vrot.lane.b32.xlu1 %v8110_v42, %s6778_s28 }
 0x1cc   : > { %v3017_v43 = vpop.f32.mrf.mxu0 }
 0x1cd   : > { %v3058_v44 = vpop.f32.mrf.mxu1  ;;  %v3018_v45 = vadd.f32 %v3017_v43, %v784_v40 }
 0x1ce   : > { %v3019_v47 = vpop.f32.mrf.mxu0 }
 0x1cf   : > { %v3060_v48 = vpop.f32.mrf.mxu1  ;;  %v3059_v51 = vadd.f32 %v3058_v44, %v3018_v45  ;;  %v3020_v54 = vadd.f32 %v3019_v47, %v788_v41 }
 0x1d0   : > { %v3021_v11 = vpop.f32.mrf.mxu0 }
 0x1d1   : > { %v3062_v55 = vpop.f32.mrf.mxu1  ;;  %v3690_v56 = vpack.c.bf16 %v3059_v51, %v3059_v51  ;;  %v3061_v57 = vadd.f32 %v3060_v48, %v3020_v54 }
 0x1d2   : > { %v3022_v58 = vpop.f32.mrf.mxu0 }
 0x1d3   : > { %v3063_v59 = vpop.f32.mrf.mxu1  ;;  %v3918_v60 = vpack.c.bf16 %v3061_v57, %v3061_v57  ;;  %3802 = vrot.lane.b32.xlu0 %v3690_v56, %s6778_s28  ;;  %v3696_v24 = vsel %vm3232_vm1, %v3690_v56, 0 }
 0x1d5   : > { %v3924_v33 = vsel %vm3232_vm1, %v3918_v60, 0 }
 0x1d7   : > { %4030 = vrot.lane.b32.xlu0 %v3918_v60, %s6778_s28 }
 0x205   : > { %v3346_v15 = vpop.permute.xlu0 %3345 }
 0x206   : > { %v3351_v22 = vsel %vm3232_vm1, %v3346_v15, 0 }
 0x207   : > { %5866 = vmatpush3.bf16.xpose.msra.mxu0 %v3351_v22  ;;  %v3575_v17 = vpop.permute.xlu1 %3574 }
 0x208   : > { %5877 = vmatprep.subr.bf16.mxu0 %v6776_v19  ;;  %v3580_v21 = vsel %vm3232_vm1, %v3575_v17, 0 }
 0x209   : > { %v3343_v1 = vpop.permute.xlu0 %3342 }
 0x20b   : > { %v3572_v23 = vpop.permute.xlu1 %3571 }
 0x20c   : > { %v3099_v0 = vpop.f32.mrf.mxu0 }
 0x20d   : > { %v3100_v2 = vadd.f32 %v3099_v0, %v792_v62 }
 0x20e   : > { %5868 = vmatmul.mubr.msk.bf16.vlgmr.msra.gmra.mxu0 %vm3232_vm1, %v3343_v1  ;;  %v3101_v5 = vpop.f32.mrf.mxu0  ;;  %v3140_v6 = vpop.f32.mrf.mxu1 }
 0x20f   : > { %5878 = vmatpush3.bf16.xpose.msra.mxu0 %v3468_v3  ;;  %5879 = vmatprep.mubr.msk.bf16.mxu0 %vm6777_vm0, %v6776_v19  ;;  %v3102_v49 = vadd.f32 %v3101_v5, %v796_v63  ;;  %v3141_v7 = vadd.f32 %v3140_v6, %v3100_v2  ;;  %v3800_v32 = vpop.permute.xlu1 %3799 }
 0x210   : > { %5889 = vmatprep.subr.bf16.mxu0 %v6776_v19  ;;  %v3103_v10 = vpop.f32.mrf.mxu0  ;;  %v3142_v12 = vpop.f32.mrf.mxu1 }
 0x211   : > { %v8132_v13 = vpack.c.bf16 %v3141_v7, %v3141_v7  ;;  %v8134_v14 = vadd.f32 %v3142_v12, %v3102_v49 }
 0x212   : > { %v3104_v52 = vpop.f32.mrf.mxu0  ;;  %v3144_v16 = vpop.f32.mrf.mxu1 }
 0x213   : > { %v3298_v18 = vsel %vm3296_vm2, %v8132_v13, 0  ;;  %v4028_v47 = vpop.permute.xlu1 %4027 }
 0x214   : > { %5860 = vmatpush3.bf16.msra.mxu1 %v3298_v18  ;;  %v3145_v20 = vpop.f32.mrf.mxu1 }
 0x215   : > { %5871 = vmatprep.subr.bf16.mxu1 %v6776_v19 }
 0x216   : > { %5880 = vmatmul.mubr.msk.bf16.vlgmr.msra.gmra.mxu0 %vm3232_vm1, %v3461_v38 }
 0x217   : > { %5890 = vmatpush3.bf16.xpose.msra.mxu0 %v3580_v21  ;;  %5891 = vmatprep.mubr.msk.bf16.mxu0 %vm6777_vm0, %v6776_v19 }
 0x218   : > { %5901 = vmatprep.subr.bf16.mxu0 %v6776_v19 }
 0x21e   : > { %5892 = vmatmul.mubr.msk.bf16.vlgmr.msra.gmra.mxu0 %vm3232_vm1, %v3572_v23 }
 0x21f   : > { %5902 = vmatpush3.bf16.xpose.msra.mxu0 %v3696_v24  ;;  %5903 = vmatprep.mubr.msk.bf16.mxu0 %vm6777_vm0, %v6776_v19 }
 0x220   : > { %5913 = vmatprep.subr.bf16.mxu0 %v6776_v19 }
 0x226   : > { %5904 = vmatmul.mubr.msk.bf16.vlgmr.msra.gmra.mxu0 %vm3232_vm1, %v8101_v39 }
 0x227   : > { %5915 = vmatprep.mubr.msk.bf16.mxu0 %vm6777_vm0, %v6776_v19 }
 0x245   : > { %v3803_v27 = vpop.permute.xlu0 %3802 }
 0x246   : > { %v3808_v28 = vsel %vm3232_vm1, %v3803_v27, 0 }
 0x247   : > { %5914 = vmatpush3.bf16.xpose.msra.mxu0 %v3808_v28 }
 0x248   : > { %5925 = vmatprep.subr.bf16.mxu0 %v6776_v19 }
 0x249   : > { %v4031_v40 = vpop.permute.xlu0 %4030 }
 0x24a   : > { %v4036_v43 = vsel %vm3232_vm1, %v4031_v40, 0 }
 0x24c   : > { %v3181_v31 = vpop.f32.mrf.mxu0 }
 0x24d   : > { %v3182_v8 = vadd.f32 %v3181_v31, %v800_v29 }
 0x24e   : > { %5916 = vmatmul.mubr.msk.bf16.vlgmr.msra.gmra.mxu0 %vm3232_vm1, %v3800_v32  ;;  %v3183_v34 = vpop.f32.mrf.mxu0  ;;  %v3222_v35 = vpop.f32.mrf.mxu1 }
 0x24f   : > { %5926 = vmatpush3.bf16.xpose.msra.mxu0 %v3924_v33  ;;  %v3184_v36 = vadd.f32 %v3183_v34, %v804_v30  ;;  %5927 = vmatprep.mubr.msk.bf16.mxu0 %vm6777_vm0, %v6776_v19  ;;  %v8161_v37 = vadd.f32 %v3222_v35, %v3182_v8 }
 0x250   : > { %5937 = vmatprep.subr.bf16.mxu0 %v6776_v19  ;;  %v3185_v9 = vpop.f32.mrf.mxu0  ;;  %v3224_v38 = vpop.f32.mrf.mxu1 }
 0x251   : > { %v8164_v39 = vadd.f32 %v3224_v38, %v3184_v36 }
 0x252   : > { %v3186_v50 = vpop.f32.mrf.mxu0  ;;  %v3226_v4 = vpop.f32.mrf.mxu1 }
 0x254   : > { %v3227_v41 = vpop.f32.mrf.mxu1 }
 0x256   : > { %5928 = vmatmul.mubr.msk.bf16.vlgmr.msra.gmra.mxu0 %vm3232_vm1, %v8110_v42 }
 0x257   : > { %5938 = vmatpush3.bf16.xpose.msra.mxu0 %v4036_v43  ;;  %5939 = vmatprep.mubr.msk.bf16.mxu0 %vm6777_vm0, %v6776_v19 }
 0x25b   : > { %v3273_v44 = vpop.f32.mrf.mxu0 }
 0x25c   : > { %v3279_v45 = vmul.f32 0.088388346, %v3273_v44 }
 0x25d   : > { %v5857_v48 = vpop.f32.mrf.mxu0 }
 0x25e   : > { %5940 = vmatmul.mubr.msk.bf16.vlgmr.msra.gmra.mxu0 %vm3232_vm1, %v4028_v47  ;;  %v3281_v51 = vsel %vm3280_vm3, %v3279_v45, -inf }
 0x25f   : > { %3282 = vmax.xlane.f32.xlu0 %v3281_v51  ;;  %v3276_v54 = vpop.f32.mrf.mxu0 }
 0x261   : > { %v5858_v11 = vpop.f32.mrf.mxu0 }
 0x2ce   : > { %v3387_v55 = vpop.f32.mrf.mxu0 }
 0x2cf   : > { %v3393_v56 = vmul.f32 0.088388346, %v3387_v55 }
 0x2d0   : > { %v5869_v57 = vpop.f32.mrf.mxu0 }
 0x2d1   : > { %v3394_v42 = vsel %vm3280_vm3, %v3393_v56, -inf }
 0x2d2   : > { %3395 = vmax.xlane.f32.xlu1 %v3394_v42  ;;  %v3390_v58 = vpop.f32.mrf.mxu0 }
 0x2d4   : > { %v5870_v59 = vpop.f32.mrf.mxu0 }
 0x2d6   : > { %v3504_v60 = vpop.f32.mrf.mxu0 }
 0x2d7   : > { %v3510_v15 = vmul.f32 0.088388346, %v3504_v60 }
 0x2d8   : > { %v5881_v22 = vpop.f32.mrf.mxu0 }
 0x2d9   : > { %v3511_v61 = vsel %vm3280_vm3, %v3510_v15, -inf }
 0x2da   : > { %3512 = vmax.xlane.f32.xlu0 %v3511_v61  ;;  %v3507_v62 = vpop.f32.mrf.mxu0 }
 0x2dc   : > { %v5882_v63 = vpop.f32.mrf.mxu0 }
 0x2de   : > { %v3616_v0 = vpop.f32.mrf.mxu0 }
 0x2df   : > { %v3622_v1 = vmul.f32 0.088388346, %v3616_v0 }
 0x2e0   : > { %v5893_v2 = vpop.f32.mrf.mxu0 }
 0x2e1   : > { %v3623_v3 = vsel %vm3280_vm3, %v3622_v1, -inf }
 0x2e2   : > { %3624 = vmax.xlane.f32.xlu0 %v3623_v3  ;;  %v3619_v5 = vpop.f32.mrf.mxu0 }
 0x2e4   : > { %v5894_v6 = vpop.f32.mrf.mxu0 }
 0x2e6   : > { %v3732_v49 = vpop.f32.mrf.mxu0 }
 0x2e7   : > { %v3738_v7 = vmul.f32 0.088388346, %v3732_v49 }
 0x2e8   : > { %v5905_v10 = vpop.f32.mrf.mxu0  ;;  %v3283_v17 = vpop.xlane.xlu0 %3282 }
 0x2e9   : > { %v3739_v12 = vsel %vm3280_vm3, %v3738_v7, -inf  ;;  %v3284_v18 = vsub.f32 %v3279_v45, %v3283_v17 }
 0x2ea   : > { %3740 = vmax.xlane.f32.xlu1 %v3739_v12  ;;  %v3735_v52 = vpop.f32.mrf.mxu0 }
 0x2eb   : > { %v3285_v20 = vmul.f32 1.442695, %v3284_v18 }
 0x2ec   : > { %v5906_v16 = vpop.f32.mrf.mxu0 }
 0x2ed   : > { %6728 = vpow2.f32 %v3285_v20 }
 0x2fa   : > { %v8179_v33 = vpop.eup %6728 }
 0x2fb   : > { %v3287_v36 = vsel %vm3280_vm3, %v8179_v33, 0.0 }
 0x30e   : > { %v3844_v21 = vpop.f32.mrf.mxu0 }
 0x30f   : > { %v3850_v23 = vmul.f32 0.088388346, %v3844_v21 }
 0x310   : > { %v5917_v24 = vpop.f32.mrf.mxu0 }
 0x311   : > { %v3851_v27 = vsel %vm3280_vm3, %v3850_v23, -inf }
 0x312   : > { %3852 = vmax.xlane.f32.xlu0 %v3851_v27  ;;  %v3847_v28 = vpop.f32.mrf.mxu0  ;;  %v3691_v27 = vpack.c.bf16 %v8161_v37, %v8161_v37 }
 0x313   : > { %v3919_v28 = vpack.c.bf16 %v8164_v39, %v8164_v39 }
 0x314   : > { %v5918_v29 = vpop.f32.mrf.mxu0 }
 0x316   : > { %v3960_v30 = vpop.f32.mrf.mxu0 }
 0x317   : > { %v3966_v31 = vmul.f32 0.088388346, %v3960_v30 }
 0x318   : > { %v5929_v32 = vpop.f32.mrf.mxu0 }
 0x319   : > { %v3967_v8 = vsel %vm3280_vm3, %v3966_v31, -inf }
 0x31a   : > { %3968 = vmax.xlane.f32.xlu1 %v3967_v8  ;;  %v3963_v34 = vpop.f32.mrf.mxu0 }
 0x31c   : > { %v5930_v35 = vpop.f32.mrf.mxu0 }
 0x31e   : > { %3288 = vadd.xlane.f32.xlu1 %v3287_v36  ;;  %v4072_v9 = vpop.f32.mrf.mxu0 }
 0x31f   : > { %v4078_v38 = vmul.f32 0.088388346, %v4072_v9 }
 0x320   : > { %v5941_v50 = vpop.f32.mrf.mxu0 }
 0x321   : > { %v4079_v4 = vsel %vm3280_vm3, %v4078_v38, -inf }
 0x322   : > { %4080 = vmax.xlane.f32.xlu0 %v4079_v4  ;;  %v4075_v40 = vpop.f32.mrf.mxu0 }
 0x324   : > { %v5942_v41 = vpop.f32.mrf.mxu0 }
 0x35b   : > { %v3396_v43 = vpop.xlane.xlu1 %3395 }
 0x35c   : > { %v3397_v44 = vsub.f32 %v3393_v56, %v3396_v43  ;;  %v3755_v43 = vsel %vm3296_vm2, %v3691_v27, 0 }
 0x35e   : > { %v3398_v45 = vmul.f32 1.442695, %v3397_v44 }
 0x360   : > { %6730 = vpow2.f32 %v3398_v45 }
 0x363   : > { %v3513_v47 = vpop.xlane.xlu0 %3512 }
 0x364   : > { %v3514_v48 = vsub.f32 %v3510_v15, %v3513_v47  ;;  %v3463_v15 = vpack.c.bf16 %v8134_v14, %v8134_v14 }
 0x366   : > { %v3515_v51 = vmul.f32 1.442695, %v3514_v48  ;;  %v3527_v39 = vsel %vm3296_vm2, %v3463_v15, 0 }
 0x368   : > { %6732 = vpow2.f32 %v3515_v51 }
 0x36b   : > { %v3625_v54 = vpop.xlane.xlu0 %3624 }
 0x36c   : > { %v3626_v11 = vsub.f32 %v3622_v1, %v3625_v54 }
 0x36d   : > { %v6731_v55 = vpop.eup %6730 }
 0x36e   : > { %v3627_v57 = vmul.f32 1.442695, %v3626_v11  ;;  %v3400_v42 = vsel %vm3280_vm3, %v6731_v55, 0.0 }
 0x36f   : > { %3401 = vadd.xlane.f32.xlu0 %v3400_v42 }
 0x370   : > { %6734 = vpow2.f32 %v3627_v57 }
 0x373   : > { %v3741_v22 = vpop.xlane.xlu1 %3740 }
 0x374   : > { %v3742_v61 = vsub.f32 %v3738_v7, %v3741_v22 }
 0x375   : > { %v8185_v58 = vpop.eup %6732 }
 0x376   : > { %v3517_v59 = vsel %vm3280_vm3, %v8185_v58, 0.0  ;;  %v3743_v62 = vmul.f32 1.442695, %v3742_v61 }
 0x377   : > { %3518 = vadd.xlane.f32.xlu1 %v3517_v59 }
 0x378   : > { %6736 = vpow2.f32 %v3743_v62 }
 0x37d   : > { %v8189_v56 = vpop.eup %6734 }
 0x37e   : > { %v3629_v60 = vsel %vm3280_vm3, %v8189_v56, 0.0 }
 0x37f   : > { %3630 = vadd.xlane.f32.xlu0 %v3629_v60  ;;  %v3983_v60 = vsel %vm3296_vm2, %v3919_v28, 0 }
 0x385   : > { %v8198_v49 = vpop.eup %6736 }
 0x386   : > { %v3745_v7 = vsel %vm3280_vm3, %v8198_v49, 0.0 }
 0x388   : > { %3636 = vrot.lane.b32.xlu1 %v3463_v15, %s6778_s28 }
 0x395   : > { %3407 = vrot.lane.b32.xlu0 %v8132_v13, %s6778_s28 }
 0x39b   : > { %v3853_v63 = vpop.xlane.xlu0 %3852 }
 0x39c   : > { %v3854_v0 = vsub.f32 %v3850_v23, %v3853_v63 }
 0x39e   : > { %v3855_v1 = vmul.f32 1.442695, %v3854_v0 }
 0x3a0   : > { %6738 = vpow2.f32 %v3855_v1 }
 0x3a3   : > { %v3969_v2 = vpop.xlane.xlu1 %3968 }
 0x3a4   : > { %v3970_v3 = vsub.f32 %v3966_v31, %v3969_v2 }
 0x3a6   : > { %v3971_v5 = vmul.f32 1.442695, %v3970_v3 }
 0x3a7   : > { %v3289_v6 = vpop.xlane.xlu1 %3288 }
 0x3a8   : > { %6740 = vpow2.f32 %v3971_v5 }
 0x3a9   : > { %6742 = vrcp.f32 %v3289_v6 }
 0x3ab   : > { %v4081_v14 = vpop.xlane.xlu0 %4080 }
 0x3ac   : > { %v4082_v10 = vsub.f32 %v4078_v38, %v4081_v14  ;;  %3746 = vadd.xlane.f32.xlu1 %v3745_v7  ;;  %v6536_v14 = vld [vmem:[%s8728_s5 + $0x70] ss:$8 sps:$4 sm:$0xff]   ;;  %v6539_v7 = vld [vmem:[%s8728_s5 + $0x60] ss:$8 sps:$4 sm:$0xff]  }
 0x3ad   : > { %v8202_v13 = vpop.eup %6738 }
 0x3ae   : > { %v4083_v12 = vmul.f32 1.442695, %v4082_v10  ;;  %v3857_v52 = vsel %vm3280_vm3, %v8202_v13, 0.0  ;;  %v6544_v10 = vld [vmem:[%s8728_s5 + $0x54] ss:$8 sps:$4 sm:$0xff]  }
 0x3b0   : > { %6744 = vpow2.f32 %v4083_v12  ;;  %3858 = vadd.xlane.f32.xlu1 %v3857_v52  ;;  %v6547_v12 = vld [vmem:[%s8728_s5 + $0x44] ss:$8 sps:$4 sm:$0xff]   ;;  %v6545_v52 = vld [vmem:[%s8728_s5 + $0x40] ss:$8 sps:$4 sm:$0xff]  }
 0x3b5   : > { %v8206_v16 = vpop.eup %6740 }
 0x3b6   : > { %v6743_v17 = vpop.eup %6742  ;;  %v3973_v18 = vsel %vm3280_vm3, %v8206_v16, 0.0 }
 0x3b7   : > { %3974 = vadd.xlane.f32.xlu1 %v3973_v18  ;;  %v3291_v20 = vmul.f32 %v6743_v17, %v8179_v33  ;;  %v6548_v17 = vld [vmem:[%s8728_s5 + $0x30] ss:$8 sps:$4 sm:$0xff]   ;;  %v6553_v18 = vld [vmem:[%s8728_s5 + $0x24] ss:$8 sps:$4 sm:$0xff]  }
 0x3b9   : > { %v3292_v21 = vpack.c.bf16 %v3291_v20, %v3291_v20  ;;  %v6551_v20 = vld [vmem:[%s8728_s5 + $0x20] ss:$8 sps:$4 sm:$0xff]  }
 0x3bb   : > { %5862 = vmatmul.mubr.msk.bf16.vlgmr.msra.gmra.mxu1 %vm3280_vm3, %v3292_v21  ;;  %v6556_v21 = vld [vmem:[%s8728_s5 + $0x14] ss:$8 sps:$4 sm:$0xff]  }
 0x3bc   : > { %5873 = vmatprep.mubr.msk.bf16.mxu1 %vm6777_vm0, %v6776_v19 }
 0x3bd   : > { %v8214_v23 = vpop.eup %6744 }
 0x3be   : > { %v4085_v24 = vsel %vm3280_vm3, %v8214_v23, 0.0 }
 0x3bf   : > { %4086 = vadd.xlane.f32.xlu0 %v4085_v24  ;;  %v6559_v24 = vld [vmem:[%s8728_s5 + $0x4] ss:$8 sps:$4 sm:$0xff]  }
 0x3c8   : > { %3864 = vrot.lane.b32.xlu1 %v3691_v27, %s6778_s28  ;;  %v6557_v27 = vld [vmem:[%s8728_s5] ss:$8 sps:$4 sm:$0xff]  }
 0x3cc   : > { %4092 = vrot.lane.b32.xlu1 %v3919_v28, %s6778_s28  ;;  %v6560_v28 = vld [vmem:[%s8728_s5 + $0xf0] ss:$8 sps:$4 sm:$0xff]  }
 0x3f8   : > { %v3402_v29 = vpop.xlane.xlu0 %3401 }
 0x3f9   : > { %6746 = vrcp.f32 %v3402_v29  ;;  %v6562_v29 = vld [vmem:[%s8728_s5 + $0xf4] ss:$8 sps:$4 sm:$0xff]  }
 0x400   : > { %v3519_v30 = vpop.xlane.xlu1 %3518 }
 0x401   : > { %6748 = vrcp.f32 %v3519_v30  ;;  %v6565_v30 = vld [vmem:[%s8728_s5 + $0xe4] ss:$8 sps:$4 sm:$0xff]  }
 0x404   : > { %v3637_v9 = vpop.permute.xlu1 %3636 }
 0x405   : > { %v3642_v4 = vsel %vm3296_vm2, %v3637_v9, 0  ;;  %v6574_v9 = vld [vmem:[%s8728_s5 + $0xb4] ss:$8 sps:$4 sm:$0xff]  }
 0x406   : > { %v6747_v31 = vpop.eup %6746 }
 0x407   : > { %v3404_v8 = vmul.f32 %v6747_v31, %v6731_v55  ;;  %v6563_v31 = vld [vmem:[%s8728_s5 + $0xe0] ss:$8 sps:$4 sm:$0xff]  }
 0x408   : > { %v3631_v32 = vpop.xlane.xlu0 %3630 }
 0x409   : > { %6750 = vrcp.f32 %v3631_v32  ;;  %v3405_v37 = vpack.c.bf16 %v3404_v8, %v3404_v8  ;;  %v6568_v32 = vld [vmem:[%s8728_s5 + $0xd4] ss:$8 sps:$4 sm:$0xff]   ;;  %v6566_v8 = vld [vmem:[%s8728_s5 + $0xd0] ss:$8 sps:$4 sm:$0xff]  }
 0x40c   : > { %v3408_v33 = vpop.permute.xlu0 %3407 }
 0x40d   : > { %v3413_v34 = vsel %vm3296_vm2, %v3408_v33, 0  ;;  %v6571_v33 = vld [vmem:[%s8728_s5 + $0xc4] ss:$8 sps:$4 sm:$0xff]  }
 0x40e   : > { %5872 = vmatpush3.bf16.msra.mxu1 %v3413_v34  ;;  %v6749_v35 = vpop.eup %6748  ;;  %v6569_v34 = vld [vmem:[%s8728_s5 + $0xc0] ss:$8 sps:$4 sm:$0xff]  }
 0x40f   : > { %5883 = vmatprep.subr.bf16.mxu1 %v6776_v19  ;;  %v3521_v36 = vmul.f32 %v6749_v35, %v8185_v58 }
 0x411   : > { %5874 = vmatmul.mubr.msk.bf16.vlgmr.msra.gmra.mxu1 %vm3280_vm3, %v3405_v37  ;;  %v3522_v38 = vpack.c.bf16 %v3521_v36, %v3521_v36  ;;  %v6572_v36 = vld [vmem:[%s8728_s5 + $0xb0] ss:$8 sps:$4 sm:$0xff]  }
 0x412   : > { %5884 = vmatpush3.bf16.msra.mxu1 %v3527_v39  ;;  %5885 = vmatprep.mubr.msk.bf16.mxu1 %vm6777_vm0, %v6776_v19 }
 0x413   : > { %5895 = vmatprep.subr.bf16.mxu1 %v6776_v19 }
 0x416   : > { %v6751_v50 = vpop.eup %6750 }
 0x417   : > { %v3633_v40 = vmul.f32 %v6751_v50, %v8189_v56 }
 0x419   : > { %5886 = vmatmul.mubr.msk.bf16.vlgmr.msra.gmra.mxu1 %vm3280_vm3, %v3522_v38  ;;  %v3634_v41 = vpack.c.bf16 %v3633_v40, %v3633_v40  ;;  %v6577_v38 = vld [vmem:[%s8728_s5 + $0xa4] ss:$8 sps:$4 sm:$0xff]  }
 0x41a   : > { %5896 = vmatpush3.bf16.msra.mxu1 %v3642_v4  ;;  %5897 = vmatprep.mubr.msk.bf16.mxu1 %vm6777_vm0, %v6776_v19  ;;  %v6575_v4 = vld [vmem:[%s8728_s5 + $0xa0] ss:$8 sps:$4 sm:$0xff]  }
 0x41b   : > { %5907 = vmatprep.subr.bf16.mxu1 %v6776_v19 }
 0x421   : > { %5898 = vmatmul.mubr.msk.bf16.vlgmr.msra.gmra.mxu1 %vm3280_vm3, %v3634_v41  ;;  %v6580_v41 = vld [vmem:[%s8728_s5 + $0x94] ss:$8 sps:$4 sm:$0xff]  }
 0x422   : > { %5908 = vmatpush3.bf16.msra.mxu1 %v3755_v43  ;;  %5909 = vmatprep.mubr.msk.bf16.mxu1 %vm6777_vm0, %v6776_v19 }
 0x423   : > { %5919 = vmatprep.subr.bf16.mxu1 %v6776_v19 }
 0x435   : > { %v3747_v44 = vpop.xlane.xlu1 %3746 }
 0x436   : > { %6752 = vrcp.f32 %v3747_v44  ;;  %v6578_v44 = vld [vmem:[%s8728_s5 + $0x90] ss:$8 sps:$4 sm:$0xff]  }
 0x439   : > { %v3859_v45 = vpop.xlane.xlu1 %3858 }
 0x43a   : > { %6754 = vrcp.f32 %v3859_v45 }
 0x440   : > { %v3975_v47 = vpop.xlane.xlu1 %3974 }
 0x441   : > { %6756 = vrcp.f32 %v3975_v47  ;;  %v6583_v47 = vld [vmem:[%s8728_s5 + $0x84] ss:$8 sps:$4 sm:$0xff]  }
 0x443   : > { %v6753_v48 = vpop.eup %6752 }
 0x444   : > { %v3749_v51 = vmul.f32 %v6753_v48, %v8198_v49  ;;  %v3865_v54 = vpop.permute.xlu1 %3864  ;;  %v6538_v49 = vld [vmem:[%s8728_s5 + $0x74] ss:$8 sps:$4 sm:$0xff]  }
 0x445   : > { %v3870_v57 = vsel %vm3296_vm2, %v3865_v54, 0  ;;  %4605 = vmatprep.subr.bf16.mxu0 %v6538_v49  ;;  %v6610_v49 = vld [vmem:[%s8728_s5 + $0x1f4] ss:$8 sps:$4 sm:$0xff]  }
 0x446   : > { %v3750_v11 = vpack.c.bf16 %v3749_v51, %v3749_v51  ;;  %4606 = vmatpush1.bf16.msra.mxu0 %v6536_v14  ;;  %v6581_v51 = vld [vmem:[%s8728_s5 + $0x80] ss:$8 sps:$4 sm:$0xff]   ;;  %v6608_v14 = vld [vmem:[%s8728_s5 + $0x1f0] ss:$8 sps:$4 sm:$0xff]  }
 0x447   : > { %v6755_v55 = vpop.eup %6754 }
 0x448   : > { %5910 = vmatmul.mubr.msk.bf16.vlgmr.msra.gmra.mxu1 %vm3280_vm3, %v3750_v11  ;;  %v4087_v42 = vpop.xlane.xlu0 %4086  ;;  %v3861_v58 = vmul.f32 %v6755_v55, %v8202_v13  ;;  %v4093_v22 = vpop.permute.xlu1 %4092  ;;  %v6542_v13 = vld [vmem:[%s8728_s5 + $0x50] ss:$8 sps:$4 sm:$0xff]  }
 0x449   : > { %5920 = vmatpush3.bf16.msra.mxu1 %v3870_v57  ;;  %5921 = vmatprep.mubr.msk.bf16.mxu1 %vm6777_vm0, %v6776_v19  ;;  %6758 = vrcp.f32 %v4087_v42  ;;  %v4098_v63 = vsel %vm3296_vm2, %v4093_v22, 0  ;;  %v6584_v57 = vld [vmem:[%s8728_s5 + $0x170] ss:$8 sps:$4 sm:$0xff]   ;;  %v6586_v42 = vld [vmem:[%s8728_s5 + $0x174] ss:$8 sps:$4 sm:$0xff]  }
 0x44a   : > { %5931 = vmatprep.subr.bf16.mxu1 %v6776_v19  ;;  %v3862_v59 = vpack.c.bf16 %v3861_v58, %v3861_v58  ;;  %v6595_v22 = vld [vmem:[%s8728_s5 + $0x144] ss:$8 sps:$4 sm:$0xff]  }
 0x44e   : > { %v6757_v56 = vpop.eup %6756 }
 0x44f   : > { %v3977_v15 = vmul.f32 %v6757_v56, %v8206_v16  ;;  %v6550_v16 = vld [vmem:[%s8728_s5 + $0x34] ss:$8 sps:$4 sm:$0xff]   ;;  %v6587_v56 = vld [vmem:[%s8728_s5 + $0x160] ss:$8 sps:$4 sm:$0xff]  }
 0x450   : > { %5922 = vmatmul.mubr.msk.bf16.vlgmr.msra.gmra.mxu1 %vm3280_vm3, %v3862_v59  ;;  %v6589_v59 = vld [vmem:[%s8728_s5 + $0x164] ss:$8 sps:$4 sm:$0xff]  }
 0x451   : > { %5932 = vmatpush3.bf16.msra.mxu1 %v3983_v60  ;;  %5933 = vmatprep.mubr.msk.bf16.mxu1 %vm6777_vm0, %v6776_v19  ;;  %v3978_v61 = vpack.c.bf16 %v3977_v15, %v3977_v15  ;;  %v6592_v60 = vld [vmem:[%s8728_s5 + $0x154] ss:$8 sps:$4 sm:$0xff]   ;;  %v6590_v15 = vld [vmem:[%s8728_s5 + $0x150] ss:$8 sps:$4 sm:$0xff]  }
 0x452   : > { %5943 = vmatprep.subr.bf16.mxu1 %v6776_v19 }
 0x456   : > { %v6759_v62 = vpop.eup %6758 }
 0x457   : > { %v4089_v0 = vmul.f32 %v6759_v62, %v8214_v23  ;;  %v6554_v23 = vld [vmem:[%s8728_s5 + $0x10] ss:$8 sps:$4 sm:$0xff]   ;;  %v6598_v62 = vld [vmem:[%s8728_s5 + $0x134] ss:$8 sps:$4 sm:$0xff]  }
 0x458   : > { %5934 = vmatmul.mubr.msk.bf16.vlgmr.msra.gmra.mxu1 %vm3280_vm3, %v3978_v61  ;;  %v6593_v61 = vld [vmem:[%s8728_s5 + $0x140] ss:$8 sps:$4 sm:$0xff]  }
 0x459   : > { %5944 = vmatpush3.bf16.msra.mxu1 %v4098_v63  ;;  %5945 = vmatprep.mubr.msk.bf16.mxu1 %vm6777_vm0, %v6776_v19  ;;  %v4090_v1 = vpack.c.bf16 %v4089_v0, %v4089_v0  ;;  %v6541_v19 = vld [vmem:[%s8728_s5 + $0x64] ss:$8 sps:$4 sm:$0xff]   ;;  %v6596_v63 = vld [vmem:[%s8728_s5 + $0x130] ss:$8 sps:$4 sm:$0xff]  }
 0x45a   : > { %4607 = vmatprep.subr.bf16.mxu0 %v6541_v19  ;;  %4646 = vmatprep.subr.bf16.mxu1 %v6586_v42  ;;  %v6601_v0 = vld [vmem:[%s8728_s5 + $0x124] ss:$8 sps:$4 sm:$0xff]  }
 0x45b   : > { %4608 = vmatpush1.bf16.msra.mxu0 %v6539_v7  ;;  %v6613_v19 = vld [vmem:[%s8728_s5 + $0x1e4] ss:$8 sps:$4 sm:$0xff]  }
 0x45c   : > { %4609 = vmatprep.subr.bf16.mxu0 %v6544_v10  ;;  %v6611_v10 = vld [vmem:[%s8728_s5 + $0x1e0] ss:$8 sps:$4 sm:$0xff]  }
 0x45d   : > { %v6765_v42 = vld [vmem:[%s6986_s16 + $0x8] sm:$0xff] }
 0x45f   : > { %4610 = vmatpush1.bf16.msra.mxu0 %v6542_v13 }
 0x460   : > { %5946 = vmatmul.mubr.msk.bf16.vlgmr.msra.gmra.mxu1 %vm3280_vm3, %v4090_v1  ;;  %4611 = vmatprep.subr.bf16.mxu0 %v6547_v12  ;;  %v6599_v1 = vld [vmem:[%s8728_s5 + $0x120] ss:$8 sps:$4 sm:$0xff]   ;;  %v6616_v12 = vld [vmem:[%s8728_s5 + $0x1d4] ss:$8 sps:$4 sm:$0xff]  }
 0x461   : > { %4647 = vmatpush1.bf16.msra.mxu1 %v6584_v57 }
 0x462   : > { %4648 = vmatprep.subr.bf16.mxu1 %v6589_v59 }
 0x463   : > { %4612 = vmatpush1.bf16.msra.mxu0 %v6545_v52 }
 0x464   : > { %4613 = vmatprep.subr.bf16.mxu0 %v6550_v16  ;;  %v6614_v16 = vld [vmem:[%s8728_s5 + $0x1d0] ss:$8 sps:$4 sm:$0xff]  }
 0x465   : > { %4649 = vmatpush1.bf16.msra.mxu1 %v6587_v56 }
 0x466   : > { %4650 = vmatprep.subr.bf16.mxu1 %v6592_v60 }
 0x467   : > { %4614 = vmatpush1.bf16.msra.mxu0 %v6548_v17 }
 0x468   : > { %4615 = vmatprep.subr.bf16.mxu0 %v6553_v18 }
 0x469   : > { %4651 = vmatpush1.bf16.msra.mxu1 %v6590_v15 }
 0x46a   : > { %4652 = vmatprep.subr.bf16.mxu1 %v6595_v22 }
 0x46b   : > { %4616 = vmatpush1.bf16.msra.mxu0 %v6551_v20 }
 0x46c   : > { %4617 = vmatprep.subr.bf16.mxu0 %v6556_v21  ;;  %v6619_v21 = vld [vmem:[%s8728_s5 + $0x1c4] ss:$8 sps:$4 sm:$0xff]  }
 0x46d   : > { %4653 = vmatpush1.bf16.msra.mxu1 %v6593_v61 }
 0x46e   : > { %4654 = vmatprep.subr.bf16.mxu1 %v6598_v62 }
 0x46f   : > { %4618 = vmatpush1.bf16.msra.mxu0 %v6554_v23 }
 0x470   : > { %4619 = vmatprep.subr.bf16.mxu0 %v6559_v24  ;;  %v6617_v24 = vld [vmem:[%s8728_s5 + $0x1c0] ss:$8 sps:$4 sm:$0xff]  }
 0x471   : > { %4655 = vmatpush1.bf16.msra.mxu1 %v6596_v63 }
 0x472   : > { %4656 = vmatprep.subr.bf16.mxu1 %v6601_v0 }
 0x473   : > { %4620 = vmatpush1.bf16.msra.mxu0 %v6557_v27 }
 0x474   : > { %4621 = vmatprep.subr.bf16.mxu0 %v6562_v29 }
 0x475   : > { %4657 = vmatpush1.bf16.msra.mxu1 %v6599_v1 }
 0x477   : > { %4622 = vmatpush2.bf16.msra.mxu0 %v6560_v28  ;;  %v6622_v28 = vld [vmem:[%s8728_s5 + $0x1b4] ss:$8 sps:$4 sm:$0xff]  }
 0x478   : > { %4623 = vmatprep.subr.bf16.mxu0 %v6565_v30  ;;  %v6620_v30 = vld [vmem:[%s8728_s5 + $0x1b0] ss:$8 sps:$4 sm:$0xff]  }
 0x47b   : > { %v3334_v2 = vpop.f32.mrf.mxu1  ;;  %4624 = vmatpush2.bf16.msra.mxu0 %v6563_v31  ;;  %v6625_v31 = vld [vmem:[%s8728_s5 + $0x1a4] ss:$8 sps:$4 sm:$0xff]  }
 0x47c   : > { %3340 = vst.msk [vmem:[#allocation2] sm:$0xff] %vm3232_vm1, %v3334_v2  ;;  %4625 = vmatprep.subr.bf16.mxu0 %v6568_v32  ;;  %v6604_v2 = vld [vmem:[%s8728_s5 + $0x114] ss:$8 sps:$4 sm:$0xff]  }
 0x47d   : > { %v5863_v3 = vpop.f32.mrf.mxu1  ;;  %4658 = vmatprep.subr.bf16.mxu1 %v6604_v2  ;;  %v6766_v2 = vld [vmem:[%s6986_s16 + $0x18] sm:$0xff] }
 0x47e   : > { %v6602_v3 = vld [vmem:[%s8728_s5 + $0x110] ss:$8 sps:$4 sm:$0xff]  }
 0x47f   : > { %v3337_v5 = vpop.f32.mrf.mxu1  ;;  %4626 = vmatpush2.bf16.msra.mxu0 %v6566_v8  ;;  %4659 = vmatpush1.bf16.msra.mxu1 %v6602_v3  ;;  %v6623_v8 = vld [vmem:[%s8728_s5 + $0x1a0] ss:$8 sps:$4 sm:$0xff]  }
 0x480   : > { %4627 = vmatprep.subr.bf16.mxu0 %v6571_v33  ;;  %v6607_v5 = vld [vmem:[%s8728_s5 + $0x104] ss:$8 sps:$4 sm:$0xff]   ;;  %v6628_v33 = vld [vmem:[%s8728_s5 + $0x194] ss:$8 sps:$4 sm:$0xff]  }
 0x481   : > { %v5864_v6 = vpop.f32.mrf.mxu1  ;;  %4660 = vmatprep.subr.bf16.mxu1 %v6607_v5 }
 0x482   : > { %v6605_v6 = vld [vmem:[%s8728_s5 + $0x100] ss:$8 sps:$4 sm:$0xff]  }
 0x483   : > { %4628 = vmatpush2.bf16.msra.mxu0 %v6569_v34  ;;  %4661 = vmatpush1.bf16.msra.mxu1 %v6605_v6 }
 0x484   : > { %4629 = vmatprep.subr.bf16.mxu0 %v6574_v9  ;;  %4662 = vmatprep.subr.bf16.mxu1 %v6610_v49 }
 0x487   : > { %4630 = vmatpush2.bf16.msra.mxu0 %v6572_v36  ;;  %4663 = vmatpush2.bf16.msra.mxu1 %v6608_v14 }
 0x488   : > { %4631 = vmatprep.subr.bf16.mxu0 %v6577_v38  ;;  %4664 = vmatprep.subr.bf16.mxu1 %v6613_v19  ;;  %v6629_v38 = vld [vmem:[%s8728_s5 + $0x180] ss:$8 sps:$4 sm:$0xff]  }
 0x48b   : > { %4632 = vmatpush2.bf16.msra.mxu0 %v6575_v4  ;;  %4665 = vmatpush2.bf16.msra.mxu1 %v6611_v10 }
 0x48c   : > { %4633 = vmatprep.subr.bf16.mxu0 %v6580_v41  ;;  %4666 = vmatprep.subr.bf16.mxu1 %v6616_v12 }
 0x48f   : > { %4634 = vmatpush2.bf16.msra.mxu0 %v6578_v44  ;;  %4667 = vmatpush2.bf16.msra.mxu1 %v6614_v16 }
 0x490   : > { %4635 = vmatprep.subr.bf16.mxu0 %v6583_v47  ;;  %4668 = vmatprep.subr.bf16.mxu1 %v6619_v21  ;;  %v6635_v21 = vld [vmem:[%s8730_s7 + $0xe8] ss:$16 sps:$4 sm:$0xff]  }
 0x493   : > { %4636 = vmatpush2.bf16.msra.mxu0 %v6581_v51  ;;  %4669 = vmatpush2.bf16.msra.mxu1 %v6617_v24  ;;  %v4179_v51 = vld [vmem:[%s8727_s4] sm:$0xf]  ;;  %v6640_v24 = vld [vmem:[%s8730_s7 + $0xc4] ss:$16 sps:$4 sm:$0xff]  }
 0x494   : > { %4670 = vmatprep.subr.bf16.mxu1 %v6622_v28  ;;  %v4184_v57 = vrot.slane %v4179_v51, %v7664_v25  ;;  %v4188_v59 = vrot.slane %v4179_v51, %v7667_v26  ;;  %v4196_v5 = vrot.slane %v4179_v51, %v7874_v53  ;;  %v6638_v28 = vld [vmem:[%s8730_s7 + $0xc0] ss:$16 sps:$4 sm:$0xff]  }
 0x497   : > { %4671 = vmatpush2.bf16.msra.mxu1 %v6620_v30  ;;  %v6646_v30 = vld [vmem:[%s8730_s7 + $0xa4] ss:$16 sps:$4 sm:$0xff]  }
 0x498   : > { %4672 = vmatprep.subr.bf16.mxu1 %v6625_v31  ;;  %v6649_v31 = vld [vmem:[%s8730_s7 + $0xac] ss:$16 sps:$4 sm:$0xff]  }
 0x49b   : > { %4673 = vmatpush2.bf16.msra.mxu1 %v6623_v8  ;;  %v6647_v8 = vld [vmem:[%s8730_s7 + $0xa8] ss:$16 sps:$4 sm:$0xff]  }
 0x49c   : > { %4674 = vmatprep.subr.bf16.mxu1 %v6628_v33  ;;  %v6652_v33 = vld [vmem:[%s8730_s7 + $0x84] ss:$16 sps:$4 sm:$0xff]  }
 0x4d1   : > { %v3449_v37 = vpop.f32.mrf.mxu1 }
 0x4d2   : > { %3456 = vrot.lane.b32.xlu1 %v3449_v37, %s6778_s28 }
 0x4d3   : > { %v5875_v35 = vpop.f32.mrf.mxu1 }
 0x4d4   : > { %v6626_v35 = vld [vmem:[%s8728_s5 + $0x190] ss:$8 sps:$4 sm:$0xff]  }
 0x4d5   : > { %v3452_v39 = vpop.f32.mrf.mxu1  ;;  %4675 = vmatpush2.bf16.msra.mxu1 %v6626_v35  ;;  %v6653_v35 = vld [vmem:[%s8730_s7 + $0x88] ss:$16 sps:$4 sm:$0xff]  }
 0x4d6   : > { %v6631_v39 = vld [vmem:[%s8728_s5 + $0x184] ss:$8 sps:$4 sm:$0xff]  }
 0x4d7   : > { %v5876_v50 = vpop.f32.mrf.mxu1  ;;  %4676 = vmatprep.subr.bf16.mxu1 %v6631_v39  ;;  %v6658_v39 = vld [vmem:[%s8730_s7 + $0x64] ss:$16 sps:$4 sm:$0xff]  }
 0x4d9   : > { %v3563_v40 = vpop.f32.mrf.mxu1  ;;  %4677 = vmatpush2.bf16.msra.mxu1 %v6629_v38  ;;  %v6659_v38 = vld [vmem:[%s8730_s7 + $0x68] ss:$16 sps:$4 sm:$0xff]  }
 0x4da   : > { %3569 = vst.msk [vmem:[#allocation2 + $0x8] sm:$0xff] %vm3232_vm1, %v3563_v40 }
 0x4db   : > { %v5887_v43 = vpop.f32.mrf.mxu1 }
 0x4dc   : > { %v4153_v43 = vld [vmem:[%s8726_s3] sm:$0xf] }
 0x4dd   : > { %v3566_v45 = vpop.f32.mrf.mxu1  ;;  %v4170_v0 = vrot.slane %v4153_v43, %v7874_v53  ;;  %v4166_v49 = vrot.slane %v4153_v43, %v7862_v46 }
 0x4de   : > { %v6764_v45 = vld [vmem:[%s6986_s16] sm:$0xff] }
 0x4df   : > { %v5888_v48 = vpop.f32.mrf.mxu1 }
 0x4e0   : > { %v4158_v48 = vrot.slane %v4153_v43, %v7664_v25 }
 0x4e1   : > { %v3678_v54 = vpop.f32.mrf.mxu1 }
 0x4e2   : > { %3685 = vrot.lane.b32.xlu1 %v3678_v54, %s6778_s28  ;;  %v4162_v54 = vrot.slane %v4153_v43, %v7667_v26  ;;  %v6670_v43 = vld [vmem:[%s8730_s7 + $0x24] ss:$16 sps:$4 sm:$0xff]  }
 0x4e3   : > { %v5899_v11 = vpop.f32.mrf.mxu1 }
 0x4e5   : > { %v3681_v55 = vpop.f32.mrf.mxu1 }
 0x4e7   : > { %v5900_v58 = vpop.f32.mrf.mxu1 }
 0x508   : > { %v3791_v7 = vpop.f32.mrf.mxu1 }
 0x509   : > { %3797 = vst.msk [vmem:[#allocation2 + $0x10] sm:$0xff] %vm3232_vm1, %v3791_v7  ;;  %v6767_v7 = vld [vmem:[%s6986_s16 + $0x10] sm:$0xff] }
 0x50a   : > { %v5911_v13 = vpop.f32.mrf.mxu1 }
 0x50b   : > { %v4192_v13 = vrot.slane %v4179_v51, %v7862_v46  ;;  %v6679_v51 = vld [vmem:[%s8730_s7 + $0xc] ss:$16 sps:$4 sm:$0xff]  }
 0x50c   : > { %v3794_v52 = vpop.f32.mrf.mxu1 }
 0x50e   : > { %v5912_v17 = vpop.f32.mrf.mxu1 }
 0x510   : > { %v3906_v18 = vpop.f32.mrf.mxu1 }
 0x512   : > { %v5923_v20 = vpop.f32.mrf.mxu1 }
 0x513   : > { %v6634_v20 = vld [vmem:[%s8730_s7 + $0xe4] ss:$16 sps:$4 sm:$0xff]  }
 0x514   : > { %v3909_v23 = vpop.f32.mrf.mxu1  ;;  %5111 = vmatprep.subr.bf16.mxu0 %v6634_v20  ;;  %v6721_v20 = vld [vmem:[%s8730_s7 + $0x12c] ss:$16 sps:$4 sm:$0xff]  }
 0x515   : > { %v6637_v23 = vld [vmem:[%s8730_s7 + $0xec] ss:$16 sps:$4 sm:$0xff]  }
 0x516   : > { %v5924_v27 = vpop.f32.mrf.mxu1  ;;  %5152 = vmatprep.subr.bf16.mxu1 %v6637_v23  ;;  %v6719_v23 = vld [vmem:[%s8730_s7 + $0x128] ss:$16 sps:$4 sm:$0xff]  }
 0x517   : > { %v6643_v27 = vld [vmem:[%s8730_s7 + $0xcc] ss:$16 sps:$4 sm:$0xff]  }
 0x518   : > { %v4019_v29 = vpop.f32.mrf.mxu1 }
 0x519   : > { %4025 = vst.msk [vmem:[#allocation2 + $0x18] sm:$0xff] %vm3232_vm1, %v4019_v29  ;;  %v6641_v29 = vld [vmem:[%s8730_s7 + $0xc8] ss:$16 sps:$4 sm:$0xff]  }
 0x51a   : > { %v5935_v32 = vpop.f32.mrf.mxu1 }
 0x51b   : > { %v6644_v32 = vld [vmem:[%s8730_s7 + $0xa0] ss:$16 sps:$4 sm:$0xff]  }
 0x51c   : > { %v4022_v34 = vpop.f32.mrf.mxu1 }
 0x51d   : > { %v6655_v34 = vld [vmem:[%s8730_s7 + $0x8c] ss:$16 sps:$4 sm:$0xff]  }
 0x51e   : > { %v5936_v37 = vpop.f32.mrf.mxu1 }
 0x51f   : > { %v6650_v37 = vld [vmem:[%s8730_s7 + $0x80] ss:$16 sps:$4 sm:$0xff]  }
 0x520   : > { %v4134_v36 = vpop.f32.mrf.mxu1 }
 0x521   : > { %4141 = vrot.lane.b32.xlu1 %v4134_v36, %s6778_s28  ;;  %v6661_v36 = vld [vmem:[%s8730_s7 + $0x6c] ss:$16 sps:$4 sm:$0xff]  }
 0x522   : > { %v5947_v9 = vpop.f32.mrf.mxu1 }
 0x523   : > { %v6656_v9 = vld [vmem:[%s8730_s7 + $0x60] ss:$16 sps:$4 sm:$0xff]  }
 0x524   : > { %v4137_v50 = vpop.f32.mrf.mxu1 }
 0x525   : > { %3913 = vrot.lane.b32.xlu1 %v3906_v18, %s6778_s28  ;;  %v6632_v18 = vld [vmem:[%s8730_s7 + $0xe0] ss:$16 sps:$4 sm:$0xff]   ;;  %v6664_v50 = vld [vmem:[%s8730_s7 + $0x44] ss:$16 sps:$4 sm:$0xff]  }
 0x526   : > { %v5948_v4 = vpop.f32.mrf.mxu1 }
 0x527   : > { %v6667_v4 = vld [vmem:[%s8730_s7 + $0x4c] ss:$16 sps:$4 sm:$0xff]  }
 0x544   : > { %v3457_v40 = vpop.permute.xlu1 %3456 }
 0x545   : > { %3460 = vst.msk [vmem:[#allocation2] sm:$0xff] %vm3459_vm4, %v3457_v40  ;;  %v6662_v40 = vld [vmem:[%s8730_s7 + $0x40] ss:$16 sps:$4 sm:$0xff]  }
 0x54c   : > { %v4145_v44 = vld [vmem:[#allocation2] sm:$0xff] }
 0x54d   : > { %v4149_v47 = vadd.f32 %v6764_v45, %v4145_v44  ;;  %v6673_v44 = vld [vmem:[%s8730_s7 + $0x2c] ss:$16 sps:$4 sm:$0xff]   ;;  %v6668_v45 = vld [vmem:[%s8730_s7 + $0x20] ss:$16 sps:$4 sm:$0xff]  }
 0x54f   : > { %v4175_v55 = vmul.f32 %v4158_v48, %v4149_v47  ;;  %v6671_v47 = vld [vmem:[%s8730_s7 + $0x28] ss:$16 sps:$4 sm:$0xff]   ;;  %v6676_v48 = vld [vmem:[%s8730_s7 + $0x4] ss:$16 sps:$4 sm:$0xff]  }
 0x551   : > { %v8476_v60 = vadd.f32 %v4184_v57, %v4175_v55  ;;  %v6682_v55 = vld [vmem:[%s8730_s7 + $0x1e4] ss:$16 sps:$4 sm:$0xff]   ;;  %v6685_v57 = vld [vmem:[%s8730_s7 + $0x1ec] ss:$16 sps:$4 sm:$0xff]  }
 0x553   : > { %v4205_v61 = vpack.c.bf16 %v8476_v60, %v8476_v60 }
 0x554   : > { %v3686_v41 = vpop.permute.xlu1 %3685 }
 0x555   : > { %3688 = vst.msk [vmem:[#allocation2 + $0x8] sm:$0xff] %vm3459_vm4, %v3686_v41  ;;  %v6665_v41 = vld [vmem:[%s8730_s7 + $0x48] ss:$16 sps:$4 sm:$0xff]  }
 0x55c   : > { %v4146_v11 = vld [vmem:[#allocation2 + $0x8] sm:$0xff] }
 0x55d   : > { %v4150_v58 = vadd.f32 %v6765_v42, %v4146_v11  ;;  %v6677_v11 = vld [vmem:[%s8730_s7 + $0x8] ss:$16 sps:$4 sm:$0xff]   ;;  %v6680_v42 = vld [vmem:[%s8730_s7 + $0x1e0] ss:$16 sps:$4 sm:$0xff]  }
 0x55f   : > { %v4176_v56 = vmul.f32 %v4162_v54, %v4150_v58  ;;  %v6674_v54 = vld [vmem:[%s8730_s7] ss:$16 sps:$4 sm:$0xff]   ;;  %v6683_v58 = vld [vmem:[%s8730_s7 + $0x1e8] ss:$16 sps:$4 sm:$0xff]  }
 0x561   : > { %v8478_v15 = vadd.f32 %v4188_v59, %v4176_v56  ;;  %v6688_v59 = vld [vmem:[%s8730_s7 + $0x1c4] ss:$16 sps:$4 sm:$0xff]   ;;  %v6691_v56 = vld [vmem:[%s8730_s7 + $0x1cc] ss:$16 sps:$4 sm:$0xff]  }
 0x563   : > { %v4206_v22 = vpack.c.bf16 %v8478_v15, %v8478_v15 }
 0x565   : > { %4637 = vmatprep.mubr.bf16.mxu0 %v4206_v22  ;;  %v6686_v22 = vld [vmem:[%s8730_s7 + $0x1c0] ss:$16 sps:$4 sm:$0xff]  }
 0x566   : > { %4638 = vmatmul.mubr.bf16.vlgmr.msra.gmra.mxu0 %v4205_v61  ;;  %v6689_v61 = vld [vmem:[%s8730_s7 + $0x1c8] ss:$16 sps:$4 sm:$0xff]  }
 0x567   : > { %5112 = vmatpush1.bf16.msra.mxu0 %v6632_v18  ;;  %v6718_v18 = vld [vmem:[%s8730_s7 + $0x124] ss:$16 sps:$4 sm:$0xff]  }
 0x568   : > { %5113 = vmatprep.subr.bf16.mxu0 %v6640_v24  ;;  %v6722_v24 = vld [vmem:[%s8730_s7 + $0x100] ss:$16 sps:$4 sm:$0xff]  }
 0x56b   : > { %5114 = vmatpush1.bf16.msra.mxu0 %v6638_v28  ;;  %v6725_v28 = vld [vmem:[%s8730_s7 + $0x108] ss:$16 sps:$4 sm:$0xff]  }
 0x56c   : > { %5115 = vmatprep.subr.bf16.mxu0 %v6646_v30 }
 0x56f   : > { %5116 = vmatpush1.bf16.msra.mxu0 %v6644_v32 }
 0x570   : > { %5117 = vmatprep.subr.bf16.mxu0 %v6652_v33  ;;  %v4273_v33 = vld [vmem:[%s8729_s6] sm:$0x3] }
 0x573   : > { %5118 = vmatpush1.bf16.msra.mxu0 %v6650_v37  ;;  %v4282_v37 = vrot.slane %v4273_v33, %v7667_v26 }
 0x574   : > { %5119 = vmatprep.subr.bf16.mxu0 %v6658_v39 }
 0x577   : > { %5120 = vmatpush1.bf16.msra.mxu0 %v6656_v9 }
 0x578   : > { %5121 = vmatprep.subr.bf16.mxu0 %v6664_v50 }
 0x57b   : > { %5122 = vmatpush1.bf16.msra.mxu0 %v6662_v40 }
 0x57c   : > { %5123 = vmatprep.subr.bf16.mxu0 %v6670_v43 }
 0x57f   : > { %5124 = vmatpush1.bf16.msra.mxu0 %v6668_v45 }
 0x580   : > { %5125 = vmatprep.subr.bf16.mxu0 %v6676_v48 }
 0x583   : > { %5126 = vmatpush1.bf16.msra.mxu0 %v6674_v54 }
 0x584   : > { %5127 = vmatprep.subr.bf16.mxu0 %v6682_v55 }
 0x587   : > { %5128 = vmatpush2.bf16.msra.mxu0 %v6680_v42 }
 0x588   : > { %5129 = vmatprep.subr.bf16.mxu0 %v6688_v59 }
 0x58b   : > { %5130 = vmatpush2.bf16.msra.mxu0 %v6686_v22  ;;  %v5193_v22 = vld [vmem:[%s8732_s9] sm:$0xf] }
 0x593   : > { %v4142_v62 = vpop.permute.xlu1 %4141 }
 0x594   : > { %4144 = vst.msk [vmem:[#allocation2 + $0x18] sm:$0xff] %vm3459_vm4, %v4142_v62  ;;  %v6694_v62 = vld [vmem:[%s8730_s7 + $0x1a4] ss:$16 sps:$4 sm:$0xff]  }
 0x595   : > { %5131 = vmatprep.subr.bf16.mxu0 %v6694_v62 }
 0x597   : > { %v3914_v63 = vpop.permute.xlu1 %3913 }
 0x598   : > { %3916 = vst.msk [vmem:[#allocation2 + $0x10] sm:$0xff] %vm3459_vm4, %v3914_v63  ;;  %v6697_v63 = vld [vmem:[%s8730_s7 + $0x1ac] ss:$16 sps:$4 sm:$0xff]  }
 0x59b   : > { %v4148_v1 = vld [vmem:[#allocation2 + $0x18] sm:$0xff] }
 0x59c   : > { %v4152_v3 = vadd.f32 %v6766_v2, %v4148_v1  ;;  %v6695_v1 = vld [vmem:[%s8730_s7 + $0x1a8] ss:$16 sps:$4 sm:$0xff]   ;;  %v6700_v2 = vld [vmem:[%s8730_s7 + $0x184] ss:$16 sps:$4 sm:$0xff]  }
 0x59e   : > { %v4178_v6 = vmul.f32 %v4170_v0, %v4152_v3  ;;  %v6692_v0 = vld [vmem:[%s8730_s7 + $0x1a0] ss:$16 sps:$4 sm:$0xff]   ;;  %v6703_v3 = vld [vmem:[%s8730_s7 + $0x18c] ss:$16 sps:$4 sm:$0xff]  }
 0x59f   : > { %v4147_v14 = vld [vmem:[#allocation2 + $0x10] sm:$0xff]  ;;  %5132 = vmatpush2.bf16.msra.mxu0 %v6692_v0  ;;  %v5198_v0 = vrot.slane %v5193_v22, %v7664_v25 }
 0x5a0   : > { %v8490_v19 = vadd.f32 %v4196_v5, %v4178_v6  ;;  %v4151_v10 = vadd.f32 %v6767_v7, %v4147_v14  ;;  %v6698_v5 = vld [vmem:[%s8730_s7 + $0x180] ss:$16 sps:$4 sm:$0xff]   ;;  %v6701_v6 = vld [vmem:[%s8730_s7 + $0x188] ss:$16 sps:$4 sm:$0xff]   ;;  %5133 = vmatprep.subr.bf16.mxu0 %v6700_v2  ;;  %v6709_v14 = vld [vmem:[%s8730_s7 + $0x16c] ss:$16 sps:$4 sm:$0xff]   ;;  %v5206_v2 = vrot.slane %v5193_v22, %v7862_v46 }
 0x5a1   : > { %v6704_v7 = vld [vmem:[%s8730_s7 + $0x160] ss:$16 sps:$4 sm:$0xff]  }
 0x5a2   : > { %v4208_v12 = vpack.c.bf16 %v8490_v19, %v8490_v19  ;;  %v4177_v52 = vmul.f32 %v4166_v49, %v4151_v10  ;;  %v6706_v49 = vld [vmem:[%s8730_s7 + $0x164] ss:$16 sps:$4 sm:$0xff]   ;;  %v6707_v10 = vld [vmem:[%s8730_s7 + $0x168] ss:$16 sps:$4 sm:$0xff]  }
 0x5a3   : > { %5134 = vmatpush2.bf16.msra.mxu0 %v6698_v5 }
 0x5a4   : > { %4678 = vmatprep.mubr.bf16.mxu1 %v4208_v12  ;;  %v8496_v16 = vadd.f32 %v4192_v13, %v4177_v52  ;;  %5135 = vmatprep.subr.bf16.mxu0 %v6706_v49  ;;  %v6712_v13 = vld [vmem:[%s8730_s7 + $0x144] ss:$16 sps:$4 sm:$0xff]   ;;  %v6715_v12 = vld [vmem:[%s8730_s7 + $0x14c] ss:$16 sps:$4 sm:$0xff]   ;;  %v6710_v52 = vld [vmem:[%s8730_s7 + $0x140] ss:$16 sps:$4 sm:$0xff]  }
 0x5a6   : > { %v4207_v17 = vpack.c.bf16 %v8496_v16, %v8496_v16 }
 0x5a7   : > { %5136 = vmatpush2.bf16.msra.mxu0 %v6704_v7 }
 0x5a8   : > { %4679 = vmatmul.mubr.bf16.vlgmr.msra.gmra.mxu1 %v4207_v17  ;;  %v6713_v17 = vld [vmem:[%s8730_s7 + $0x148] ss:$16 sps:$4 sm:$0xff]   ;;  %5137 = vmatprep.subr.bf16.mxu0 %v6712_v13  ;;  %v5210_v13 = vrot.slane %v5193_v22, %v7874_v53 }
 0x5a9   : > { %5153 = vmatpush1.bf16.msra.mxu1 %v6635_v21  ;;  %v6716_v21 = vld [vmem:[%s8730_s7 + $0x120] ss:$16 sps:$4 sm:$0xff]  }
 0x5aa   : > { %5154 = vmatprep.subr.bf16.mxu1 %v6643_v27  ;;  %v6724_v27 = vld [vmem:[%s8730_s7 + $0x104] ss:$16 sps:$4 sm:$0xff]  }
 0x5ab   : > { %5138 = vmatpush2.bf16.msra.mxu0 %v6710_v52 }
 0x5ac   : > { %5139 = vmatprep.subr.bf16.mxu0 %v6718_v18 }
 0x5ad   : > { %5155 = vmatpush1.bf16.msra.mxu1 %v6641_v29  ;;  %v6727_v29 = vld [vmem:[%s8730_s7 + $0x10c] ss:$16 sps:$4 sm:$0xff]  }
 0x5ae   : > { %5156 = vmatprep.subr.bf16.mxu1 %v6649_v31 }
 0x5af   : > { %5140 = vmatpush2.bf16.msra.mxu0 %v6716_v21 }
 0x5b0   : > { %5141 = vmatprep.subr.bf16.mxu0 %v6724_v27 }
 0x5b1   : > { %5157 = vmatpush1.bf16.msra.mxu1 %v6647_v8 }
 0x5b2   : > { %5158 = vmatprep.subr.bf16.mxu1 %v6655_v34  ;;  %v4278_v34 = vrot.slane %v4273_v33, %v7664_v25 }
 0x5b3   : > { %5142 = vmatpush2.bf16.msra.mxu0 %v6722_v24 }
 0x5b5   : > { %5159 = vmatpush1.bf16.msra.mxu1 %v6653_v35 }
 0x5b6   : > { %5160 = vmatprep.subr.bf16.mxu1 %v6661_v36 }
 0x5b9   : > { %5161 = vmatpush1.bf16.msra.mxu1 %v6659_v38 }
 0x5ba   : > { %5162 = vmatprep.subr.bf16.mxu1 %v6667_v4 }
 0x5bd   : > { %5163 = vmatpush1.bf16.msra.mxu1 %v6665_v41 }
 0x5be   : > { %5164 = vmatprep.subr.bf16.mxu1 %v6673_v44 }
 0x5c1   : > { %5165 = vmatpush1.bf16.msra.mxu1 %v6671_v47 }
 0x5c2   : > { %5166 = vmatprep.subr.bf16.mxu1 %v6679_v51 }
 0x5c5   : > { %5167 = vmatpush1.bf16.msra.mxu1 %v6677_v11 }
 0x5c6   : > { %5168 = vmatprep.subr.bf16.mxu1 %v6685_v57 }
 0x5c9   : > { %5169 = vmatpush2.bf16.msra.mxu1 %v6683_v58  ;;  %v4765_v58 = vld [vmem:[%s8731_s8] sm:$0xf] }
 0x5ca   : > { %5170 = vmatprep.subr.bf16.mxu1 %v6691_v56  ;;  %v4770_v59 = vrot.slane %v4765_v58, %v7664_v25  ;;  %v4778_v56 = vrot.slane %v4765_v58, %v7862_v46  ;;  %v4782_v62 = vrot.slane %v4765_v58, %v7874_v53 }
 0x5cc   : > { %v4790_v49 = vmul.f32 %v4782_v62, %v8490_v19 }
 0x5cd   : > { %5171 = vmatpush2.bf16.msra.mxu1 %v6689_v61  ;;  %v4774_v61 = vrot.slane %v4765_v58, %v7667_v26 }
 0x5ce   : > { %5172 = vmatprep.subr.bf16.mxu1 %v6697_v63  ;;  %v4787_v63 = vmul.f32 %v4770_v59, %v8476_v60 }
 0x5d1   : > { %5173 = vmatpush2.bf16.msra.mxu1 %v6695_v1  ;;  %v4789_v1 = vmul.f32 %v4778_v56, %v8496_v16 }
 0x5d2   : > { %5174 = vmatprep.subr.bf16.mxu1 %v6703_v3 }
 0x5d5   : > { %5175 = vmatpush2.bf16.msra.mxu1 %v6701_v6  ;;  %v4788_v6 = vmul.f32 %v4774_v61, %v8478_v15 }
 0x5d6   : > { %5176 = vmatprep.subr.bf16.mxu1 %v6709_v14 }
 0x5d9   : > { %5177 = vmatpush2.bf16.msra.mxu1 %v6707_v10  ;;  %v5202_v10 = vrot.slane %v5193_v22, %v7667_v26 }
 0x5da   : > { %5178 = vmatprep.subr.bf16.mxu1 %v6715_v12 }
 0x5dd   : > { %5179 = vmatpush2.bf16.msra.mxu1 %v6713_v17 }
 0x5de   : > { %5180 = vmatprep.subr.bf16.mxu1 %v6721_v20 }
 0x5e1   : > { %5181 = vmatpush2.bf16.msra.mxu1 %v6719_v23 }
 0x5e2   : > { %5182 = vmatprep.subr.bf16.mxu1 %v6727_v29 }
 0x5e5   : > { %5183 = vmatpush2.bf16.msra.mxu1 %v6725_v28 }
 0x626   : > { %v4639_v30 = vpop.f32.mrf.mxu0 }
 0x627   : > { %v4640_v35 = vadd.f32 %v4639_v30, %v4278_v34 }
 0x628   : > { %v4641_v31 = vpop.f32.mrf.mxu0 }
 0x629   : > { %v4642_v36 = vadd.f32 %v4641_v31, %v4282_v37 }
 0x62a   : > { %v4643_v32 = vpop.f32.mrf.mxu0 }
 0x62c   : > { %v4644_v8 = vpop.f32.mrf.mxu0 }
 0x668   : > { %v4680_v39 = vpop.f32.mrf.mxu1 }
 0x669   : > { %v4681_v9 = vadd.f32 %v4680_v39, %v4640_v35 }
 0x66a   : > { %v4682_v38 = vpop.f32.mrf.mxu1 }
 0x66b   : > { %v4689_v50 = vmin.f32 %v4681_v9, 0.0  ;;  %v4683_v4 = vadd.f32 %v4682_v38, %v4642_v36  ;;  %vm4687_vm5 = vcmp.gt.f32.partialorder %v4681_v9, 0.0 }
 0x66c   : > { %v4684_v40 = vpop.f32.mrf.mxu1 }
 0x66d   : > { %v4691_v41 = vmul.f32 1.442695, %v4689_v50  ;;  %v4690_v43 = vmin.f32 %v4683_v4, 0.0  ;;  %vm4688_vm6 = vcmp.gt.f32.partialorder %v4683_v4, 0.0 }
 0x66e   : > { %v4685_v44 = vpop.f32.mrf.mxu1 }
 0x66f   : > { %6760 = vpow2.f32 %v4691_v41  ;;  %v4693_v45 = vmul.f32 1.442695, %v4690_v43 }
 0x671   : > { %6762 = vpow2.f32 %v4693_v45 }
 0x67c   : > { %v6761_v47 = vpop.eup %6760 }
 0x67d   : > { %v5751_v48 = vadd.f32 -1.0, %v6761_v47 }
 0x67e   : > { %v6763_v51 = vpop.eup %6762 }
 0x67f   : > { %v5752_v54 = vadd.f32 -1.0, %v6763_v51  ;;  %v4697_v11 = vsel %vm4687_vm5, %v4681_v9, %v5751_v48 }
 0x680   : > { %v4699_v42 = vpack.c.bf16 %v4697_v11, %v4697_v11 }
 0x681   : > { %v4698_v55 = vsel %vm4688_vm6, %v4683_v4, %v5752_v54 }
 0x682   : > { %v4700_v57 = vpack.c.bf16 %v4698_v55, %v4698_v55 }
 0x684   : > { %5143 = vmatprep.mubr.bf16.mxu0 %v4700_v57  ;;  %5184 = vmatprep.mubr.bf16.mxu1 %v4700_v57 }
 0x685   : > { %5144 = vmatmul.mubr.bf16.vlgmr.msra.gmra.mxu0 %v4699_v42  ;;  %5185 = vmatmul.mubr.bf16.vlgmr.msra.gmra.mxu1 %v4699_v42 }
 0x745   : > { %v5145_v3 = vpop.f32.mrf.mxu0  ;;  %v5186_v5 = vpop.f32.mrf.mxu1 }
 0x746   : > { %v5146_v14 = vadd.f32 %v5145_v3, %v4787_v63  ;;  %v5187_v7 = vadd.f32 %v5186_v5, %v4789_v1 }
 0x747   : > { %v5147_v25 = vpop.f32.mrf.mxu0  ;;  %v5188_v60 = vpop.f32.mrf.mxu1 }
 0x748   : > { %v5215_v46 = vadd.f32 %v5198_v0, %v5146_v14  ;;  %v5217_v16 = vadd.f32 %v5206_v2, %v5187_v7  ;;  %v5148_v12 = vadd.f32 %v5147_v25, %v4788_v6  ;;  %v5189_v52 = vadd.f32 %v5188_v60, %v4790_v49 }
 0x749   : > { %v5149_v15 = vpop.f32.mrf.mxu0  ;;  %v5190_v17 = vpop.f32.mrf.mxu1 }
 0x74a   : > { %5219 = vst [vmem:[%s359_s26] sm:$0xff] %v5215_v46  ;;  %5221 = vst [vmem:[%s359_s26 + $0x10] sm:$0xff] %v5217_v16  ;;  %v5216_v19 = vadd.f32 %v5202_v10, %v5148_v12  ;;  %v5218_v18 = vadd.f32 %v5210_v13, %v5189_v52 }
 0x74b   : > { %v5150_v26 = vpop.f32.mrf.mxu0  ;;  %v5191_v20 = vpop.f32.mrf.mxu1 }
 0x74c   : > { %5220 = vst [vmem:[%s359_s26 + $0x8] sm:$0xff] %v5216_v19  ;;  %5222 = vst [vmem:[%s359_s26 + $0x18] sm:$0xff] %v5218_v18 }
 0x74d PF: > { %s20_s13 = sadd.s32 1, %s6774_s13  }
 0x74e   : > { %p17_p4 = scmp.ge.s32.totalorder %s20_s13, 4  }
 0x750   :  { %19 = sbr.rel (!%p17_p4) target bundleno = 1 (0x1), region = 90 }

</bundles_post_ra>
